<compile_context>
chip_gen: v7x
topology: tpu7x:2x2x1
jax: 0.10.0
libtpu: 0.0.40
codegen_flags: <defaults>
</compile_context>

<pallas_src>
import jax
import jax.numpy as jnp
from jax.experimental import pallas as pl
from jax.experimental.pallas import tpu as pltpu

LATENT_DIM = 100
PAD_LATENT = 128                      # lane-aligned K for the first MXU tile
IMG_SHAPE = (3, 32, 32)
OUT_DIM = IMG_SHAPE[0] * IMG_SHAPE[1] * IMG_SHAPE[2]   # 3072
HIDDEN = 1024                         # width feeding the final Linear
TN = 512                              # output-feature tile of Linear(1024,3072)
BN_EPS = 0.8                          # nn.BatchNorm1d(out_feat, 0.8): eps
NEG_SLOPE = 0.2                       # nn.LeakyReLU(0.2)

_VMEM_PHYS_MIN = 64 * 1024 * 1024     # v7x per-TC physical VMEM (strictest)


def _leaky_relu(x):
    return jnp.where(x >= 0, x, NEG_SLOPE * x)


def _nbytes(*arrs):
    return int(sum(a.size * jnp.dtype(a.dtype).itemsize for a in arrs))


def _vmem_limit(nbytes, slack=8 * 1024 * 1024):
    limit = max(int(nbytes) + slack, 32 * 1024 * 1024)
    assert limit <= _VMEM_PHYS_MIN, (
        f"VMEM budget {limit / 2**20:.1f} MiB exceeds v7x physical 64 MiB; "
        "reduce the batch or tile the batch dimension.")
    return limit


def _trunk_kernel(z_ref,
                  w0_ref, b0_ref,
                  w1_ref, b1_ref, g1_ref, be1_ref,
                  w2_ref, b2_ref, g2_ref, be2_ref,
                  w3_ref, b3_ref, g3_ref, be3_ref,
                  h_ref):
    """Layers 0-3 fused: Linear+LReLU, then 3x (Linear + BN(eps=0.8) + LReLU)."""
    # block(latent_dim, 128, normalize=False)
    x = jnp.dot(z_ref[...].astype(jnp.bfloat16), w0_ref[...],
                preferred_element_type=jnp.float32) + b0_ref[...]
    x = _leaky_relu(x)

    def bn_block(x, w_ref, b_ref, g_ref, be_ref):
        # Linear: bf16 operands on the MXU, f32 accumulation.
        y = jnp.dot(x.astype(jnp.bfloat16), w_ref[...],
                    preferred_element_type=jnp.float32) + b_ref[...]
        # BatchNorm1d (training mode): per-feature batch mean / biased variance,
        # kept entirely in f32 (eps=0.8 is large, but precision still matters).
        mean = jnp.mean(y, axis=0, keepdims=True)
        var = jnp.mean(jnp.square(y - mean), axis=0, keepdims=True)
        y = (y - mean) * jax.lax.rsqrt(var + BN_EPS) * g_ref[...] + be_ref[...]
        return _leaky_relu(y)

    x = bn_block(x, w1_ref, b1_ref, g1_ref, be1_ref)   # block(128, 256)
    x = bn_block(x, w2_ref, b2_ref, g2_ref, be2_ref)   # block(256, 512)
    x = bn_block(x, w3_ref, b3_ref, g3_ref, be3_ref)   # block(512, 1024)

    # h is only ever consumed as an MXU operand by the head kernel -> bf16.
    h_ref[...] = x.astype(jnp.bfloat16)


def _head_kernel(h_ref, w4_ref, b4_ref, out_ref):
    """One (B, TN) column tile of Linear(1024, 3072) + tanh (lane-dense store)."""
    y = jnp.dot(h_ref[...], w4_ref[...],
                preferred_element_type=jnp.float32) + b4_ref[...]
    out_ref[...] = jnp.tanh(y)


def basic_generator(z, params):
    """z: (B, 100) f32 -> img (B, 3, 32, 32) f32."""
    B = z.shape[0]
    # Explicit zero-padding of the latent dim (w0 rows are pre-padded in params).
    z_pad = jnp.pad(z, ((0, 0), (0, PAD_LATENT - LATENT_DIM)))

    vmem = pl.BlockSpec(memory_space=pltpu.MemorySpace.VMEM)
    trunk_args = (z_pad,
                  params["w0"], params["b0"],
                  params["w1"], params["b1"], params["g1"], params["be1"],
                  params["w2"], params["b2"], params["g2"], params["be2"],
                  params["w3"], params["b3"], params["g3"], params["be3"])

    trunk_flops = 2 * B * (PAD_LATENT * 128 + 128 * 256 + 256 * 512 + 512 * HIDDEN)
    trunk_bytes = _nbytes(*trunk_args) + B * HIDDEN * 2
    h = pl.pallas_call(
        _trunk_kernel,
        out_shape=jax.ShapeDtypeStruct((B, HIDDEN), jnp.bfloat16),
        in_specs=[vmem] * len(trunk_args),
        out_specs=vmem,
        compiler_params=pltpu.CompilerParams(
            vmem_limit_bytes=_vmem_limit(trunk_bytes + 8 * B * HIDDEN * 4)),
        cost_estimate=pl.CostEstimate(
            flops=trunk_flops,
            transcendentals=256 + 512 + 1024,          # rsqrt per BN feature
            bytes_accessed=trunk_bytes),
    )(*trunk_args)

    # Head: Linear(1024, 3072) + tanh, tiled over output features. The w4 /
    # output tiles are double-buffered by BlockSpec pipelining, and the grid
    # axis is "parallel" so v7x megacore splits the 3072 columns across cores
    # (no BN after this layer -> no cross-core coupling).
    n_tiles = OUT_DIM // TN
    head_bytes = (B * HIDDEN * 2 + HIDDEN * OUT_DIM * 2 + OUT_DIM * 4
                  + B * OUT_DIM * 4)
    head_vmem = B * HIDDEN * 2 + 2 * (HIDDEN * TN * 2 + TN * 4 + B * TN * 4)
    img_flat = pl.pallas_call(
        _head_kernel,
        out_shape=jax.ShapeDtypeStruct((B, OUT_DIM), jnp.float32),
        grid=(n_tiles,),
        in_specs=[pl.BlockSpec((B, HIDDEN), lambda j: (0, 0)),   # h (resident)
                  pl.BlockSpec((HIDDEN, TN), lambda j: (0, j)),  # w4 column tile
                  pl.BlockSpec((1, TN), lambda j: (0, j))],      # b4 tile
        out_specs=pl.BlockSpec((B, TN), lambda j: (0, j)),
        compiler_params=pltpu.CompilerParams(
            dimension_semantics=("parallel",),
            vmem_limit_bytes=_vmem_limit(head_vmem)),
        cost_estimate=pl.CostEstimate(
            flops=2 * B * HIDDEN * OUT_DIM,
            transcendentals=B * OUT_DIM,               # tanh
            bytes_accessed=head_bytes),
    )(h, params["w4"], params["b4"])

    # img.view(B, *img_shape): metadata-only reshape outside the kernel.
    return img_flat.reshape(B, *IMG_SHAPE)


def init_params(key):
    """PyTorch-default-style init, already in kernel-ready layout.

    Linear weights are pre-transposed to (in, out) and stored bf16 (they only
    feed the MXU); biases / BN gamma / beta are (1, out) f32.  w0 is zero-padded
    from 100 to 128 input rows.  Loading real PyTorch weights only requires the
    same one-time transpose / pad / cast at param-prep time.
    """
    in_feats = [LATENT_DIM, 128, 256, 512, 1024]
    out_feats = [128, 256, 512, 1024, OUT_DIM]
    params = {}
    for i, (fi, fo) in enumerate(zip(in_feats, out_feats)):
        key, kw, kb = jax.random.split(key, 3)
        bound = 1.0 / float(fi) ** 0.5
        w = jax.random.uniform(kw, (fi, fo), jnp.float32, -bound, bound)
        if i == 0:
            w = jnp.pad(w, ((0, PAD_LATENT - LATENT_DIM), (0, 0)))
        params[f"w{i}"] = w.astype(jnp.bfloat16)
        params[f"b{i}"] = jax.random.uniform(kb, (1, fo), jnp.float32,
                                             -bound, bound)
    for i, fo in ((1, 256), (2, 512), (3, 1024)):
        params[f"g{i}"] = jnp.ones((1, fo), jnp.float32)    # BN weight
        params[f"be{i}"] = jnp.zeros((1, fo), jnp.float32)  # BN bias
    return params


if __name__ == "__main__":
    key = jax.random.PRNGKey(0)
    kp, kz = jax.random.split(key)
    params = init_params(kp)
    z = jax.random.normal(kz, (2, LATENT_DIM), jnp.float32)   # batch=2, latent=100

    out = jax.jit(basic_generator)(z, params)
    jax.block_until_ready(out)

    assert out.shape == (2,) + IMG_SHAPE and out.dtype == jnp.float32
    assert bool(jnp.all(jnp.isfinite(out)))
    # Tanh output must lie in [-1, 1].
    assert bool(jnp.all(jnp.abs(out) <= 1.0 + 1e-6))
    print("KERNEL_OK")
</pallas_src>

<mosaic_0001>
module attributes {stable_mosaic.version = 11 : i64} {
  func.func @_trunk_kernel(%arg0: memref<2x128xf32, #tpu.memory_space<vmem>>, %arg1: memref<128x128xbf16, #tpu.memory_space<vmem>>, %arg2: memref<1x128xf32, #tpu.memory_space<vmem>>, %arg3: memref<128x256xbf16, #tpu.memory_space<vmem>>, %arg4: memref<1x256xf32, #tpu.memory_space<vmem>>, %arg5: memref<1x256xf32, #tpu.memory_space<vmem>>, %arg6: memref<1x256xf32, #tpu.memory_space<vmem>>, %arg7: memref<256x512xbf16, #tpu.memory_space<vmem>>, %arg8: memref<1x512xf32, #tpu.memory_space<vmem>>, %arg9: memref<1x512xf32, #tpu.memory_space<vmem>>, %arg10: memref<1x512xf32, #tpu.memory_space<vmem>>, %arg11: memref<512x1024xbf16, #tpu.memory_space<vmem>>, %arg12: memref<1x1024xf32, #tpu.memory_space<vmem>>, %arg13: memref<1x1024xf32, #tpu.memory_space<vmem>>, %arg14: memref<1x1024xf32, #tpu.memory_space<vmem>>, %arg15: memref<2x1024xbf16, #tpu.memory_space<vmem>>) attributes {dimension_semantics = [], scalar_prefetch = 0 : i64, scratch_operands = 0 : i64, tpu.core_type = #tpu.core_type<tc>} {
    %c0 = arith.constant 0 : index
    %c0_0 = arith.constant 0 : index
    %0 = vector.load %arg0[%c0, %c0_0] : memref<2x128xf32, #tpu.memory_space<vmem>>, vector<2x128xf32>
    %1 = arith.truncf %0 : vector<2x128xf32> to vector<2x128xbf16>
    %c0_1 = arith.constant 0 : index
    %c0_2 = arith.constant 0 : index
    %2 = vector.load %arg1[%c0_1, %c0_2] : memref<128x128xbf16, #tpu.memory_space<vmem>>, vector<128x128xbf16>
    %cst = arith.constant dense<0.000000e+00> : vector<2x128xf32>
    %3 = tpu.matmul %1, %2, %cst {dimension_numbers = #tpu.dot_dimension_numbers<[1], [0], [0], [1], [0, 0, 1, 1], [], []>} : vector<2x128xbf16>, vector<128x128xbf16>, vector<2x128xf32> -> vector<2x128xf32>
    %c0_3 = arith.constant 0 : index
    %c0_4 = arith.constant 0 : index
    %4 = vector.load %arg2[%c0_3, %c0_4] : memref<1x128xf32, #tpu.memory_space<vmem>>, vector<1x128xf32>
    %5 = vector.broadcast %4 : vector<1x128xf32> to vector<2x128xf32>
    %6 = arith.addf %3, %5 : vector<2x128xf32>
    %cst_5 = arith.constant 0.000000e+00 : f32
    %7 = vector.broadcast %cst_5 : f32 to vector<2x128xf32>
    %8 = arith.cmpf oge, %6, %7 : vector<2x128xf32>
    %cst_6 = arith.constant 2.000000e-01 : f32
    %9 = vector.broadcast %cst_6 : f32 to vector<2x128xf32>
    %10 = arith.mulf %9, %6 : vector<2x128xf32>
    %11 = arith.select %8, %6, %10 : vector<2x128xi1>, vector<2x128xf32>
    %12 = arith.truncf %11 : vector<2x128xf32> to vector<2x128xbf16>
    %c0_7 = arith.constant 0 : index
    %c0_8 = arith.constant 0 : index
    %13 = vector.load %arg3[%c0_7, %c0_8] : memref<128x256xbf16, #tpu.memory_space<vmem>>, vector<128x256xbf16>
    %cst_9 = arith.constant dense<0.000000e+00> : vector<2x256xf32>
    %14 = tpu.matmul %12, %13, %cst_9 {dimension_numbers = #tpu.dot_dimension_numbers<[1], [0], [0], [1], [0, 0, 1, 1], [], []>} : vector<2x128xbf16>, vector<128x256xbf16>, vector<2x256xf32> -> vector<2x256xf32>
    %c0_10 = arith.constant 0 : index
    %c0_11 = arith.constant 0 : index
    %15 = vector.load %arg4[%c0_10, %c0_11] : memref<1x256xf32, #tpu.memory_space<vmem>>, vector<1x256xf32>
    %16 = vector.broadcast %15 : vector<1x256xf32> to vector<2x256xf32>
    %17 = arith.addf %14, %16 : vector<2x256xf32>
    %cst_12 = arith.constant dense<0.000000e+00> : vector<256xf32>
    %18 = vector.multi_reduction <add>, %17, %cst_12 [0] : vector<2x256xf32> to vector<256xf32>
    %19 = vector.shape_cast %18 : vector<256xf32> to vector<1x256xf32>
    %cst_13 = arith.constant 2.000000e+00 : f32
    %20 = vector.broadcast %cst_13 : f32 to vector<1x256xf32>
    %21 = arith.divf %19, %20 : vector<1x256xf32>
    %22 = vector.broadcast %21 : vector<1x256xf32> to vector<2x256xf32>
    %23 = arith.subf %17, %22 : vector<2x256xf32>
    %24 = arith.mulf %23, %23 : vector<2x256xf32>
    %cst_14 = arith.constant dense<0.000000e+00> : vector<256xf32>
    %25 = vector.multi_reduction <add>, %24, %cst_14 [0] : vector<2x256xf32> to vector<256xf32>
    %26 = vector.shape_cast %25 : vector<256xf32> to vector<1x256xf32>
    %cst_15 = arith.constant 2.000000e+00 : f32
    %27 = vector.broadcast %cst_15 : f32 to vector<1x256xf32>
    %28 = arith.divf %26, %27 : vector<1x256xf32>
    %29 = vector.broadcast %21 : vector<1x256xf32> to vector<2x256xf32>
    %30 = arith.subf %17, %29 : vector<2x256xf32>
    %cst_16 = arith.constant 8.000000e-01 : f32
    %31 = vector.broadcast %cst_16 : f32 to vector<1x256xf32>
    %32 = arith.addf %28, %31 : vector<1x256xf32>
    %33 = math.rsqrt %32 : vector<1x256xf32>
    %34 = vector.broadcast %33 : vector<1x256xf32> to vector<2x256xf32>
    %35 = arith.mulf %30, %34 : vector<2x256xf32>
    %c0_17 = arith.constant 0 : index
    %c0_18 = arith.constant 0 : index
    %36 = vector.load %arg5[%c0_17, %c0_18] : memref<1x256xf32, #tpu.memory_space<vmem>>, vector<1x256xf32>
    %37 = vector.broadcast %36 : vector<1x256xf32> to vector<2x256xf32>
    %38 = arith.mulf %35, %37 : vector<2x256xf32>
    %c0_19 = arith.constant 0 : index
    %c0_20 = arith.constant 0 : index
    %39 = vector.load %arg6[%c0_19, %c0_20] : memref<1x256xf32, #tpu.memory_space<vmem>>, vector<1x256xf32>
    %40 = vector.broadcast %39 : vector<1x256xf32> to vector<2x256xf32>
    %41 = arith.addf %38, %40 : vector<2x256xf32>
    %cst_21 = arith.constant 0.000000e+00 : f32
    %42 = vector.broadcast %cst_21 : f32 to vector<2x256xf32>
    %43 = arith.cmpf oge, %41, %42 : vector<2x256xf32>
    %cst_22 = arith.constant 2.000000e-01 : f32
    %44 = vector.broadcast %cst_22 : f32 to vector<2x256xf32>
    %45 = arith.mulf %44, %41 : vector<2x256xf32>
    %46 = arith.select %43, %41, %45 : vector<2x256xi1>, vector<2x256xf32>
    %47 = arith.truncf %46 : vector<2x256xf32> to vector<2x256xbf16>
    %c0_23 = arith.constant 0 : index
    %c0_24 = arith.constant 0 : index
    %48 = vector.load %arg7[%c0_23, %c0_24] : memref<256x512xbf16, #tpu.memory_space<vmem>>, vector<256x512xbf16>
    %cst_25 = arith.constant dense<0.000000e+00> : vector<2x512xf32>
    %49 = tpu.matmul %47, %48, %cst_25 {dimension_numbers = #tpu.dot_dimension_numbers<[1], [0], [0], [1], [0, 0, 1, 1], [], []>} : vector<2x256xbf16>, vector<256x512xbf16>, vector<2x512xf32> -> vector<2x512xf32>
    %c0_26 = arith.constant 0 : index
    %c0_27 = arith.constant 0 : index
    %50 = vector.load %arg8[%c0_26, %c0_27] : memref<1x512xf32, #tpu.memory_space<vmem>>, vector<1x512xf32>
    %51 = vector.broadcast %50 : vector<1x512xf32> to vector<2x512xf32>
    %52 = arith.addf %49, %51 : vector<2x512xf32>
    %cst_28 = arith.constant dense<0.000000e+00> : vector<512xf32>
    %53 = vector.multi_reduction <add>, %52, %cst_28 [0] : vector<2x512xf32> to vector<512xf32>
    %54 = vector.shape_cast %53 : vector<512xf32> to vector<1x512xf32>
    %cst_29 = arith.constant 2.000000e+00 : f32
    %55 = vector.broadcast %cst_29 : f32 to vector<1x512xf32>
    %56 = arith.divf %54, %55 : vector<1x512xf32>
    %57 = vector.broadcast %56 : vector<1x512xf32> to vector<2x512xf32>
    %58 = arith.subf %52, %57 : vector<2x512xf32>
    %59 = arith.mulf %58, %58 : vector<2x512xf32>
    %cst_30 = arith.constant dense<0.000000e+00> : vector<512xf32>
    %60 = vector.multi_reduction <add>, %59, %cst_30 [0] : vector<2x512xf32> to vector<512xf32>
    %61 = vector.shape_cast %60 : vector<512xf32> to vector<1x512xf32>
    %cst_31 = arith.constant 2.000000e+00 : f32
    %62 = vector.broadcast %cst_31 : f32 to vector<1x512xf32>
    %63 = arith.divf %61, %62 : vector<1x512xf32>
    %64 = vector.broadcast %56 : vector<1x512xf32> to vector<2x512xf32>
    %65 = arith.subf %52, %64 : vector<2x512xf32>
    %cst_32 = arith.constant 8.000000e-01 : f32
    %66 = vector.broadcast %cst_32 : f32 to vector<1x512xf32>
    %67 = arith.addf %63, %66 : vector<1x512xf32>
    %68 = math.rsqrt %67 : vector<1x512xf32>
    %69 = vector.broadcast %68 : vector<1x512xf32> to vector<2x512xf32>
    %70 = arith.mulf %65, %69 : vector<2x512xf32>
    %c0_33 = arith.constant 0 : index
    %c0_34 = arith.constant 0 : index
    %71 = vector.load %arg9[%c0_33, %c0_34] : memref<1x512xf32, #tpu.memory_space<vmem>>, vector<1x512xf32>
    %72 = vector.broadcast %71 : vector<1x512xf32> to vector<2x512xf32>
    %73 = arith.mulf %70, %72 : vector<2x512xf32>
    %c0_35 = arith.constant 0 : index
    %c0_36 = arith.constant 0 : index
    %74 = vector.load %arg10[%c0_35, %c0_36] : memref<1x512xf32, #tpu.memory_space<vmem>>, vector<1x512xf32>
    %75 = vector.broadcast %74 : vector<1x512xf32> to vector<2x512xf32>
    %76 = arith.addf %73, %75 : vector<2x512xf32>
    %cst_37 = arith.constant 0.000000e+00 : f32
    %77 = vector.broadcast %cst_37 : f32 to vector<2x512xf32>
    %78 = arith.cmpf oge, %76, %77 : vector<2x512xf32>
    %cst_38 = arith.constant 2.000000e-01 : f32
    %79 = vector.broadcast %cst_38 : f32 to vector<2x512xf32>
    %80 = arith.mulf %79, %76 : vector<2x512xf32>
    %81 = arith.select %78, %76, %80 : vector<2x512xi1>, vector<2x512xf32>
    %82 = arith.truncf %81 : vector<2x512xf32> to vector<2x512xbf16>
    %c0_39 = arith.constant 0 : index
    %c0_40 = arith.constant 0 : index
    %83 = vector.load %arg11[%c0_39, %c0_40] : memref<512x1024xbf16, #tpu.memory_space<vmem>>, vector<512x1024xbf16>
    %cst_41 = arith.constant dense<0.000000e+00> : vector<2x1024xf32>
    %84 = tpu.matmul %82, %83, %cst_41 {dimension_numbers = #tpu.dot_dimension_numbers<[1], [0], [0], [1], [0, 0, 1, 1], [], []>} : vector<2x512xbf16>, vector<512x1024xbf16>, vector<2x1024xf32> -> vector<2x1024xf32>
    %c0_42 = arith.constant 0 : index
    %c0_43 = arith.constant 0 : index
    %85 = vector.load %arg12[%c0_42, %c0_43] : memref<1x1024xf32, #tpu.memory_space<vmem>>, vector<1x1024xf32>
    %86 = vector.broadcast %85 : vector<1x1024xf32> to vector<2x1024xf32>
    %87 = arith.addf %84, %86 : vector<2x1024xf32>
    %cst_44 = arith.constant dense<0.000000e+00> : vector<1024xf32>
    %88 = vector.multi_reduction <add>, %87, %cst_44 [0] : vector<2x1024xf32> to vector<1024xf32>
    %89 = vector.shape_cast %88 : vector<1024xf32> to vector<1x1024xf32>
    %cst_45 = arith.constant 2.000000e+00 : f32
    %90 = vector.broadcast %cst_45 : f32 to vector<1x1024xf32>
    %91 = arith.divf %89, %90 : vector<1x1024xf32>
    %92 = vector.broadcast %91 : vector<1x1024xf32> to vector<2x1024xf32>
    %93 = arith.subf %87, %92 : vector<2x1024xf32>
    %94 = arith.mulf %93, %93 : vector<2x1024xf32>
    %cst_46 = arith.constant dense<0.000000e+00> : vector<1024xf32>
    %95 = vector.multi_reduction <add>, %94, %cst_46 [0] : vector<2x1024xf32> to vector<1024xf32>
    %96 = vector.shape_cast %95 : vector<1024xf32> to vector<1x1024xf32>
    %cst_47 = arith.constant 2.000000e+00 : f32
    %97 = vector.broadcast %cst_47 : f32 to vector<1x1024xf32>
    %98 = arith.divf %96, %97 : vector<1x1024xf32>
    %99 = vector.broadcast %91 : vector<1x1024xf32> to vector<2x1024xf32>
    %100 = arith.subf %87, %99 : vector<2x1024xf32>
    %cst_48 = arith.constant 8.000000e-01 : f32
    %101 = vector.broadcast %cst_48 : f32 to vector<1x1024xf32>
    %102 = arith.addf %98, %101 : vector<1x1024xf32>
    %103 = math.rsqrt %102 : vector<1x1024xf32>
    %104 = vector.broadcast %103 : vector<1x1024xf32> to vector<2x1024xf32>
    %105 = arith.mulf %100, %104 : vector<2x1024xf32>
    %c0_49 = arith.constant 0 : index
    %c0_50 = arith.constant 0 : index
    %106 = vector.load %arg13[%c0_49, %c0_50] : memref<1x1024xf32, #tpu.memory_space<vmem>>, vector<1x1024xf32>
    %107 = vector.broadcast %106 : vector<1x1024xf32> to vector<2x1024xf32>
    %108 = arith.mulf %105, %107 : vector<2x1024xf32>
    %c0_51 = arith.constant 0 : index
    %c0_52 = arith.constant 0 : index
    %109 = vector.load %arg14[%c0_51, %c0_52] : memref<1x1024xf32, #tpu.memory_space<vmem>>, vector<1x1024xf32>
    %110 = vector.broadcast %109 : vector<1x1024xf32> to vector<2x1024xf32>
    %111 = arith.addf %108, %110 : vector<2x1024xf32>
    %cst_53 = arith.constant 0.000000e+00 : f32
    %112 = vector.broadcast %cst_53 : f32 to vector<2x1024xf32>
    %113 = arith.cmpf oge, %111, %112 : vector<2x1024xf32>
    %cst_54 = arith.constant 2.000000e-01 : f32
    %114 = vector.broadcast %cst_54 : f32 to vector<2x1024xf32>
    %115 = arith.mulf %114, %111 : vector<2x1024xf32>
    %116 = arith.select %113, %111, %115 : vector<2x1024xi1>, vector<2x1024xf32>
    %117 = arith.truncf %116 : vector<2x1024xf32> to vector<2x1024xbf16>
    %c0_55 = arith.constant 0 : index
    %c0_56 = arith.constant 0 : index
    %118 = vector.load %arg15[%c0_55, %c0_56] : memref<2x1024xbf16, #tpu.memory_space<vmem>>, vector<2x1024xbf16>
    tpu.vector_store %arg15[%c0_55, %c0_56], %117 {strides = array<i32>} : memref<2x1024xbf16, #tpu.memory_space<vmem>>, vector<2x1024xbf16>,
    return
  }
}

module attributes {stable_mosaic.version = 11 : i64} {
  func.func @_head_kernel(%arg0: i32, %arg1: memref<2x1024xbf16, #tpu.memory_space<vmem>>, %arg2: memref<1024x512xbf16, #tpu.memory_space<vmem>>, %arg3: memref<1x512xf32, #tpu.memory_space<vmem>>, %arg4: memref<2x512xf32, #tpu.memory_space<vmem>>) attributes {dimension_semantics = [#tpu.dimension_semantics<parallel>], iteration_bounds = array<i64: 6>, scalar_prefetch = 0 : i64, scratch_operands = 0 : i64, tpu.core_type = #tpu.core_type<tc>, window_params = [{pipeline_mode = #tpu.pipeline_mode<synchronous>, transform_indices = @transform_0, window_bounds = array<i64: 2, 1024>}, {transform_indices = @transform_1, window_bounds = array<i64: 1024, 512>}, {transform_indices = @transform_2, window_bounds = array<i64: 1, 512>}, {transform_indices = @transform_3, window_bounds = array<i64: 2, 512>}]} {
    %c0 = arith.constant 0 : index
    %c0_0 = arith.constant 0 : index
    %0 = vector.load %arg1[%c0, %c0_0] : memref<2x1024xbf16, #tpu.memory_space<vmem>>, vector<2x1024xbf16>
    %c0_1 = arith.constant 0 : index
    %c0_2 = arith.constant 0 : index
    %1 = vector.load %arg2[%c0_1, %c0_2] : memref<1024x512xbf16, #tpu.memory_space<vmem>>, vector<1024x512xbf16>
    %cst = arith.constant dense<0.000000e+00> : vector<2x512xf32>
    %2 = tpu.matmul %0, %1, %cst {dimension_numbers = #tpu.dot_dimension_numbers<[1], [0], [0], [1], [0, 0, 1, 1], [], []>} : vector<2x1024xbf16>, vector<1024x512xbf16>, vector<2x512xf32> -> vector<2x512xf32>
    %c0_3 = arith.constant 0 : index
    %c0_4 = arith.constant 0 : index
    %3 = vector.load %arg3[%c0_3, %c0_4] : memref<1x512xf32, #tpu.memory_space<vmem>>, vector<1x512xf32>
    %4 = vector.broadcast %3 : vector<1x512xf32> to vector<2x512xf32>
    %5 = arith.addf %2, %4 : vector<2x512xf32>
    %6 = math.tanh %5 : vector<2x512xf32>
    %c0_5 = arith.constant 0 : index
    %c0_6 = arith.constant 0 : index
    %7 = vector.load %arg4[%c0_5, %c0_6] : memref<2x512xf32, #tpu.memory_space<vmem>>, vector<2x512xf32>
    tpu.vector_store %arg4[%c0_5, %c0_6], %6 {strides = array<i32>} : memref<2x512xf32, #tpu.memory_space<vmem>>, vector<2x512xf32>,
    return
  }
  func.func @transform_0(%arg0: i32) -> (i32, i32) {
    %c0_i32 = arith.constant 0 : i32
    %c0_i32_0 = arith.constant 0 : i32
    %c0_i32_1 = arith.constant 0 : i32
    return %c0_i32, %c0_i32_0 : i32, i32
  }
  func.func @transform_1(%arg0: i32) -> (i32, i32) {
    %c0_i32 = arith.constant 0 : i32
    %c0_i32_0 = arith.constant 0 : i32
    return %c0_i32, %arg0 : i32, i32
  }
  func.func @transform_2(%arg0: i32) -> (i32, i32) {
    %c0_i32 = arith.constant 0 : i32
    %c0_i32_0 = arith.constant 0 : i32
    return %c0_i32, %arg0 : i32, i32
  }
  func.func @transform_3(%arg0: i32) -> (i32, i32) {
    %c0_i32 = arith.constant 0 : i32
    %c0_i32_0 = arith.constant 0 : i32
    return %c0_i32, %arg0 : i32, i32
  }
}

</mosaic_0001>

<bundles_post_ra>
// kernel: basic_generator.3
= control target key start
LH: loop header
LB: loop body
LE: loop exit
PB: predicated region body
PF: predicated region fallthrough
CT: control target
= control target key end

     0   :  { %8 = vsyncpa [#allocation3], 0  ;;  %s3609_s0 = inlined_call_operand.vmem [shape: bf16[2,1024], index: 0, kind: input, shape index: {}]   ;;  %s3610_s1 = inlined_call_operand.hbm [shape: bf16[1024,3072], index: 1, kind: input, shape index: {}]   ;;  %s3611_s2 = inlined_call_operand.hbm [shape: f32[1,3072], index: 2, kind: input, shape index: {}]   ;;  %s3612_s3 = inlined_call_operand.vmem [shape: f32[2,3072], index: 3, kind: output, shape index: {}]  }
   0x1   :  { %10 = vsyncpa [#allocation3 + $0x1], 0 }
   0x2   :  { %11 = vsyncpa [#allocation5], 0 }
   0x3   :  { %13 = vsyncpa [#allocation5 + $0x1], 0  ;;  %s3166_s12 = smov 0   ;;  %s3168_s13 = smov 0  }
   0x4   :  { %s3170_s14 = smov 0   ;;  %s3172_s15 = smov 0  }
   0x5 LB: > { %s2294_s16 = sadd.s32 4294967295, %s3137_s15   ;;  %s3186_s17 = sadd.s32 1, %s3137_s15   ;;  %s3137_s15 = sphi %s3172_s15, %s3622_s15   ;;  %s3133_s14 = sphi %s3170_s14, %s3621_s14   ;;  %s3129_s13 = sphi %s3168_s13, %s3620_s13   ;;  %s3125_s12 = sphi %s3166_s12, %s3619_s12  }
   0x6   : > { %s44_s18 = ssub.s32 %s3137_s15, %s3186_s17  ;;  %s47_s19 = sadd.s32 1, %s3133_s14 }
   0x7   : > { %p45_p0 = scmp.eq.s32.totalorder %s44_s18, 0  ;;  %p54_p1 = scmp.ne.s32.totalorder %s3133_s14, %s3129_s13 }
   0x8   : > { %p55_p2 = scmp.eq.s32.totalorder %s3137_s15, 0  ;;  %p60_p3 = scmp.ne.s32.totalorder %s3129_s13, %s3125_s12 }
   0x9   : > { %s3196_s20 = scalar_select %p45_p0, %s3133_s14, %s47_s19  }
   0xa   : > { %p56_p4 = por %p55_p2, %p54_p1  ;;  %p61_p5 = scmp.eq.s32.totalorder %s2294_s16, 0 }
   0xb   : > { %p2608_p6 = scmp.lt.s32.totalorder %s3137_s15, 6  ;;  %s3206_s22 = sand.u32 1, %s3133_s14  }
   0xc   : > { %p3201_p7 = por %p61_p5, %p60_p3  ;;  %s2298_s23 = sshll.u32 %s3206_s22, 11 }
   0xd   : > { %s2567_s24 = sshll.u32 %s3137_s15, 8  ;;  %s143_s28 = scalar_lea.vmem [#allocation2], %s2298_s23 }
   0xe   : > { %s3614_s21 = scalar_select %p3201_p7, 1, 0 }
   0xf   : > { %s3213_s27 = scalar_lea.hbm %s3610_s1, %s2567_s24  ;;  %s150_s29 = sshll.u32 %s143_s28, 4  ;;  %s3215_s29 = int_to_ptr.vmem [resolvable:$true] %s150_s29 }
  0x10   : > { %p3217_p8 = pnand %p2608_p6, %p56_p4  ;;  %s140_s4 = scalar_lea.sflag [#allocation3], %s3206_s22 }
  0x11   : > { %s3039_s5 = scalar_lea.hbm %s3213_s27, 32768  ;;  %s3044_s8 = scalar_lea.hbm %s3610_s1, 196608 }
  0x12   : > { %p3040_p9 = scmp.ne.s32.totalorder %s3213_s27, %s3039_s5  ;;  %p3041_p10 = pneg %p3217_p8 }
  0x13   : > { %p3045_p13 = scmp.lt.u32.totalorder %s3213_s27, %s3610_s1  ;;  %p3046_p0 = scmp.lt.u32.totalorder %s3044_s8, %s3039_s5 }
  0x14   : > { %p3042_p11 = pnand %p3041_p10, %p3040_p9  ;;  %p3048_p2 = scmp.lt.u32.totalorder %s3039_s5, %s3213_s27 }
  0x15   : > { %p3047_p1 = por %p3046_p0, %p3045_p13 }
  0x16   : > { %p3043_p12 = pneg %p3042_p11 }
  0x17   : > { %p3049_p3 = por %p3048_p2, %p3047_p1 }
  0x19   : > { %p3050_p4 = pnand %p3049_p3, %p3043_p12 }
  0x1b   : > { %3053 = shalt.err (!%p3050_p4)
}
  0x1c   : > { %s3054_s11 = scalar_lea.vmem %s3215_s29, 32768  ;;  %s3139_s12 = smov [#allocation2]  }
  0x1d   : > { %p3055_p5 = scmp.ne.s32.totalorder %s3215_s29, %s3054_s11  ;;  %s3059_s18 = sshll.u32 %s3139_s12, 4  ;;  %s3060_s18 = int_to_ptr.vmem [resolvable:$false] %s3059_s18 }
  0x1e   : > { %s3061_s19 = scalar_lea.vmem %s3060_s18, 65536  ;;  %p3062_p11 = scmp.lt.s32.totalorder %s3215_s29, %s3060_s18 }
  0x1f   : > { %p3057_p6 = pnand %p3055_p5, %p3041_p10  ;;  %p3063_p13 = scmp.lt.s32.totalorder %s3061_s19, %s3054_s11 }
  0x21   : > { %p3058_p9 = pneg %p3057_p6  ;;  %p3064_p0 = por %p3063_p13, %p3062_p11 }
  0x23   : > { %p3065_p1 = pnand %p3064_p0, %p3058_p9 }
  0x25   : > { %3068 = shalt.err (!%p3065_p1)
}
  0x26   : > { %s3140_s23 = smov 1536   ;;  %s3141_s24 = smov 256  }
  0x27   : > { %s3142_s25 = smov 16   ;;  %p2304_p12 = scmp.ge.s32.totalorder %s3137_s15, 1 }
  0x28   : > { %2604 = dma.hbm_to_vmem [thread:$0]  (!%p3217_p8), %s3213_s27, 32768, %s3215_s29, %s140_s4, %s3140_s23, %s3141_s24, %s3142_s25  }
  0x29   : > { %p177_p2 = scmp.lt.s32.totalorder %s3137_s15, 7  ;;  %s2301_s26 = sshll.u32 %s3206_s22, 2 }
  0x2a   : > { %s2568_s5 = sshll.u32 %s3137_s15, 6  ;;  %s164_s6 = scalar_lea.vmem [#allocation4], %s2301_s26 }
  0x2b   : > { %p3252_p3 = pnand %p2304_p12, %p177_p2  ;;  %s172_s7 = sshll.u32 %s164_s6, 4  ;;  %s173_s7 = int_to_ptr.vmem [resolvable:$true] %s172_s7 }
  0x2c   : > { %s3260_s10 = scalar_lea.hbm %s3611_s2, %s2568_s5  ;;  %s161_s27 = scalar_lea.sflag [#allocation5], %s3206_s22 }
  0x2d   : > { %s3616_s28 = scalar_select %p3252_p3, 1, 0 }
  0x2e   : > { %s3069_s29 = scalar_lea.hbm %s3260_s10, 64  ;;  %s3074_s12 = scalar_lea.hbm %s3611_s2, 384 }
  0x2f   : > { %p3070_p4 = scmp.ne.s32.totalorder %s3260_s10, %s3069_s29  ;;  %p3075_p9 = scmp.lt.u32.totalorder %s3260_s10, %s3611_s2 }
  0x30   : > { %p3076_p11 = scmp.lt.u32.totalorder %s3074_s12, %s3069_s29  ;;  %p3078_p0 = scmp.lt.u32.totalorder %s3069_s29, %s3260_s10 }
  0x31   : > { %p3072_p5 = pnand %p3070_p4, %p3041_p10 }
  0x32   : > { %p3077_p13 = por %p3076_p11, %p3075_p9 }
  0x33   : > { %p3073_p6 = pneg %p3072_p5 }
  0x34   : > { %p3079_p1 = por %p3078_p0, %p3077_p13 }
  0x36   : > { %p3080_p12 = pnand %p3079_p1, %p3073_p6 }
  0x38   : > { %3083 = shalt.err (!%p3080_p12)
}
  0x39   : > { %s3084_s22 = scalar_lea.vmem %s173_s7, 64  ;;  %s3143_s23 = smov [#allocation4]  }
  0x3a   : > { %p3085_p2 = scmp.ne.s32.totalorder %s173_s7, %s3084_s22  ;;  %s3089_s24 = sshll.u32 %s3143_s23, 4  ;;  %s3090_s24 = int_to_ptr.vmem [resolvable:$false] %s3089_s24 }
  0x3b   : > { %s3091_s25 = scalar_lea.vmem %s3090_s24, 128  ;;  %p3092_p7 = scmp.lt.s32.totalorder %s173_s7, %s3090_s24 }
  0x3c   : > { %p3087_p4 = pnand %p3085_p2, %p3041_p10  ;;  %p3093_p3 = scmp.lt.s32.totalorder %s3091_s25, %s3084_s22 }
  0x3e   : > { %p3088_p5 = pneg %p3087_p4  ;;  %p3094_p9 = por %p3093_p3, %p3092_p7 }
  0x40   : > { %p3095_p11 = pnand %p3094_p9, %p3088_p5 }
  0x42   : > { %3098 = shalt.err (!%p3095_p11)
}
  0x43   : > { %2607 = dma.hbm_to_vmem [thread:$0]  (!%p3217_p8), %s3260_s10, 64, %s173_s7, %s161_s27  }
  0x44   : > { %p3617_p6 = scmp.ne.s32.totalorder %s3616_s28, 0 }
  0x45   : > { %s183_s26 = sand.u32 (!%p3617_p6), 1, %s3129_s13   ;;  %p3618_p10 = scmp.ne.s32.totalorder (!%p3617_p6), %s3614_s21, 0 }
  0x46   : > { %181 = sbr.rel (%p3617_p6) target bundleno = 573 (0x23d), region = 32  ;;  %s2305_s5 = sshll.u32 (!%p3617_p6), %s183_s26, 11 }
  0x47   : > { %s184_s6 = scalar_lea.sflag (!%p3617_p6), [#allocation3], %s183_s26  ;;  %s3285_s8 = scalar_lea.vmem (!%p3617_p6), [#allocation2], %s2305_s5 }
  0x4d   : > { %3116 = dma.done.wait (%p3618_p10), %s184_s6, 32768  }
  0x4e   : > { %3118 = vsyncadd (%p3618_p10), %s184_s6, 4294934528  ;;  %s2306_s9 = sshll.u32 %s183_s26, 2  ;;  %s193_s30 = scalar_lea.sflag [#allocation5], %s183_s26 }
  0x4f   : > { %s3291_s29 = scalar_lea.vmem [#allocation4], %s2306_s9 }
  0x50   : > { %3120 = dma.done.wait (%p3618_p10), %s193_s30, 64  }
  0x51   : > { %3122 = vsyncadd (%p3618_p10), %s193_s30, 4294967232  ;;  %v2646_v0 = vld [vmem:[%s3285_s8 + $0x4] ss:$16 sps:$4 sm:$0xff]   ;;  %v2648_v1 = vld [vmem:[%s3285_s8 + $0xc] ss:$16 sps:$4 sm:$0xff]   ;;  %v491_v36 = vlaneseq  ;;  %s2307_s7 = sshll.u32 %s2294_s16, 2 }
  0x52   : > { %1849 = vmatprep.subr.bf16.mxu0 %v2646_v0  ;;  %v2650_v2 = vld [vmem:[%s3285_s8] ss:$16 sps:$4 sm:$0xff]   ;;  %v2651_v3 = vld [vmem:[%s3285_s8 + $0x8] ss:$16 sps:$4 sm:$0xff]   ;;  %2013 = vmatprep.subr.bf16.mxu1 %v2648_v1  ;;  %v2652_v4 = vld [vmem:[%s3285_s8 + $0x24] ss:$16 sps:$4 sm:$0xff]  }
  0x53   : > { %1850 = vmatpush1.bf16.msra.mxu0 %v2650_v2  ;;  %2014 = vmatpush1.bf16.msra.mxu1 %v2651_v3  ;;  %v2654_v5 = vld [vmem:[%s3285_s8 + $0x2c] ss:$16 sps:$4 sm:$0xff]   ;;  %v2656_v6 = vld [vmem:[%s3285_s8 + $0x20] ss:$16 sps:$4 sm:$0xff]   ;;  %v2657_v7 = vld [vmem:[%s3285_s8 + $0x28] ss:$16 sps:$4 sm:$0xff]  }
  0x54   : > { %1851 = vmatprep.subr.bf16.mxu0 %v2652_v4  ;;  %2015 = vmatprep.subr.bf16.mxu1 %v2654_v5  ;;  %v2658_v8 = vld [vmem:[%s3285_s8 + $0x44] ss:$16 sps:$4 sm:$0xff]   ;;  %v2660_v9 = vld [vmem:[%s3285_s8 + $0x4c] ss:$16 sps:$4 sm:$0xff]   ;;  %v2662_v10 = vld [vmem:[%s3285_s8 + $0x40] ss:$16 sps:$4 sm:$0xff]  }
  0x55   : > { %v2663_v11 = vld [vmem:[%s3285_s8 + $0x48] ss:$16 sps:$4 sm:$0xff]   ;;  %v2664_v12 = vld [vmem:[%s3285_s8 + $0x64] ss:$16 sps:$4 sm:$0xff]   ;;  %v2666_v13 = vld [vmem:[%s3285_s8 + $0x6c] ss:$16 sps:$4 sm:$0xff]  }
  0x56   : > { %v2668_v14 = vld [vmem:[%s3285_s8 + $0x60] ss:$16 sps:$4 sm:$0xff]   ;;  %v2669_v15 = vld [vmem:[%s3285_s8 + $0x68] ss:$16 sps:$4 sm:$0xff]   ;;  %v2670_v16 = vld [vmem:[%s3285_s8 + $0x84] ss:$16 sps:$4 sm:$0xff]  }
  0x57   : > { %1852 = vmatpush1.bf16.msra.mxu0 %v2656_v6  ;;  %2016 = vmatpush1.bf16.msra.mxu1 %v2657_v7  ;;  %v2672_v17 = vld [vmem:[%s3285_s8 + $0x8c] ss:$16 sps:$4 sm:$0xff]   ;;  %v2674_v18 = vld [vmem:[%s3285_s8 + $0x80] ss:$16 sps:$4 sm:$0xff]   ;;  %v2675_v19 = vld [vmem:[%s3285_s8 + $0x88] ss:$16 sps:$4 sm:$0xff]  }
  0x58   : > { %1853 = vmatprep.subr.bf16.mxu0 %v2658_v8  ;;  %2017 = vmatprep.subr.bf16.mxu1 %v2660_v9  ;;  %v2676_v20 = vld [vmem:[%s3285_s8 + $0xa4] ss:$16 sps:$4 sm:$0xff]   ;;  %v2678_v21 = vld [vmem:[%s3285_s8 + $0xac] ss:$16 sps:$4 sm:$0xff]   ;;  %v2680_v22 = vld [vmem:[%s3285_s8 + $0xa0] ss:$16 sps:$4 sm:$0xff]  }
  0x59   : > { %v2681_v23 = vld [vmem:[%s3285_s8 + $0xa8] ss:$16 sps:$4 sm:$0xff]   ;;  %v2682_v24 = vld [vmem:[%s3285_s8 + $0xc4] ss:$16 sps:$4 sm:$0xff]   ;;  %v2684_v25 = vld [vmem:[%s3285_s8 + $0xcc] ss:$16 sps:$4 sm:$0xff]  }
  0x5a   : > { %v2686_v26 = vld [vmem:[%s3285_s8 + $0xc0] ss:$16 sps:$4 sm:$0xff]   ;;  %v2687_v27 = vld [vmem:[%s3285_s8 + $0xc8] ss:$16 sps:$4 sm:$0xff]   ;;  %v2688_v28 = vld [vmem:[%s3285_s8 + $0xe4] ss:$16 sps:$4 sm:$0xff]  }
  0x5b   : > { %1854 = vmatpush1.bf16.msra.mxu0 %v2662_v10  ;;  %2018 = vmatpush1.bf16.msra.mxu1 %v2663_v11  ;;  %v2690_v29 = vld [vmem:[%s3285_s8 + $0xec] ss:$16 sps:$4 sm:$0xff]   ;;  %v2692_v30 = vld [vmem:[%s3285_s8 + $0xe0] ss:$16 sps:$4 sm:$0xff]   ;;  %v2693_v31 = vld [vmem:[%s3285_s8 + $0xe8] ss:$16 sps:$4 sm:$0xff]  }
  0x5c   : > { %1855 = vmatprep.subr.bf16.mxu0 %v2664_v12  ;;  %2019 = vmatprep.subr.bf16.mxu1 %v2666_v13  ;;  %v2694_v32 = vld [vmem:[%s3285_s8 + $0x104] ss:$16 sps:$4 sm:$0xff]   ;;  %v2696_v33 = vld [vmem:[%s3285_s8 + $0x10c] ss:$16 sps:$4 sm:$0xff]   ;;  %v2698_v34 = vld [vmem:[%s3285_s8 + $0x100] ss:$16 sps:$4 sm:$0xff]  }
  0x5d   : > { %v2699_v35 = vld [vmem:[%s3285_s8 + $0x108] ss:$16 sps:$4 sm:$0xff]   ;;  %v3144_v37 = vmov 1966171168   ;;  %v2700_v39 = vld [vmem:[%s3285_s8 + $0x124] ss:$16 sps:$4 sm:$0xff]  }
  0x5e   : > { %v514_v38 = vunpack.c.l.s4 %v3144_v37  ;;  %v2702_v40 = vld [vmem:[%s3285_s8 + $0x12c] ss:$16 sps:$4 sm:$0xff]   ;;  %v2704_v41 = vld [vmem:[%s3285_s8 + $0x120] ss:$16 sps:$4 sm:$0xff]   ;;  %v3336_v42 = vshrl.u32 %v491_v36, 7  ;;  %p227_p7 = scmp.lt.s32.totalorder %s2307_s7, 23 }
  0x5f   : > { %1856 = vmatpush1.bf16.msra.mxu0 %v2668_v14  ;;  %2020 = vmatpush1.bf16.msra.mxu1 %v2669_v15  ;;  %v2705_v44 = vld [vmem:[%s3285_s8 + $0x128] ss:$16 sps:$4 sm:$0xff]   ;;  %v2706_v45 = vld [vmem:[%s3285_s8 + $0x144] ss:$16 sps:$4 sm:$0xff]   ;;  %v2708_v46 = vld [vmem:[%s3285_s8 + $0x14c] ss:$16 sps:$4 sm:$0xff]  }
  0x60   : > { %1857 = vmatprep.subr.bf16.mxu0 %v2670_v16  ;;  %2021 = vmatprep.subr.bf16.mxu1 %v2672_v17  ;;  %v515_v43 = vunpack.c.0.s8 %v514_v38  ;;  %v2710_v47 = vld [vmem:[%s3285_s8 + $0x140] ss:$16 sps:$4 sm:$0xff]   ;;  %v2711_v48 = vld [vmem:[%s3285_s8 + $0x148] ss:$16 sps:$4 sm:$0xff]   ;;  %v2712_v50 = vld [vmem:[%s3285_s8 + $0x164] ss:$16 sps:$4 sm:$0xff]  }
  0x61   : > { %v2714_v51 = vld [vmem:[%s3285_s8 + $0x16c] ss:$16 sps:$4 sm:$0xff]   ;;  %v232_v52 = vld [vmem:[%s3609_s0] sm:$0xff]  ;;  %v2717_v55 = vld [vmem:[%s3285_s8 + $0x168] ss:$16 sps:$4 sm:$0xff]   ;;  %s3624_s7 = smov (!%p227_p7, %s2307_s7), 23 }
  0x62   : > { %v3344_v49 = vsub.s32 %v515_v43, %v3336_v42  ;;  %v2716_v53 = vld [vmem:[%s3285_s8 + $0x160] ss:$16 sps:$4 sm:$0xff]   ;;  %v2718_v56 = vld [vmem:[%s3285_s8 + $0x184] ss:$16 sps:$4 sm:$0xff]   ;;  %v2720_v57 = vld [vmem:[%s3285_s8 + $0x18c] ss:$16 sps:$4 sm:$0xff]   ;;  %v512_v9 = vcombine.high %v232_v52, %v232_v52 }
  0x63   : > { %1858 = vmatpush1.bf16.msra.mxu0 %v2674_v18  ;;  %2022 = vmatpush1.bf16.msra.mxu1 %v2675_v19  ;;  %v2722_v59 = vld [vmem:[%s3285_s8 + $0x180] ss:$16 sps:$4 sm:$0xff]   ;;  %v2723_v61 = vld [vmem:[%s3285_s8 + $0x188] ss:$16 sps:$4 sm:$0xff]   ;;  %v2724_v62 = vld [vmem:[%s3285_s8 + $0x1a4] ss:$16 sps:$4 sm:$0xff]  }
  0x64   : > { %1859 = vmatprep.subr.bf16.mxu0 %v2676_v20  ;;  %2023 = vmatprep.subr.bf16.mxu1 %v2678_v21  ;;  %v519_v54 = vrot.slane %v232_v52, %v3344_v49  ;;  %v2726_v63 = vld [vmem:[%s3285_s8 + $0x1ac] ss:$16 sps:$4 sm:$0xff]   ;;  %v2728_v0 = vld [vmem:[%s3285_s8 + $0x1a0] ss:$16 sps:$4 sm:$0xff]   ;;  %v2729_v1 = vld [vmem:[%s3285_s8 + $0x1a8] ss:$16 sps:$4 sm:$0xff]   ;;  %v526_v13 = vrot.slane %v512_v9, %v3344_v49 }
  0x65   : > { %v2730_v2 = vld [vmem:[%s3285_s8 + $0x1c4] ss:$16 sps:$4 sm:$0xff]   ;;  %v2732_v3 = vld [vmem:[%s3285_s8 + $0x1cc] ss:$16 sps:$4 sm:$0xff]   ;;  %v2734_v4 = vld [vmem:[%s3285_s8 + $0x1c0] ss:$16 sps:$4 sm:$0xff]  }
  0x66   : > { %v527_v58 = vcombine.high %v519_v54, %v519_v54  ;;  %v2735_v5 = vld [vmem:[%s3285_s8 + $0x1c8] ss:$16 sps:$4 sm:$0xff]   ;;  %v2736_v6 = vld [vmem:[%s3285_s8 + $0x1e4] ss:$16 sps:$4 sm:$0xff]   ;;  %v2738_v7 = vld [vmem:[%s3285_s8 + $0x1ec] ss:$16 sps:$4 sm:$0xff]   ;;  %v3376_v15 = vrot.slane %v519_v54, %v3344_v49  ;;  %v528_v16 = vcombine.high %v526_v13, %v526_v13  ;;  %v3385_v21 = vrot.slane %v526_v13, %v3344_v49 }
  0x67   : > { %1860 = vmatpush1.bf16.msra.mxu0 %v2680_v22  ;;  %2024 = vmatpush1.bf16.msra.mxu1 %v2681_v23  ;;  %v2740_v8 = vld [vmem:[%s3285_s8 + $0x1e0] ss:$16 sps:$4 sm:$0xff]   ;;  %v2741_v10 = vld [vmem:[%s3285_s8 + $0x1e8] ss:$16 sps:$4 sm:$0xff]   ;;  %v2744_v11 = vld [vmem:[%s3285_s8 + $0x204] ss:$16 sps:$4 sm:$0xff]  }
  0x68   : > { %1861 = vmatprep.subr.bf16.mxu0 %v2682_v24  ;;  %2025 = vmatprep.subr.bf16.mxu1 %v2684_v25  ;;  %v549_v60 = vrot.slane %v527_v58, %v3344_v49  ;;  %v2747_v12 = vld [vmem:[%s3285_s8 + $0x20c] ss:$16 sps:$4 sm:$0xff]   ;;  %v2742_v14 = vld [vmem:[%s3285_s8 + $0x200] ss:$16 sps:$4 sm:$0xff]   ;;  %v2745_v17 = vld [vmem:[%s3285_s8 + $0x208] ss:$16 sps:$4 sm:$0xff]   ;;  %v3382_v20 = vrot.slane %v528_v16, %v3344_v49 }
  0x69   : > { %v2750_v18 = vld [vmem:[%s3285_s8 + $0x224] ss:$16 sps:$4 sm:$0xff]   ;;  %v2753_v19 = vld [vmem:[%s3285_s8 + $0x22c] ss:$16 sps:$4 sm:$0xff]   ;;  %v2748_v23 = vld [vmem:[%s3285_s8 + $0x220] ss:$16 sps:$4 sm:$0xff]  }
  0x6a   : > { %1881 = vmatprep.mubr.bf16.mxu0 %v549_v60  ;;  %2045 = vmatprep.mubr.bf16.mxu1 %v549_v60  ;;  %v559_v22 = vcombine.high %v549_v60, %v549_v60  ;;  %v2751_v24 = vld [vmem:[%s3285_s8 + $0x228] ss:$16 sps:$4 sm:$0xff]   ;;  %v2756_v25 = vld [vmem:[%s3285_s8 + $0x244] ss:$16 sps:$4 sm:$0xff]   ;;  %v2777_v38 = vld [vmem:[%s3285_s8 + $0x2ac] ss:$16 sps:$4 sm:$0xff]  }
  0x6b   : > { %1862 = vmatpush1.bf16.msra.mxu0 %v2686_v26  ;;  %2026 = vmatpush1.bf16.msra.mxu1 %v2687_v27  ;;  %v2759_v26 = vld [vmem:[%s3285_s8 + $0x24c] ss:$16 sps:$4 sm:$0xff]   ;;  %v2754_v27 = vld [vmem:[%s3285_s8 + $0x240] ss:$16 sps:$4 sm:$0xff]   ;;  %v2769_v36 = vld [vmem:[%s3285_s8 + $0x288] ss:$16 sps:$4 sm:$0xff]  }
  0x6c   : > { %1863 = vmatprep.subr.bf16.mxu0 %v2688_v28  ;;  %2027 = vmatprep.subr.bf16.mxu1 %v2690_v29  ;;  %v2757_v28 = vld [vmem:[%s3285_s8 + $0x248] ss:$16 sps:$4 sm:$0xff]   ;;  %v2762_v29 = vld [vmem:[%s3285_s8 + $0x264] ss:$16 sps:$4 sm:$0xff]   ;;  %v2783_v43 = vld [vmem:[%s3285_s8 + $0x2cc] ss:$16 sps:$4 sm:$0xff]  }
  0x6d   : > { %v2774_v37 = vld [vmem:[%s3285_s8 + $0x2a4] ss:$16 sps:$4 sm:$0xff]   ;;  %v2787_v49 = vld [vmem:[%s3285_s8 + $0x2e8] ss:$16 sps:$4 sm:$0xff]   ;;  %v2790_v52 = vld [vmem:[%s3285_s8 + $0x300] ss:$16 sps:$4 sm:$0xff]  }
  0x6e   : > { %v2798_v54 = vld [vmem:[%s3285_s8 + $0x324] ss:$16 sps:$4 sm:$0xff]   ;;  %v2802_v60 = vld [vmem:[%s3285_s8 + $0x340] ss:$16 sps:$4 sm:$0xff]   ;;  %v2823_v9 = vld [vmem:[%s3285_s8 + $0x3a8] ss:$16 sps:$4 sm:$0xff]  }
  0x6f   : > { %1864 = vmatpush1.bf16.msra.mxu0 %v2692_v30  ;;  %2028 = vmatpush1.bf16.msra.mxu1 %v2693_v31  ;;  %v2765_v30 = vld [vmem:[%s3285_s8 + $0x26c] ss:$16 sps:$4 sm:$0xff]   ;;  %v2760_v31 = vld [vmem:[%s3285_s8 + $0x260] ss:$16 sps:$4 sm:$0xff]   ;;  %v2804_v58 = vld [vmem:[%s3285_s8 + $0x344] ss:$16 sps:$4 sm:$0xff]  }
  0x70   : > { %1865 = vmatprep.subr.bf16.mxu0 %v2694_v32  ;;  %2029 = vmatprep.subr.bf16.mxu1 %v2696_v33  ;;  %v2763_v32 = vld [vmem:[%s3285_s8 + $0x268] ss:$16 sps:$4 sm:$0xff]   ;;  %v2768_v33 = vld [vmem:[%s3285_s8 + $0x284] ss:$16 sps:$4 sm:$0xff]   ;;  %v2837_v16 = vld [vmem:[%s3285_s8 + $0x3ec] ss:$16 sps:$4 sm:$0xff]  }
  0x71   : > { %v2829_v13 = vld [vmem:[%s3285_s8 + $0x3c8] ss:$16 sps:$4 sm:$0xff]   ;;  %s2308_s10 = sshll.u32 %s3624_s7, 1 }
  0x72   : > { %s230_s15 = scalar_lea.vmem %s3612_s3, %s2308_s10 }
  0x73   : > { %1866 = vmatpush1.bf16.msra.mxu0 %v2698_v34  ;;  %2030 = vmatpush1.bf16.msra.mxu1 %v2699_v35  ;;  %v2771_v34 = vld [vmem:[%s3285_s8 + $0x28c] ss:$16 sps:$4 sm:$0xff]   ;;  %v2766_v35 = vld [vmem:[%s3285_s8 + $0x280] ss:$16 sps:$4 sm:$0xff]  }
  0x74   : > { %1867 = vmatprep.subr.bf16.mxu0 %v2700_v39  ;;  %2031 = vmatprep.subr.bf16.mxu1 %v2702_v40  ;;  %v2772_v39 = vld [vmem:[%s3285_s8 + $0x2a0] ss:$16 sps:$4 sm:$0xff]   ;;  %v2775_v40 = vld [vmem:[%s3285_s8 + $0x2a8] ss:$16 sps:$4 sm:$0xff]  }
  0x77   : > { %1868 = vmatpush1.bf16.msra.mxu0 %v2704_v41  ;;  %2032 = vmatpush1.bf16.msra.mxu1 %v2705_v44  ;;  %v2780_v41 = vld [vmem:[%s3285_s8 + $0x2c4] ss:$16 sps:$4 sm:$0xff]   ;;  %v2778_v44 = vld [vmem:[%s3285_s8 + $0x2c0] ss:$16 sps:$4 sm:$0xff]  }
  0x78   : > { %1869 = vmatprep.subr.bf16.mxu0 %v2706_v45  ;;  %2033 = vmatprep.subr.bf16.mxu1 %v2708_v46  ;;  %v2781_v45 = vld [vmem:[%s3285_s8 + $0x2c8] ss:$16 sps:$4 sm:$0xff]   ;;  %v2786_v46 = vld [vmem:[%s3285_s8 + $0x2e4] ss:$16 sps:$4 sm:$0xff]  }
  0x7b   : > { %1870 = vmatpush1.bf16.msra.mxu0 %v2710_v47  ;;  %2034 = vmatpush1.bf16.msra.mxu1 %v2711_v48  ;;  %v2789_v47 = vld [vmem:[%s3285_s8 + $0x2ec] ss:$16 sps:$4 sm:$0xff]   ;;  %v2784_v48 = vld [vmem:[%s3285_s8 + $0x2e0] ss:$16 sps:$4 sm:$0xff]  }
  0x7c   : > { %1871 = vmatprep.subr.bf16.mxu0 %v2712_v50  ;;  %2035 = vmatprep.subr.bf16.mxu1 %v2714_v51  ;;  %v2792_v50 = vld [vmem:[%s3285_s8 + $0x304] ss:$16 sps:$4 sm:$0xff]   ;;  %v2795_v51 = vld [vmem:[%s3285_s8 + $0x30c] ss:$16 sps:$4 sm:$0xff]  }
  0x7f   : > { %1872 = vmatpush1.bf16.msra.mxu0 %v2716_v53  ;;  %2036 = vmatpush1.bf16.msra.mxu1 %v2717_v55  ;;  %v2793_v53 = vld [vmem:[%s3285_s8 + $0x308] ss:$16 sps:$4 sm:$0xff]   ;;  %v2801_v55 = vld [vmem:[%s3285_s8 + $0x32c] ss:$16 sps:$4 sm:$0xff]  }
  0x80   : > { %1873 = vmatprep.subr.bf16.mxu0 %v2718_v56  ;;  %2037 = vmatprep.subr.bf16.mxu1 %v2720_v57  ;;  %v2796_v56 = vld [vmem:[%s3285_s8 + $0x320] ss:$16 sps:$4 sm:$0xff]   ;;  %v2799_v57 = vld [vmem:[%s3285_s8 + $0x328] ss:$16 sps:$4 sm:$0xff]  }
  0x83   : > { %1874 = vmatpush1.bf16.msra.mxu0 %v2722_v59  ;;  %2038 = vmatpush1.bf16.msra.mxu1 %v2723_v61  ;;  %v2807_v59 = vld [vmem:[%s3285_s8 + $0x34c] ss:$16 sps:$4 sm:$0xff]   ;;  %v2805_v61 = vld [vmem:[%s3285_s8 + $0x348] ss:$16 sps:$4 sm:$0xff]  }
  0x84   : > { %1875 = vmatprep.subr.bf16.mxu0 %v2724_v62  ;;  %2039 = vmatprep.subr.bf16.mxu1 %v2726_v63  ;;  %v2810_v62 = vld [vmem:[%s3285_s8 + $0x364] ss:$16 sps:$4 sm:$0xff]   ;;  %v2813_v63 = vld [vmem:[%s3285_s8 + $0x36c] ss:$16 sps:$4 sm:$0xff]  }
  0x87   : > { %1876 = vmatpush1.bf16.msra.mxu0 %v2728_v0  ;;  %2040 = vmatpush1.bf16.msra.mxu1 %v2729_v1  ;;  %v2808_v0 = vld [vmem:[%s3285_s8 + $0x360] ss:$16 sps:$4 sm:$0xff]   ;;  %v2811_v1 = vld [vmem:[%s3285_s8 + $0x368] ss:$16 sps:$4 sm:$0xff]  }
  0x88   : > { %1877 = vmatprep.subr.bf16.mxu0 %v2730_v2  ;;  %2041 = vmatprep.subr.bf16.mxu1 %v2732_v3  ;;  %v2816_v2 = vld [vmem:[%s3285_s8 + $0x384] ss:$16 sps:$4 sm:$0xff]   ;;  %v2819_v3 = vld [vmem:[%s3285_s8 + $0x38c] ss:$16 sps:$4 sm:$0xff]  }
  0x8b   : > { %1878 = vmatpush1.bf16.msra.mxu0 %v2734_v4  ;;  %2042 = vmatpush1.bf16.msra.mxu1 %v2735_v5  ;;  %v2814_v4 = vld [vmem:[%s3285_s8 + $0x380] ss:$16 sps:$4 sm:$0xff]   ;;  %v2817_v5 = vld [vmem:[%s3285_s8 + $0x388] ss:$16 sps:$4 sm:$0xff]  }
  0x8c   : > { %1879 = vmatprep.subr.bf16.mxu0 %v2736_v6  ;;  %2043 = vmatprep.subr.bf16.mxu1 %v2738_v7  ;;  %v2822_v6 = vld [vmem:[%s3285_s8 + $0x3a4] ss:$16 sps:$4 sm:$0xff]   ;;  %v2825_v7 = vld [vmem:[%s3285_s8 + $0x3ac] ss:$16 sps:$4 sm:$0xff]  }
  0x8f   : > { %1880 = vmatpush1.bf16.msra.mxu0 %v2740_v8  ;;  %2044 = vmatpush1.bf16.msra.mxu1 %v2741_v10  ;;  %v2820_v8 = vld [vmem:[%s3285_s8 + $0x3a0] ss:$16 sps:$4 sm:$0xff]   ;;  %v2828_v10 = vld [vmem:[%s3285_s8 + $0x3c4] ss:$16 sps:$4 sm:$0xff]  }
  0x90   : > { %1890 = vmatprep.subr.bf16.mxu0 %v2744_v11  ;;  %2054 = vmatprep.subr.bf16.mxu1 %v2747_v12  ;;  %v2831_v11 = vld [vmem:[%s3285_s8 + $0x3cc] ss:$16 sps:$4 sm:$0xff]   ;;  %v2826_v12 = vld [vmem:[%s3285_s8 + $0x3c0] ss:$16 sps:$4 sm:$0xff]  }
  0x92   : > { %1882 = vmatmul.mubr.bf16.vlgmr.msra.gmra.mrb[0].mxu0 %v3376_v15  ;;  %2046 = vmatmul.mubr.bf16.vlgmr.msra.gmra.mrb[0].mxu1 %v3376_v15 }
  0x93   : > { %1891 = vmatpush1.bf16.msra.mxu0 %v2742_v14  ;;  %2055 = vmatpush1.bf16.msra.mxu1 %v2745_v17  ;;  %v2834_v14 = vld [vmem:[%s3285_s8 + $0x3e4] ss:$16 sps:$4 sm:$0xff]   ;;  %v2832_v17 = vld [vmem:[%s3285_s8 + $0x3e0] ss:$16 sps:$4 sm:$0xff]  }
  0x94   : > { %1892 = vmatprep.subr.bf16.mxu0 %v2750_v18  ;;  %2056 = vmatprep.subr.bf16.mxu1 %v2753_v19  ;;  %v2835_v18 = vld [vmem:[%s3285_s8 + $0x3e8] ss:$16 sps:$4 sm:$0xff]   ;;  %v2840_v19 = vld [vmem:[%s3285_s8 + $0x404] ss:$16 sps:$4 sm:$0xff]  }
  0x95   : > { %1922 = vmatprep.mubr.bf16.mxu0 %v559_v22  ;;  %2086 = vmatprep.mubr.bf16.mxu1 %v559_v22  ;;  %v2843_v22 = vld [vmem:[%s3285_s8 + $0x40c] ss:$16 sps:$4 sm:$0xff]  }
  0x97   : > { %1893 = vmatpush1.bf16.msra.mxu0 %v2748_v23  ;;  %2057 = vmatpush1.bf16.msra.mxu1 %v2751_v24  ;;  %v2838_v23 = vld [vmem:[%s3285_s8 + $0x400] ss:$16 sps:$4 sm:$0xff]   ;;  %v557_v24 = vcombine.high %v3376_v15, %v3376_v15  ;;  %v2847_v15 = vld [vmem:[%s3285_s8 + $0x428] ss:$16 sps:$4 sm:$0xff]  }
  0x98   : > { %1894 = vmatprep.subr.bf16.mxu0 %v2756_v25  ;;  %2058 = vmatprep.subr.bf16.mxu1 %v2759_v26  ;;  %v2841_v25 = vld [vmem:[%s3285_s8 + $0x408] ss:$16 sps:$4 sm:$0xff]   ;;  %v2846_v26 = vld [vmem:[%s3285_s8 + $0x424] ss:$16 sps:$4 sm:$0xff]  }
  0x9b   : > { %1895 = vmatpush1.bf16.msra.mxu0 %v2754_v27  ;;  %2059 = vmatpush1.bf16.msra.mxu1 %v2757_v28  ;;  %v2849_v27 = vld [vmem:[%s3285_s8 + $0x42c] ss:$16 sps:$4 sm:$0xff]   ;;  %v2844_v28 = vld [vmem:[%s3285_s8 + $0x420] ss:$16 sps:$4 sm:$0xff]  }
  0x9c   : > { %1896 = vmatprep.subr.bf16.mxu0 %v2762_v29  ;;  %2060 = vmatprep.subr.bf16.mxu1 %v2765_v30  ;;  %v2852_v29 = vld [vmem:[%s3285_s8 + $0x444] ss:$16 sps:$4 sm:$0xff]   ;;  %v2855_v30 = vld [vmem:[%s3285_s8 + $0x44c] ss:$16 sps:$4 sm:$0xff]  }
  0x9f   : > { %1897 = vmatpush1.bf16.msra.mxu0 %v2760_v31  ;;  %2061 = vmatpush1.bf16.msra.mxu1 %v2763_v32  ;;  %v2850_v31 = vld [vmem:[%s3285_s8 + $0x440] ss:$16 sps:$4 sm:$0xff]   ;;  %v2853_v32 = vld [vmem:[%s3285_s8 + $0x448] ss:$16 sps:$4 sm:$0xff]  }
  0xa0   : > { %1898 = vmatprep.subr.bf16.mxu0 %v2768_v33  ;;  %2062 = vmatprep.subr.bf16.mxu1 %v2771_v34  ;;  %v2858_v33 = vld [vmem:[%s3285_s8 + $0x464] ss:$16 sps:$4 sm:$0xff]   ;;  %v2861_v34 = vld [vmem:[%s3285_s8 + $0x46c] ss:$16 sps:$4 sm:$0xff]  }
  0xa3   : > { %1899 = vmatpush1.bf16.msra.mxu0 %v2766_v35  ;;  %2063 = vmatpush1.bf16.msra.mxu1 %v2769_v36  ;;  %v2856_v35 = vld [vmem:[%s3285_s8 + $0x460] ss:$16 sps:$4 sm:$0xff]   ;;  %v2859_v36 = vld [vmem:[%s3285_s8 + $0x468] ss:$16 sps:$4 sm:$0xff]  }
  0xa4   : > { %1900 = vmatprep.subr.bf16.mxu0 %v2774_v37  ;;  %2064 = vmatprep.subr.bf16.mxu1 %v2777_v38  ;;  %v2864_v37 = vld [vmem:[%s3285_s8 + $0x484] ss:$16 sps:$4 sm:$0xff]   ;;  %v2867_v38 = vld [vmem:[%s3285_s8 + $0x48c] ss:$16 sps:$4 sm:$0xff]  }
  0xa7   : > { %1901 = vmatpush1.bf16.msra.mxu0 %v2772_v39  ;;  %2065 = vmatpush1.bf16.msra.mxu1 %v2775_v40  ;;  %v2862_v39 = vld [vmem:[%s3285_s8 + $0x480] ss:$16 sps:$4 sm:$0xff]   ;;  %v2865_v40 = vld [vmem:[%s3285_s8 + $0x488] ss:$16 sps:$4 sm:$0xff]  }
  0xa8   : > { %1902 = vmatprep.subr.bf16.mxu0 %v2780_v41  ;;  %2066 = vmatprep.subr.bf16.mxu1 %v2783_v43  ;;  %v2870_v41 = vld [vmem:[%s3285_s8 + $0x4a4] ss:$16 sps:$4 sm:$0xff]   ;;  %v2873_v43 = vld [vmem:[%s3285_s8 + $0x4ac] ss:$16 sps:$4 sm:$0xff]  }
  0xab   : > { %1903 = vmatpush1.bf16.msra.mxu0 %v2778_v44  ;;  %2067 = vmatpush1.bf16.msra.mxu1 %v2781_v45  ;;  %v2868_v44 = vld [vmem:[%s3285_s8 + $0x4a0] ss:$16 sps:$4 sm:$0xff]   ;;  %v2871_v45 = vld [vmem:[%s3285_s8 + $0x4a8] ss:$16 sps:$4 sm:$0xff]  }
  0xac   : > { %1904 = vmatprep.subr.bf16.mxu0 %v2786_v46  ;;  %2068 = vmatprep.subr.bf16.mxu1 %v2789_v47  ;;  %v2876_v46 = vld [vmem:[%s3285_s8 + $0x4c4] ss:$16 sps:$4 sm:$0xff]   ;;  %v2879_v47 = vld [vmem:[%s3285_s8 + $0x4cc] ss:$16 sps:$4 sm:$0xff]  }
  0xaf   : > { %1905 = vmatpush1.bf16.msra.mxu0 %v2784_v48  ;;  %2069 = vmatpush1.bf16.msra.mxu1 %v2787_v49  ;;  %v2874_v48 = vld [vmem:[%s3285_s8 + $0x4c0] ss:$16 sps:$4 sm:$0xff]   ;;  %v2877_v49 = vld [vmem:[%s3285_s8 + $0x4c8] ss:$16 sps:$4 sm:$0xff]  }
  0xb0   : > { %1906 = vmatprep.subr.bf16.mxu0 %v2792_v50  ;;  %2070 = vmatprep.subr.bf16.mxu1 %v2795_v51  ;;  %v2882_v50 = vld [vmem:[%s3285_s8 + $0x4e4] ss:$16 sps:$4 sm:$0xff]   ;;  %v2885_v51 = vld [vmem:[%s3285_s8 + $0x4ec] ss:$16 sps:$4 sm:$0xff]  }
  0xb3   : > { %1907 = vmatpush1.bf16.msra.mxu0 %v2790_v52  ;;  %2071 = vmatpush1.bf16.msra.mxu1 %v2793_v53  ;;  %v2880_v52 = vld [vmem:[%s3285_s8 + $0x4e0] ss:$16 sps:$4 sm:$0xff]   ;;  %v2883_v53 = vld [vmem:[%s3285_s8 + $0x4e8] ss:$16 sps:$4 sm:$0xff]  }
  0xb4   : > { %1908 = vmatprep.subr.bf16.mxu0 %v2798_v54  ;;  %2072 = vmatprep.subr.bf16.mxu1 %v2801_v55  ;;  %v2888_v54 = vld [vmem:[%s3285_s8 + $0x504] ss:$16 sps:$4 sm:$0xff]   ;;  %v2891_v55 = vld [vmem:[%s3285_s8 + $0x50c] ss:$16 sps:$4 sm:$0xff]  }
  0xb7   : > { %1909 = vmatpush1.bf16.msra.mxu0 %v2796_v56  ;;  %2073 = vmatpush1.bf16.msra.mxu1 %v2799_v57  ;;  %v2886_v56 = vld [vmem:[%s3285_s8 + $0x500] ss:$16 sps:$4 sm:$0xff]   ;;  %v2889_v57 = vld [vmem:[%s3285_s8 + $0x508] ss:$16 sps:$4 sm:$0xff]  }
  0xb8   : > { %1910 = vmatprep.subr.bf16.mxu0 %v2804_v58  ;;  %2074 = vmatprep.subr.bf16.mxu1 %v2807_v59  ;;  %v2894_v58 = vld [vmem:[%s3285_s8 + $0x524] ss:$16 sps:$4 sm:$0xff]   ;;  %v2897_v59 = vld [vmem:[%s3285_s8 + $0x52c] ss:$16 sps:$4 sm:$0xff]  }
  0xbb   : > { %1911 = vmatpush1.bf16.msra.mxu0 %v2802_v60  ;;  %2075 = vmatpush1.bf16.msra.mxu1 %v2805_v61  ;;  %v2892_v60 = vld [vmem:[%s3285_s8 + $0x520] ss:$16 sps:$4 sm:$0xff]   ;;  %v2895_v61 = vld [vmem:[%s3285_s8 + $0x528] ss:$16 sps:$4 sm:$0xff]  }
  0xbc   : > { %1912 = vmatprep.subr.bf16.mxu0 %v2810_v62  ;;  %2076 = vmatprep.subr.bf16.mxu1 %v2813_v63  ;;  %v2900_v62 = vld [vmem:[%s3285_s8 + $0x544] ss:$16 sps:$4 sm:$0xff]   ;;  %v2903_v63 = vld [vmem:[%s3285_s8 + $0x54c] ss:$16 sps:$4 sm:$0xff]  }
  0xbf   : > { %1913 = vmatpush1.bf16.msra.mxu0 %v2808_v0  ;;  %2077 = vmatpush1.bf16.msra.mxu1 %v2811_v1  ;;  %v2898_v0 = vld [vmem:[%s3285_s8 + $0x540] ss:$16 sps:$4 sm:$0xff]   ;;  %v2901_v1 = vld [vmem:[%s3285_s8 + $0x548] ss:$16 sps:$4 sm:$0xff]  }
  0xc0   : > { %1914 = vmatprep.subr.bf16.mxu0 %v2816_v2  ;;  %2078 = vmatprep.subr.bf16.mxu1 %v2819_v3  ;;  %v2906_v2 = vld [vmem:[%s3285_s8 + $0x564] ss:$16 sps:$4 sm:$0xff]   ;;  %v2909_v3 = vld [vmem:[%s3285_s8 + $0x56c] ss:$16 sps:$4 sm:$0xff]  }
  0xc3   : > { %1915 = vmatpush1.bf16.msra.mxu0 %v2814_v4  ;;  %2079 = vmatpush1.bf16.msra.mxu1 %v2817_v5  ;;  %v2904_v4 = vld [vmem:[%s3285_s8 + $0x560] ss:$16 sps:$4 sm:$0xff]   ;;  %v2907_v5 = vld [vmem:[%s3285_s8 + $0x568] ss:$16 sps:$4 sm:$0xff]  }
  0xc4   : > { %1916 = vmatprep.subr.bf16.mxu0 %v2822_v6  ;;  %2080 = vmatprep.subr.bf16.mxu1 %v2825_v7  ;;  %v2912_v6 = vld [vmem:[%s3285_s8 + $0x584] ss:$16 sps:$4 sm:$0xff]   ;;  %v2915_v7 = vld [vmem:[%s3285_s8 + $0x58c] ss:$16 sps:$4 sm:$0xff]  }
  0xc7   : > { %1917 = vmatpush1.bf16.msra.mxu0 %v2820_v8  ;;  %2081 = vmatpush1.bf16.msra.mxu1 %v2823_v9  ;;  %v2910_v8 = vld [vmem:[%s3285_s8 + $0x580] ss:$16 sps:$4 sm:$0xff]   ;;  %v2913_v9 = vld [vmem:[%s3285_s8 + $0x588] ss:$16 sps:$4 sm:$0xff]  }
  0xc8   : > { %1918 = vmatprep.subr.bf16.mxu0 %v2828_v10  ;;  %2082 = vmatprep.subr.bf16.mxu1 %v2831_v11  ;;  %v2918_v10 = vld [vmem:[%s3285_s8 + $0x5a4] ss:$16 sps:$4 sm:$0xff]   ;;  %v2921_v11 = vld [vmem:[%s3285_s8 + $0x5ac] ss:$16 sps:$4 sm:$0xff]  }
  0xcb   : > { %1919 = vmatpush1.bf16.msra.mxu0 %v2826_v12  ;;  %2083 = vmatpush1.bf16.msra.mxu1 %v2829_v13  ;;  %v2916_v12 = vld [vmem:[%s3285_s8 + $0x5a0] ss:$16 sps:$4 sm:$0xff]   ;;  %v2919_v13 = vld [vmem:[%s3285_s8 + $0x5a8] ss:$16 sps:$4 sm:$0xff]  }
  0xcc   : > { %1920 = vmatprep.subr.bf16.mxu0 %v2834_v14  ;;  %2084 = vmatprep.subr.bf16.mxu1 %v2837_v16  ;;  %v2924_v14 = vld [vmem:[%s3285_s8 + $0x5c4] ss:$16 sps:$4 sm:$0xff]   ;;  %v2927_v16 = vld [vmem:[%s3285_s8 + $0x5cc] ss:$16 sps:$4 sm:$0xff]  }
  0xcf   : > { %1921 = vmatpush1.bf16.msra.mxu0 %v2832_v17  ;;  %2085 = vmatpush1.bf16.msra.mxu1 %v2835_v18  ;;  %v2922_v17 = vld [vmem:[%s3285_s8 + $0x5c0] ss:$16 sps:$4 sm:$0xff]   ;;  %v2925_v18 = vld [vmem:[%s3285_s8 + $0x5c8] ss:$16 sps:$4 sm:$0xff]  }
  0xd0   : > { %1931 = vmatprep.subr.bf16.mxu0 %v2840_v19  ;;  %2095 = vmatprep.subr.bf16.mxu1 %v2843_v22  ;;  %v2930_v19 = vld [vmem:[%s3285_s8 + $0x5e4] ss:$16 sps:$4 sm:$0xff]   ;;  %v2933_v22 = vld [vmem:[%s3285_s8 + $0x5ec] ss:$16 sps:$4 sm:$0xff]  }
  0xd2   : > { %1923 = vmatmul.mubr.bf16.vlgmr.msra.gmra.mrb[0].mxu0 %v557_v24  ;;  %2087 = vmatmul.mubr.bf16.vlgmr.msra.gmra.mrb[0].mxu1 %v557_v24  ;;  %v2931_v24 = vld [vmem:[%s3285_s8 + $0x5e8] ss:$16 sps:$4 sm:$0xff]  }
  0xd3   : > { %1932 = vmatpush1.bf16.msra.mxu0 %v2838_v23  ;;  %2096 = vmatpush1.bf16.msra.mxu1 %v2841_v25  ;;  %v2928_v23 = vld [vmem:[%s3285_s8 + $0x5e0] ss:$16 sps:$4 sm:$0xff]   ;;  %v2937_v25 = vld [vmem:[%s3285_s8 + $0x604] ss:$16 sps:$4 sm:$0xff]  }
  0xd4   : > { %1933 = vmatprep.subr.bf16.mxu0 %v2846_v26  ;;  %2097 = vmatprep.subr.bf16.mxu1 %v2849_v27  ;;  %v2940_v26 = vld [vmem:[%s3285_s8 + $0x60c] ss:$16 sps:$4 sm:$0xff]   ;;  %v2935_v27 = vld [vmem:[%s3285_s8 + $0x600] ss:$16 sps:$4 sm:$0xff]  }
  0xd5   : > { %1963 = vmatprep.mubr.bf16.mxu0 %v3382_v20  ;;  %2127 = vmatprep.mubr.bf16.mxu1 %v3382_v20 }
  0xd7   : > { %1934 = vmatpush1.bf16.msra.mxu0 %v2844_v28  ;;  %2098 = vmatpush1.bf16.msra.mxu1 %v2847_v15  ;;  %v2938_v28 = vld [vmem:[%s3285_s8 + $0x608] ss:$16 sps:$4 sm:$0xff]   ;;  %v2943_v15 = vld [vmem:[%s3285_s8 + $0x624] ss:$16 sps:$4 sm:$0xff]  }
  0xd8   : > { %1935 = vmatprep.subr.bf16.mxu0 %v2852_v29  ;;  %2099 = vmatprep.subr.bf16.mxu1 %v2855_v30  ;;  %v2946_v29 = vld [vmem:[%s3285_s8 + $0x62c] ss:$16 sps:$4 sm:$0xff]   ;;  %v560_v30 = vcombine.high %v3382_v20, %v3382_v20  ;;  %v2947_v20 = vld [vmem:[%s3285_s8 + $0x640] ss:$16 sps:$4 sm:$0xff]  }
  0xdb   : > { %1936 = vmatpush1.bf16.msra.mxu0 %v2850_v31  ;;  %2100 = vmatpush1.bf16.msra.mxu1 %v2853_v32  ;;  %v2941_v31 = vld [vmem:[%s3285_s8 + $0x620] ss:$16 sps:$4 sm:$0xff]   ;;  %v2944_v32 = vld [vmem:[%s3285_s8 + $0x628] ss:$16 sps:$4 sm:$0xff]  }
  0xdc   : > { %1937 = vmatprep.subr.bf16.mxu0 %v2858_v33  ;;  %2101 = vmatprep.subr.bf16.mxu1 %v2861_v34  ;;  %v2949_v33 = vld [vmem:[%s3285_s8 + $0x644] ss:$16 sps:$4 sm:$0xff]   ;;  %v2952_v34 = vld [vmem:[%s3285_s8 + $0x64c] ss:$16 sps:$4 sm:$0xff]  }
  0xdf   : > { %1938 = vmatpush1.bf16.msra.mxu0 %v2856_v35  ;;  %2102 = vmatpush1.bf16.msra.mxu1 %v2859_v36  ;;  %v2950_v35 = vld [vmem:[%s3285_s8 + $0x648] ss:$16 sps:$4 sm:$0xff]   ;;  %v2955_v36 = vld [vmem:[%s3285_s8 + $0x664] ss:$16 sps:$4 sm:$0xff]  }
  0xe0   : > { %1939 = vmatprep.subr.bf16.mxu0 %v2864_v37  ;;  %2103 = vmatprep.subr.bf16.mxu1 %v2867_v38  ;;  %v2958_v37 = vld [vmem:[%s3285_s8 + $0x66c] ss:$16 sps:$4 sm:$0xff]   ;;  %v2953_v38 = vld [vmem:[%s3285_s8 + $0x660] ss:$16 sps:$4 sm:$0xff]  }
  0xe3   : > { %1940 = vmatpush1.bf16.msra.mxu0 %v2862_v39  ;;  %2104 = vmatpush1.bf16.msra.mxu1 %v2865_v40  ;;  %v2956_v39 = vld [vmem:[%s3285_s8 + $0x668] ss:$16 sps:$4 sm:$0xff]   ;;  %v2961_v40 = vld [vmem:[%s3285_s8 + $0x684] ss:$16 sps:$4 sm:$0xff]  }
  0xe4   : > { %1941 = vmatprep.subr.bf16.mxu0 %v2870_v41  ;;  %2105 = vmatprep.subr.bf16.mxu1 %v2873_v43  ;;  %v2964_v41 = vld [vmem:[%s3285_s8 + $0x68c] ss:$16 sps:$4 sm:$0xff]   ;;  %v2959_v43 = vld [vmem:[%s3285_s8 + $0x680] ss:$16 sps:$4 sm:$0xff]  }
  0xe7   : > { %1942 = vmatpush1.bf16.msra.mxu0 %v2868_v44  ;;  %2106 = vmatpush1.bf16.msra.mxu1 %v2871_v45  ;;  %v2962_v44 = vld [vmem:[%s3285_s8 + $0x688] ss:$16 sps:$4 sm:$0xff]   ;;  %v2967_v45 = vld [vmem:[%s3285_s8 + $0x6a4] ss:$16 sps:$4 sm:$0xff]  }
  0xe8   : > { %1943 = vmatprep.subr.bf16.mxu0 %v2876_v46  ;;  %2107 = vmatprep.subr.bf16.mxu1 %v2879_v47  ;;  %v2970_v46 = vld [vmem:[%s3285_s8 + $0x6ac] ss:$16 sps:$4 sm:$0xff]   ;;  %v2965_v47 = vld [vmem:[%s3285_s8 + $0x6a0] ss:$16 sps:$4 sm:$0xff]  }
  0xeb   : > { %1944 = vmatpush1.bf16.msra.mxu0 %v2874_v48  ;;  %2108 = vmatpush1.bf16.msra.mxu1 %v2877_v49  ;;  %v2968_v48 = vld [vmem:[%s3285_s8 + $0x6a8] ss:$16 sps:$4 sm:$0xff]   ;;  %v2973_v49 = vld [vmem:[%s3285_s8 + $0x6c4] ss:$16 sps:$4 sm:$0xff]  }
  0xec   : > { %1945 = vmatprep.subr.bf16.mxu0 %v2882_v50  ;;  %2109 = vmatprep.subr.bf16.mxu1 %v2885_v51  ;;  %v2976_v50 = vld [vmem:[%s3285_s8 + $0x6cc] ss:$16 sps:$4 sm:$0xff]   ;;  %v2971_v51 = vld [vmem:[%s3285_s8 + $0x6c0] ss:$16 sps:$4 sm:$0xff]  }
  0xef   : > { %1946 = vmatpush1.bf16.msra.mxu0 %v2880_v52  ;;  %2110 = vmatpush1.bf16.msra.mxu1 %v2883_v53  ;;  %v2974_v52 = vld [vmem:[%s3285_s8 + $0x6c8] ss:$16 sps:$4 sm:$0xff]   ;;  %v2979_v53 = vld [vmem:[%s3285_s8 + $0x6e4] ss:$16 sps:$4 sm:$0xff]  }
  0xf0   : > { %1947 = vmatprep.subr.bf16.mxu0 %v2888_v54  ;;  %2111 = vmatprep.subr.bf16.mxu1 %v2891_v55  ;;  %v2982_v54 = vld [vmem:[%s3285_s8 + $0x6ec] ss:$16 sps:$4 sm:$0xff]   ;;  %v2977_v55 = vld [vmem:[%s3285_s8 + $0x6e0] ss:$16 sps:$4 sm:$0xff]  }
  0xf3   : > { %1948 = vmatpush1.bf16.msra.mxu0 %v2886_v56  ;;  %2112 = vmatpush1.bf16.msra.mxu1 %v2889_v57  ;;  %v2980_v56 = vld [vmem:[%s3285_s8 + $0x6e8] ss:$16 sps:$4 sm:$0xff]   ;;  %v2985_v57 = vld [vmem:[%s3285_s8 + $0x704] ss:$16 sps:$4 sm:$0xff]  }
  0xf4   : > { %1949 = vmatprep.subr.bf16.mxu0 %v2894_v58  ;;  %2113 = vmatprep.subr.bf16.mxu1 %v2897_v59  ;;  %v2988_v58 = vld [vmem:[%s3285_s8 + $0x70c] ss:$16 sps:$4 sm:$0xff]   ;;  %v2983_v59 = vld [vmem:[%s3285_s8 + $0x700] ss:$16 sps:$4 sm:$0xff]  }
  0xf7   : > { %1950 = vmatpush1.bf16.msra.mxu0 %v2892_v60  ;;  %2114 = vmatpush1.bf16.msra.mxu1 %v2895_v61  ;;  %v2986_v60 = vld [vmem:[%s3285_s8 + $0x708] ss:$16 sps:$4 sm:$0xff]   ;;  %v2991_v61 = vld [vmem:[%s3285_s8 + $0x724] ss:$16 sps:$4 sm:$0xff]  }
  0xf8   : > { %1951 = vmatprep.subr.bf16.mxu0 %v2900_v62  ;;  %2115 = vmatprep.subr.bf16.mxu1 %v2903_v63  ;;  %v2994_v62 = vld [vmem:[%s3285_s8 + $0x72c] ss:$16 sps:$4 sm:$0xff]   ;;  %v2989_v63 = vld [vmem:[%s3285_s8 + $0x720] ss:$16 sps:$4 sm:$0xff]  }
  0xfb   : > { %1952 = vmatpush1.bf16.msra.mxu0 %v2898_v0  ;;  %2116 = vmatpush1.bf16.msra.mxu1 %v2901_v1  ;;  %v2992_v0 = vld [vmem:[%s3285_s8 + $0x728] ss:$16 sps:$4 sm:$0xff]   ;;  %v2997_v1 = vld [vmem:[%s3285_s8 + $0x744] ss:$16 sps:$4 sm:$0xff]  }
  0xfc   : > { %1953 = vmatprep.subr.bf16.mxu0 %v2906_v2  ;;  %2117 = vmatprep.subr.bf16.mxu1 %v2909_v3  ;;  %v3000_v2 = vld [vmem:[%s3285_s8 + $0x74c] ss:$16 sps:$4 sm:$0xff]   ;;  %v2995_v3 = vld [vmem:[%s3285_s8 + $0x740] ss:$16 sps:$4 sm:$0xff]  }
  0xff   : > { %1954 = vmatpush1.bf16.msra.mxu0 %v2904_v4  ;;  %2118 = vmatpush1.bf16.msra.mxu1 %v2907_v5  ;;  %v2998_v4 = vld [vmem:[%s3285_s8 + $0x748] ss:$16 sps:$4 sm:$0xff]   ;;  %v3003_v5 = vld [vmem:[%s3285_s8 + $0x764] ss:$16 sps:$4 sm:$0xff]  }
 0x100   : > { %1955 = vmatprep.subr.bf16.mxu0 %v2912_v6  ;;  %2119 = vmatprep.subr.bf16.mxu1 %v2915_v7  ;;  %v3006_v6 = vld [vmem:[%s3285_s8 + $0x76c] ss:$16 sps:$4 sm:$0xff]   ;;  %v3001_v7 = vld [vmem:[%s3285_s8 + $0x760] ss:$16 sps:$4 sm:$0xff]  }
 0x103   : > { %1956 = vmatpush1.bf16.msra.mxu0 %v2910_v8  ;;  %2120 = vmatpush1.bf16.msra.mxu1 %v2913_v9  ;;  %v3004_v8 = vld [vmem:[%s3285_s8 + $0x768] ss:$16 sps:$4 sm:$0xff]   ;;  %v3009_v9 = vld [vmem:[%s3285_s8 + $0x784] ss:$16 sps:$4 sm:$0xff]  }
 0x104   : > { %1957 = vmatprep.subr.bf16.mxu0 %v2918_v10  ;;  %2121 = vmatprep.subr.bf16.mxu1 %v2921_v11  ;;  %v3012_v10 = vld [vmem:[%s3285_s8 + $0x78c] ss:$16 sps:$4 sm:$0xff]   ;;  %v3007_v11 = vld [vmem:[%s3285_s8 + $0x780] ss:$16 sps:$4 sm:$0xff]  }
 0x107   : > { %1958 = vmatpush1.bf16.msra.mxu0 %v2916_v12  ;;  %2122 = vmatpush1.bf16.msra.mxu1 %v2919_v13  ;;  %v3010_v12 = vld [vmem:[%s3285_s8 + $0x788] ss:$16 sps:$4 sm:$0xff]   ;;  %v3015_v13 = vld [vmem:[%s3285_s8 + $0x7a4] ss:$16 sps:$4 sm:$0xff]  }
 0x108   : > { %1959 = vmatprep.subr.bf16.mxu0 %v2924_v14  ;;  %2123 = vmatprep.subr.bf16.mxu1 %v2927_v16  ;;  %v3018_v14 = vld [vmem:[%s3285_s8 + $0x7ac] ss:$16 sps:$4 sm:$0xff]   ;;  %v3013_v16 = vld [vmem:[%s3285_s8 + $0x7a0] ss:$16 sps:$4 sm:$0xff]  }
 0x10b   : > { %1960 = vmatpush1.bf16.msra.mxu0 %v2922_v17  ;;  %2124 = vmatpush1.bf16.msra.mxu1 %v2925_v18  ;;  %v3016_v17 = vld [vmem:[%s3285_s8 + $0x7a8] ss:$16 sps:$4 sm:$0xff]   ;;  %v3021_v18 = vld [vmem:[%s3285_s8 + $0x7c4] ss:$16 sps:$4 sm:$0xff]  }
 0x10c   : > { %1961 = vmatprep.subr.bf16.mxu0 %v2930_v19  ;;  %2125 = vmatprep.subr.bf16.mxu1 %v2933_v22  ;;  %v3024_v19 = vld [vmem:[%s3285_s8 + $0x7cc] ss:$16 sps:$4 sm:$0xff]   ;;  %v3019_v22 = vld [vmem:[%s3285_s8 + $0x7c0] ss:$16 sps:$4 sm:$0xff]  }
 0x10f   : > { %1962 = vmatpush1.bf16.msra.mxu0 %v2928_v23  ;;  %2126 = vmatpush1.bf16.msra.mxu1 %v2931_v24  ;;  %v3022_v23 = vld [vmem:[%s3285_s8 + $0x7c8] ss:$16 sps:$4 sm:$0xff]   ;;  %v3027_v24 = vld [vmem:[%s3285_s8 + $0x7e4] ss:$16 sps:$4 sm:$0xff]  }
 0x110   : > { %1972 = vmatprep.subr.bf16.mxu0 %v2937_v25  ;;  %2136 = vmatprep.subr.bf16.mxu1 %v2940_v26  ;;  %v3030_v25 = vld [vmem:[%s3285_s8 + $0x7ec] ss:$16 sps:$4 sm:$0xff]   ;;  %v3025_v26 = vld [vmem:[%s3285_s8 + $0x7e0] ss:$16 sps:$4 sm:$0xff]  }
 0x112   : > { %1964 = vmatmul.mubr.bf16.vlgmr.msra.gmra.mrb[0].mxu0 %v3385_v21  ;;  %2128 = vmatmul.mubr.bf16.vlgmr.msra.gmra.mrb[0].mxu1 %v3385_v21 }
 0x113   : > { %1973 = vmatpush1.bf16.msra.mxu0 %v2935_v27  ;;  %2137 = vmatpush1.bf16.msra.mxu1 %v2938_v28  ;;  %v3028_v27 = vld [vmem:[%s3285_s8 + $0x7e8] ss:$16 sps:$4 sm:$0xff]   ;;  %v558_v28 = vcombine.high %v3385_v21, %v3385_v21 }
 0x114   : > { %1974 = vmatprep.subr.bf16.mxu0 %v2943_v15  ;;  %2138 = vmatprep.subr.bf16.mxu1 %v2946_v29  ;;  %v493_v15 = vsub.s32 0, %v3336_v42  ;;  %v501_v29 = vsub.s32 2, %v3336_v42 }
 0x115   : > { %2004 = vmatprep.mubr.bf16.mxu0 %v560_v30  ;;  %2168 = vmatprep.mubr.bf16.mxu1 %v560_v30  ;;  %v489_v30 = vld [vmem:[%s3291_s29] sm:$0xf] }
 0x117   : > { %1975 = vmatpush1.bf16.msra.mxu0 %v2941_v31  ;;  %2139 = vmatpush1.bf16.msra.mxu1 %v2944_v32  ;;  %v497_v31 = vsub.s32 1, %v3336_v42  ;;  %v505_v32 = vsub.s32 3, %v3336_v42 }
 0x118   : > { %1976 = vmatprep.subr.bf16.mxu0 %v2949_v33  ;;  %2140 = vmatprep.subr.bf16.mxu1 %v2952_v34  ;;  %v494_v33 = vrot.slane %v489_v30, %v493_v15  ;;  %v502_v34 = vrot.slane %v489_v30, %v501_v29 }
 0x11b   : > { %1977 = vmatpush1.bf16.msra.mxu0 %v2947_v20  ;;  %2141 = vmatpush1.bf16.msra.mxu1 %v2950_v35  ;;  %v498_v20 = vrot.slane %v489_v30, %v497_v31  ;;  %v506_v35 = vrot.slane %v489_v30, %v505_v32 }
 0x11c   : > { %1978 = vmatprep.subr.bf16.mxu0 %v2955_v36  ;;  %2142 = vmatprep.subr.bf16.mxu1 %v2958_v37 }
 0x11f   : > { %1979 = vmatpush1.bf16.msra.mxu0 %v2953_v38  ;;  %2143 = vmatpush1.bf16.msra.mxu1 %v2956_v39 }
 0x120   : > { %1980 = vmatprep.subr.bf16.mxu0 %v2961_v40  ;;  %2144 = vmatprep.subr.bf16.mxu1 %v2964_v41 }
 0x123   : > { %1981 = vmatpush1.bf16.msra.mxu0 %v2959_v43  ;;  %2145 = vmatpush1.bf16.msra.mxu1 %v2962_v44 }
 0x124   : > { %1982 = vmatprep.subr.bf16.mxu0 %v2967_v45  ;;  %2146 = vmatprep.subr.bf16.mxu1 %v2970_v46 }
 0x127   : > { %1983 = vmatpush1.bf16.msra.mxu0 %v2965_v47  ;;  %2147 = vmatpush1.bf16.msra.mxu1 %v2968_v48  ;;  %v3145_v48 = vmov 1983009808  }
 0x128   : > { %1984 = vmatprep.subr.bf16.mxu0 %v2973_v49  ;;  %2148 = vmatprep.subr.bf16.mxu1 %v2976_v50  ;;  %v2188_v49 = vunpack.c.l.s4 %v3145_v48 }
 0x12a   : > { %v2189_v50 = vunpack.c.0.s8 %v2188_v49 }
 0x12b   : > { %1985 = vmatpush1.bf16.msra.mxu0 %v2971_v51  ;;  %2149 = vmatpush1.bf16.msra.mxu1 %v2974_v52 }
 0x12c   : > { %1986 = vmatprep.subr.bf16.mxu0 %v2979_v53  ;;  %2150 = vmatprep.subr.bf16.mxu1 %v2982_v54  ;;  %v2192_v53 = vsub.s32 %v2189_v50, %v3336_v42 }
 0x12f   : > { %1987 = vmatpush1.bf16.msra.mxu0 %v2977_v55  ;;  %2151 = vmatpush1.bf16.msra.mxu1 %v2980_v56 }
 0x130   : > { %1988 = vmatprep.subr.bf16.mxu0 %v2985_v57  ;;  %2152 = vmatprep.subr.bf16.mxu1 %v2988_v58 }
 0x133   : > { %1989 = vmatpush1.bf16.msra.mxu0 %v2983_v59  ;;  %2153 = vmatpush1.bf16.msra.mxu1 %v2986_v60 }
 0x134   : > { %1990 = vmatprep.subr.bf16.mxu0 %v2991_v61  ;;  %2154 = vmatprep.subr.bf16.mxu1 %v2994_v62 }
 0x137   : > { %1991 = vmatpush1.bf16.msra.mxu0 %v2989_v63  ;;  %2155 = vmatpush1.bf16.msra.mxu1 %v2992_v0 }
 0x138   : > { %1992 = vmatprep.subr.bf16.mxu0 %v2997_v1  ;;  %2156 = vmatprep.subr.bf16.mxu1 %v3000_v2 }
 0x13b   : > { %1993 = vmatpush1.bf16.msra.mxu0 %v2995_v3  ;;  %2157 = vmatpush1.bf16.msra.mxu1 %v2998_v4 }
 0x13c   : > { %1994 = vmatprep.subr.bf16.mxu0 %v3003_v5  ;;  %2158 = vmatprep.subr.bf16.mxu1 %v3006_v6 }
 0x13f   : > { %1995 = vmatpush1.bf16.msra.mxu0 %v3001_v7  ;;  %2159 = vmatpush1.bf16.msra.mxu1 %v3004_v8 }
 0x140   : > { %1996 = vmatprep.subr.bf16.mxu0 %v3009_v9  ;;  %2160 = vmatprep.subr.bf16.mxu1 %v3012_v10 }
 0x143   : > { %1997 = vmatpush1.bf16.msra.mxu0 %v3007_v11  ;;  %2161 = vmatpush1.bf16.msra.mxu1 %v3010_v12 }
 0x144   : > { %1998 = vmatprep.subr.bf16.mxu0 %v3015_v13  ;;  %2162 = vmatprep.subr.bf16.mxu1 %v3018_v14 }
 0x147   : > { %1999 = vmatpush1.bf16.msra.mxu0 %v3013_v16  ;;  %2163 = vmatpush1.bf16.msra.mxu1 %v3016_v17 }
 0x148   : > { %2000 = vmatprep.subr.bf16.mxu0 %v3021_v18  ;;  %2164 = vmatprep.subr.bf16.mxu1 %v3024_v19 }
 0x14b   : > { %2001 = vmatpush1.bf16.msra.mxu0 %v3019_v22  ;;  %2165 = vmatpush1.bf16.msra.mxu1 %v3022_v23 }
 0x14c   : > { %2002 = vmatprep.subr.bf16.mxu0 %v3027_v24  ;;  %2166 = vmatprep.subr.bf16.mxu1 %v3030_v25 }
 0x14f   : > { %2003 = vmatpush1.bf16.msra.mxu0 %v3025_v26  ;;  %2167 = vmatpush1.bf16.msra.mxu1 %v3028_v27 }
 0x152   : > { %2005 = vmatmul.mubr.bf16.vlgmr.msra.gmra.mrb[0].mxu0 %v558_v28  ;;  %2169 = vmatmul.mubr.bf16.vlgmr.msra.gmra.mrb[0].mxu1 %v558_v28 }
 0x225   : > { %v2006_v36 = vpop.f32.mrb[0].mxu0  ;;  %v2170_v37 = vpop.f32.mrb[0].mxu1 }
 0x226   : > { %v2569_v21 = vadd.f32 %v2006_v36, %v494_v33  ;;  %v2571_v38 = vadd.f32 %v2170_v37, %v502_v34  ;;  %v2008_v39 = vpop.f32.mrb[1].mxu0  ;;  %v2172_v40 = vpop.f32.mrb[1].mxu1 }
 0x227   : > { %v2570_v41 = vadd.f32 %v2008_v39, %v498_v20  ;;  %v2572_v43 = vadd.f32 %v2172_v40, %v506_v35  ;;  %v2010_v44 = vpop.f32.mrb[2].mxu0  ;;  %v2174_v45 = vpop.f32.mrb[2].mxu1 }
 0x228   : > { %3031 = vtanh.f32 %v2569_v21  ;;  %v2011_v46 = vpop.f32.mrb[3].mxu0  ;;  %v2175_v47 = vpop.f32.mrb[3].mxu1 }
 0x229   : > { %3033 = vtanh.f32 %v2571_v38 }
 0x22a   : > { %3035 = vtanh.f32 %v2570_v41 }
 0x22b   : > { %3037 = vtanh.f32 %v2572_v43 }
 0x232   : > { %v3032_v51 = vpop.eup %3031 }
 0x233   : > { %v3034_v52 = vpop.eup %3033 }
 0x234   : > { %v3036_v54 = vpop.eup %3035 }
 0x235   : > { %v3038_v55 = vpop.eup %3037  ;;  %v2185_v56 = vcombine.low %v3032_v51, %v3036_v54 }
 0x236   : > { %v2186_v57 = vcombine.low %v3034_v52, %v3038_v55 }
 0x237   : > { %v2193_v58 = vrot.slane %v2185_v56, %v2192_v53 }
 0x238   : > { %v2200_v59 = vrot.slane %v2186_v57, %v2192_v53 }
 0x23a   : > { %v2201_v60 = vcombine.low %v2193_v58, %v2200_v59 }
 0x23c   : > { %2203 = vst [vmem:[%s230_s15] sm:$0xff] %v2201_v60 }
 0x23d PF: > { %p16_p8 = scmp.ge.s32.totalorder %s3186_s17, 8   ;;  %s3619_s12 = smov %s3129_s13 }
 0x23e   : > { %s3620_s13 = smov %s3133_s14  ;;  %s3621_s14 = smov %s3196_s20 }
 0x23f   : > { %s3622_s15 = smov %s3186_s17  ;;  %18 = sbr.rel (!%p16_p8) target bundleno = 5 (0x5), region = 85 }
 0x246   :  { %2226 = vsyncpa [#allocation3], 1 }
 0x247   :  { %2228 = vsyncpa [#allocation3 + $0x1], 1 }
 0x248   :  { %2229 = vsyncpa [#allocation5], 1 }
 0x249   :  { %2231 = vsyncpa [#allocation5 + $0x1], 1 }

// kernel: basic_generator.2
= control target key start
LH: loop header
LB: loop body
LE: loop exit
PB: predicated region body
PF: predicated region fallthrough
CT: control target
= control target key end

     0   :  { %20 = vsyncpa [#allocation3], 0  ;;  %s4918_s0 = inlined_call_operand.vmem [shape: f32[2,128], index: 0, kind: input, shape index: {}]   ;;  %s4919_s1 = inlined_call_operand.hbm [shape: bf16[128,128], index: 1, kind: input, shape index: {}]   ;;  %s4920_s2 = inlined_call_operand.hbm [shape: f32[1,128], index: 2, kind: input, shape index: {}]   ;;  %s4921_s3 = inlined_call_operand.hbm [shape: bf16[128,256], index: 3, kind: input, shape index: {}]   ;;  %s4922_s4 = inlined_call_operand.hbm [shape: f32[1,256], index: 4, kind: input, shape index: {}]   ;;  %s4923_s5 = inlined_call_operand.hbm [shape: f32[1,256], index: 5, kind: input, shape index: {}]   ;;  %s4924_s6 = inlined_call_operand.hbm [shape: f32[1,256], index: 6, kind: input, shape index: {}]   ;;  %s4925_s7 = inlined_call_operand.hbm [shape: bf16[256,512], index: 7, kind: input, shape index: {}]   ;;  %s4926_s8 = inlined_call_operand.hbm [shape: f32[1,512], index: 8, kind: input, shape index: {}]   ;;  %s4927_s9 = inlined_call_operand.hbm [shape: f32[1,512], index: 9, kind: input, shape index: {}]   ;;  %s4928_s10 = inlined_call_operand.hbm [shape: f32[1,512], index: 10, kind: input, shape index: {}]   ;;  %s4929_s11 = inlined_call_operand.hbm [shape: bf16[512,1024], index: 11, kind: input, shape index: {}]   ;;  %s4930_s12 = inlined_call_operand.hbm [shape: f32[1,1024], index: 12, kind: input, shape index: {}]   ;;  %s4931_s13 = inlined_call_operand.hbm [shape: f32[1,1024], index: 13, kind: input, shape index: {}]   ;;  %s4932_s14 = inlined_call_operand.hbm [shape: f32[1,1024], index: 14, kind: input, shape index: {}]   ;;  %s4933_s15 = inlined_call_operand.vmem [shape: bf16[2,1024], index: 15, kind: output, shape index: {}]  }
   0x1   :  { %21 = vsyncpa [#allocation5], 0 }
   0x2   :  { %22 = vsyncpa [#allocation8], 0 }
   0x3   :  { %23 = vsyncpa [#allocation11], 0 }
   0x4   :  { %24 = vsyncpa [#allocation14], 0 }
   0x5   :  { %25 = vsyncpa [#allocation17], 0 }
   0x6   :  { %26 = vsyncpa [#allocation20], 0 }
   0x7   :  { %27 = vsyncpa [#allocation23], 0  ;;  %s4392_s18 = smov [#allocation4]   ;;  %s4393_s20 = smov [#allocation7]  }
   0x8   :  { %s48_s19 = sshll.u32 %s4392_s18, 4  ;;  %s70_s21 = sshll.u32 %s4393_s20, 4  ;;  %s49_s19 = int_to_ptr.vmem [resolvable:$true] %s48_s19  ;;  %s71_s21 = int_to_ptr.vmem [resolvable:$true] %s70_s21 }
   0x9   :  { %s4068_s24 = scalar_lea.hbm %s4920_s2, 16 }
   0xa   :  { %p4069_p0 = scmp.ne.s32.totalorder %s4920_s2, %s4068_s24  ;;  %p4072_p1 = scmp.lt.u32.totalorder %s4068_s24, %s4920_s2 }
   0xc   :  { %p4074_p2 = pnand %p4072_p1, %p4069_p0 }
   0xe   :  { %4077 = shalt.err (!%p4074_p2)
}
   0xf   :  { %s4078_s29 = scalar_lea.vmem %s49_s19, 16  ;;  %s4082_s30 = scalar_lea.vmem %s49_s19, 32 }
  0x10   :  { %p4079_p3 = scmp.ne.s32.totalorder %s49_s19, %s4078_s29  ;;  %p4083_p4 = scmp.lt.s32.totalorder %s49_s19, %s49_s19 }
  0x11   :  { %p4084_p5 = scmp.lt.s32.totalorder %s4082_s30, %s4078_s29 }
  0x13   :  { %p4085_p6 = por %p4084_p5, %p4083_p4 }
  0x15   :  { %p4086_p7 = pnand %p4085_p6, %p4079_p3 }
  0x17   :  { %4089 = shalt.err (!%p4086_p7)
}
  0x18   :  { %51 = dma.hbm_to_vmem [thread:$0]  %s4920_s2, 16, %s49_s19, [#allocation5]  }
  0x19   :  { %s4090_s22 = scalar_lea.hbm %s4922_s4, 32 }
  0x1a   :  { %p4091_p8 = scmp.ne.s32.totalorder %s4922_s4, %s4090_s22  ;;  %p4094_p9 = scmp.lt.u32.totalorder %s4090_s22, %s4922_s4 }
  0x1c   :  { %p4096_p10 = pnand %p4094_p9, %p4091_p8 }
  0x1e   :  { %4099 = shalt.err (!%p4096_p10)
}
  0x1f   :  { %s4100_s27 = scalar_lea.vmem %s71_s21, 32  ;;  %p4105_p12 = scmp.lt.s32.totalorder %s71_s21, %s71_s21 }
  0x20   :  { %p4101_p11 = scmp.ne.s32.totalorder %s71_s21, %s4100_s27  ;;  %p4106_p13 = scmp.lt.s32.totalorder %s4100_s27, %s4100_s27 }
  0x22   :  { %p4107_p0 = por %p4106_p13, %p4105_p12 }
  0x24   :  { %p4108_p1 = pnand %p4107_p0, %p4101_p11 }
  0x26   :  { %4111 = shalt.err (!%p4108_p1)
}
  0x27   :  { %73 = dma.hbm_to_vmem [thread:$0]  %s4922_s4, 32, %s71_s21, [#allocation8]  }
  0x28   :  { %s4394_s28 = smov [#allocation10]   ;;  %s4395_s30 = smov [#allocation13]  }
  0x29   :  { %s90_s29 = sshll.u32 %s4394_s28, 4  ;;  %s112_s16 = sshll.u32 %s4395_s30, 4  ;;  %s91_s29 = int_to_ptr.vmem [resolvable:$true] %s90_s29  ;;  %s113_s16 = int_to_ptr.vmem [resolvable:$true] %s112_s16 }
  0x2a   :  { %s4112_s20 = scalar_lea.hbm %s4924_s6, 32 }
  0x2b   :  { %p4113_p2 = scmp.ne.s32.totalorder %s4924_s6, %s4112_s20  ;;  %p4116_p3 = scmp.lt.u32.totalorder %s4112_s20, %s4924_s6 }
  0x2d   :  { %p4118_p4 = pnand %p4116_p3, %p4113_p2 }
  0x2f   :  { %4121 = shalt.err (!%p4118_p4)
}
  0x30   :  { %s4122_s4 = scalar_lea.vmem %s91_s29, 32  ;;  %p4127_p6 = scmp.lt.s32.totalorder %s91_s29, %s91_s29 }
  0x31   :  { %p4123_p5 = scmp.ne.s32.totalorder %s91_s29, %s4122_s4  ;;  %p4128_p7 = scmp.lt.s32.totalorder %s4122_s4, %s4122_s4 }
  0x33   :  { %p4129_p8 = por %p4128_p7, %p4127_p6 }
  0x35   :  { %p4130_p9 = pnand %p4129_p8, %p4123_p5 }
  0x37   :  { %4133 = shalt.err (!%p4130_p9)
}
  0x38   :  { %93 = dma.hbm_to_vmem [thread:$0]  %s4924_s6, 32, %s91_s29, [#allocation11]  }
  0x39   :  { %s4134_s19 = scalar_lea.hbm %s4926_s8, 64 }
  0x3a   :  { %p4135_p10 = scmp.ne.s32.totalorder %s4926_s8, %s4134_s19  ;;  %p4138_p11 = scmp.lt.u32.totalorder %s4134_s19, %s4926_s8 }
  0x3c   :  { %p4140_p12 = pnand %p4138_p11, %p4135_p10 }
  0x3e   :  { %4143 = shalt.err (!%p4140_p12)
}
  0x3f   :  { %s4144_s20 = scalar_lea.vmem %s113_s16, 64  ;;  %p4149_p0 = scmp.lt.s32.totalorder %s113_s16, %s113_s16 }
  0x40   :  { %p4145_p13 = scmp.ne.s32.totalorder %s113_s16, %s4144_s20  ;;  %p4150_p1 = scmp.lt.s32.totalorder %s4144_s20, %s4144_s20 }
  0x42   :  { %p4151_p2 = por %p4150_p1, %p4149_p0 }
  0x44   :  { %p4152_p3 = pnand %p4151_p2, %p4145_p13 }
  0x46   :  { %4155 = shalt.err (!%p4152_p3)
}
  0x47   :  { %115 = dma.hbm_to_vmem [thread:$0]  %s4926_s8, 64, %s113_s16, [#allocation14]  }
  0x48   :  { %s4396_s22 = smov [#allocation16]   ;;  %s4397_s24 = smov [#allocation19]  }
  0x49   :  { %s132_s23 = sshll.u32 %s4396_s22, 4  ;;  %s154_s25 = sshll.u32 %s4397_s24, 4  ;;  %s133_s23 = int_to_ptr.vmem [resolvable:$true] %s132_s23  ;;  %s155_s25 = int_to_ptr.vmem [resolvable:$true] %s154_s25 }
  0x4a   :  { %s4156_s26 = scalar_lea.hbm %s4928_s10, 64 }
  0x4b   :  { %p4157_p4 = scmp.ne.s32.totalorder %s4928_s10, %s4156_s26  ;;  %p4160_p5 = scmp.lt.u32.totalorder %s4156_s26, %s4928_s10 }
  0x4d   :  { %p4162_p6 = pnand %p4160_p5, %p4157_p4 }
  0x4f   :  { %4165 = shalt.err (!%p4162_p6)
}
  0x50   :  { %s4166_s8 = scalar_lea.vmem %s133_s23, 64  ;;  %p4171_p8 = scmp.lt.s32.totalorder %s133_s23, %s133_s23 }
  0x51   :  { %p4167_p7 = scmp.ne.s32.totalorder %s133_s23, %s4166_s8  ;;  %p4172_p9 = scmp.lt.s32.totalorder %s4166_s8, %s4166_s8 }
  0x53   :  { %p4173_p10 = por %p4172_p9, %p4171_p8 }
  0x55   :  { %p4174_p11 = pnand %p4173_p10, %p4167_p7 }
  0x57   :  { %4177 = shalt.err (!%p4174_p11)
}
  0x58   :  { %135 = dma.hbm_to_vmem [thread:$0]  %s4928_s10, 64, %s133_s23, [#allocation17]  }
  0x59   :  { %s4178_s20 = scalar_lea.hbm %s4930_s12, 128 }
  0x5a   :  { %p4179_p12 = scmp.ne.s32.totalorder %s4930_s12, %s4178_s20  ;;  %p4182_p13 = scmp.lt.u32.totalorder %s4178_s20, %s4930_s12 }
  0x5c   :  { %p4184_p0 = pnand %p4182_p13, %p4179_p12 }
  0x5e   :  { %4187 = shalt.err (!%p4184_p0)
}
  0x5f   :  { %s4188_s4 = scalar_lea.vmem %s155_s25, 128  ;;  %p4193_p2 = scmp.lt.s32.totalorder %s155_s25, %s155_s25 }
  0x60   :  { %p4189_p1 = scmp.ne.s32.totalorder %s155_s25, %s4188_s4  ;;  %p4194_p3 = scmp.lt.s32.totalorder %s4188_s4, %s4188_s4 }
  0x62   :  { %p4195_p4 = por %p4194_p3, %p4193_p2 }
  0x64   :  { %p4196_p5 = pnand %p4195_p4, %p4189_p1 }
  0x66   :  { %4199 = shalt.err (!%p4196_p5)
}
  0x67   :  { %157 = dma.hbm_to_vmem [thread:$0]  %s4930_s12, 128, %s155_s25, [#allocation20]  }
  0x68   :  { %s4398_s21 = smov [#allocation2]   ;;  %s4200_s19 = scalar_lea.hbm %s4919_s1, 1024 }
  0x69   :  { %s35_s26 = sshll.u32 %s4398_s21, 4  ;;  %p4201_p6 = scmp.ne.s32.totalorder %s4919_s1, %s4200_s19  ;;  %s36_s26 = int_to_ptr.vmem [resolvable:$true] %s35_s26 }
  0x6a   :  { %p4204_p7 = scmp.lt.u32.totalorder %s4200_s19, %s4919_s1 }
  0x6c   :  { %p4206_p8 = pnand %p4204_p7, %p4201_p6 }
  0x6e   :  { %4209 = shalt.err (!%p4206_p8)
}
  0x6f   :  { %s4210_s17 = scalar_lea.vmem %s36_s26, 1024  ;;  %p4215_p10 = scmp.lt.s32.totalorder %s36_s26, %s36_s26 }
  0x70   :  { %p4211_p9 = scmp.ne.s32.totalorder %s36_s26, %s4210_s17  ;;  %p4216_p11 = scmp.lt.s32.totalorder %s4210_s17, %s4210_s17 }
  0x72   :  { %p4217_p12 = por %p4216_p11, %p4215_p10 }
  0x74   :  { %p4218_p13 = pnand %p4217_p12, %p4211_p9 }
  0x76   :  { %4221 = shalt.err (!%p4218_p13)
}
  0x77   :  { %s4399_s12 = smov 64   ;;  %s4400_s25 = smov 4  }
  0x78   :  { %41 = dma.hbm_to_vmem [thread:$0]  %s4919_s1, 1024, %s36_s26, [#allocation3], %s4399_s12, %s4399_s12, %s4400_s25  }
  0x79   :  { %s4401_s6 = smov [#allocation6]   ;;  %s4222_s4 = scalar_lea.hbm %s4921_s3, 2048 }
  0x7a   :  { %s57_s29 = sshll.u32 %s4401_s6, 4  ;;  %p4223_p0 = scmp.ne.s32.totalorder %s4921_s3, %s4222_s4  ;;  %s58_s29 = int_to_ptr.vmem [resolvable:$true] %s57_s29 }
  0x7b   :  { %p4226_p1 = scmp.lt.u32.totalorder %s4222_s4, %s4921_s3 }
  0x7d   :  { %p4228_p2 = pnand %p4226_p1, %p4223_p0 }
  0x7f   :  { %4231 = shalt.err (!%p4228_p2)
}
  0x80   :  { %s4232_s2 = scalar_lea.vmem %s58_s29, 2048  ;;  %p4237_p4 = scmp.lt.s32.totalorder %s58_s29, %s58_s29 }
  0x81   :  { %p4233_p3 = scmp.ne.s32.totalorder %s58_s29, %s4232_s2  ;;  %p4238_p5 = scmp.lt.s32.totalorder %s4232_s2, %s4232_s2 }
  0x83   :  { %p4239_p6 = por %p4238_p5, %p4237_p4 }
  0x85   :  { %p4240_p7 = pnand %p4239_p6, %p4233_p3 }
  0x87   :  { %4243 = shalt.err (!%p4240_p7)
}
  0x88   :  { %s4402_s1 = smov 128   ;;  %s4403_s26 = smov 8  }
  0x89   :  { %63 = dma.hbm_to_vmem [thread:$0]  %s4921_s3, 2048, %s58_s29, [#allocation5], %s4402_s1, %s4402_s1, %s4403_s26  }
  0x8a   :  { %s4404_s8 = smov [#allocation9]   ;;  %s4405_s30 = smov [#allocation12]  }
  0x8b   :  { %s80_s16 = sshll.u32 %s4404_s8, 4  ;;  %s99_s17 = sshll.u32 %s4405_s30, 4  ;;  %s81_s16 = int_to_ptr.vmem [resolvable:$true] %s80_s16  ;;  %s4594_s17 = int_to_ptr.vmem [resolvable:$true] %s99_s17 }
  0x8c   :  { %s4244_s18 = scalar_lea.hbm %s4923_s5, 32 }
  0x8d   :  { %p4245_p8 = scmp.ne.s32.totalorder %s4923_s5, %s4244_s18  ;;  %p4248_p9 = scmp.lt.u32.totalorder %s4244_s18, %s4923_s5 }
  0x8f   :  { %p4250_p10 = pnand %p4248_p9, %p4245_p8 }
  0x91   :  { %4253 = shalt.err (!%p4250_p10)
}
  0x92   :  { %s4254_s3 = scalar_lea.vmem %s81_s16, 32  ;;  %p4259_p12 = scmp.lt.s32.totalorder %s81_s16, %s81_s16 }
  0x93   :  { %p4255_p11 = scmp.ne.s32.totalorder %s81_s16, %s4254_s3  ;;  %p4260_p13 = scmp.lt.s32.totalorder %s4254_s3, %s4254_s3 }
  0x95   :  { %p4261_p0 = por %p4260_p13, %p4259_p12 }
  0x97   :  { %p4262_p1 = pnand %p4261_p0, %p4255_p11 }
  0x99   :  { %4265 = shalt.err (!%p4262_p1)
}
  0x9a   :  { %83 = dma.hbm_to_vmem [thread:$0]  %s4923_s5, 32, %s81_s16, [#allocation8]  }
  0x9b   :  { %s4266_s21 = scalar_lea.hbm %s4925_s7, 8192 }
  0x9c   :  { %p4267_p2 = scmp.ne.s32.totalorder %s4925_s7, %s4266_s21  ;;  %p4270_p3 = scmp.lt.u32.totalorder %s4266_s21, %s4925_s7 }
  0x9e   :  { %p4272_p4 = pnand %p4270_p3, %p4267_p2 }
  0xa0   :  { %4275 = shalt.err (!%p4272_p4)
}
  0xa1   :  { %s4276_s19 = scalar_lea.vmem %s4594_s17, 8192  ;;  %p4281_p6 = scmp.lt.s32.totalorder %s4594_s17, %s4594_s17 }
  0xa2   :  { %p4277_p5 = scmp.ne.s32.totalorder %s4594_s17, %s4276_s19  ;;  %p4282_p7 = scmp.lt.s32.totalorder %s4276_s19, %s4276_s19 }
  0xa4   :  { %p4283_p8 = por %p4282_p7, %p4281_p6 }
  0xa6   :  { %p4284_p9 = pnand %p4283_p8, %p4277_p5 }
  0xa8   :  { %4287 = shalt.err (!%p4284_p9)
}
  0xa9   :  { %s4406_s5 = smov 256   ;;  %s4407_s28 = smov 16  }
  0xaa   :  { %105 = dma.hbm_to_vmem [thread:$0]  %s4925_s7, 8192, %s4594_s17, [#allocation11], %s4406_s5, %s4406_s5, %s4407_s28  }
  0xab   :  { %s4408_s30 = smov [#allocation15]   ;;  %s4409_s25 = smov [#allocation18]  }
  0xac   :  { %s122_s12 = sshll.u32 %s4408_s30, 4  ;;  %s141_s18 = sshll.u32 %s4409_s25, 4  ;;  %s123_s12 = int_to_ptr.vmem [resolvable:$true] %s122_s12  ;;  %s4625_s18 = int_to_ptr.vmem [resolvable:$true] %s141_s18 }
  0xad   :  { %s4288_s22 = scalar_lea.hbm %s4927_s9, 64 }
  0xae   :  { %p4289_p10 = scmp.ne.s32.totalorder %s4927_s9, %s4288_s22  ;;  %p4292_p11 = scmp.lt.u32.totalorder %s4288_s22, %s4927_s9 }
  0xb0   :  { %p4294_p12 = pnand %p4292_p11, %p4289_p10 }
  0xb2   :  { %4297 = shalt.err (!%p4294_p12)
}
  0xb3   :  { %s4298_s7 = scalar_lea.vmem %s123_s12, 64  ;;  %p4303_p0 = scmp.lt.s32.totalorder %s123_s12, %s123_s12 }
  0xb4   :  { %p4299_p13 = scmp.ne.s32.totalorder %s123_s12, %s4298_s7  ;;  %p4304_p1 = scmp.lt.s32.totalorder %s4298_s7, %s4298_s7 }
  0xb6   :  { %p4305_p2 = por %p4304_p1, %p4303_p0 }
  0xb8   :  { %p4306_p3 = pnand %p4305_p2, %p4299_p13 }
  0xba   :  { %4309 = shalt.err (!%p4306_p3)
}
  0xbb   :  { %125 = dma.hbm_to_vmem [thread:$0]  %s4927_s9, 64, %s123_s12, [#allocation14]  }
  0xbc   :  { %s4310_s27 = scalar_lea.hbm %s4929_s11, 32768 }
  0xbd   :  { %p4311_p4 = scmp.ne.s32.totalorder %s4929_s11, %s4310_s27  ;;  %p4314_p5 = scmp.lt.u32.totalorder %s4310_s27, %s4929_s11 }
  0xbf   :  { %p4316_p6 = pnand %p4314_p5, %p4311_p4 }
  0xc1   :  { %4319 = shalt.err (!%p4316_p6)
}
  0xc2   :  { %s4320_s5 = scalar_lea.vmem %s4625_s18, 32768  ;;  %p4325_p8 = scmp.lt.s32.totalorder %s4625_s18, %s4625_s18 }
  0xc3   :  { %p4321_p7 = scmp.ne.s32.totalorder %s4625_s18, %s4320_s5  ;;  %p4326_p9 = scmp.lt.s32.totalorder %s4320_s5, %s4320_s5 }
  0xc5   :  { %p4327_p10 = por %p4326_p9, %p4325_p8 }
  0xc7   :  { %p4328_p11 = pnand %p4327_p10, %p4321_p7 }
  0xc9   :  { %4331 = shalt.err (!%p4328_p11)
}
  0xca   :  { %s4410_s9 = smov 512   ;;  %s4411_s28 = smov 32  }
  0xcb   :  { %147 = dma.hbm_to_vmem [thread:$0]  %s4929_s11, 32768, %s4625_s18, [#allocation17], %s4410_s9, %s4410_s9, %s4411_s28  }
  0xcc   :  { %s4412_s30 = smov [#allocation21]   ;;  %s4413_s25 = smov [#allocation22]  }
  0xcd   :  { %s164_s12 = sshll.u32 %s4412_s30, 4  ;;  %s174_s20 = sshll.u32 %s4413_s25, 4  ;;  %s165_s12 = int_to_ptr.vmem [resolvable:$true] %s164_s12  ;;  %s175_s20 = int_to_ptr.vmem [resolvable:$true] %s174_s20 }
  0xce   :  { %s4332_s24 = scalar_lea.hbm %s4931_s13, 128 }
  0xcf   :  { %p4333_p12 = scmp.ne.s32.totalorder %s4931_s13, %s4332_s24  ;;  %p4336_p13 = scmp.lt.u32.totalorder %s4332_s24, %s4931_s13 }
  0xd1   :  { %p4338_p0 = pnand %p4336_p13, %p4333_p12 }
  0xd3   :  { %4341 = shalt.err (!%p4338_p0)
}
  0xd4   :  { %s4342_s11 = scalar_lea.vmem %s165_s12, 128  ;;  %p4347_p2 = scmp.lt.s32.totalorder %s165_s12, %s165_s12 }
  0xd5   :  { %p4343_p1 = scmp.ne.s32.totalorder %s165_s12, %s4342_s11  ;;  %p4348_p3 = scmp.lt.s32.totalorder %s4342_s11, %s4342_s11 }
  0xd7   :  { %p4349_p4 = por %p4348_p3, %p4347_p2 }
  0xd9   :  { %p4350_p5 = pnand %p4349_p4, %p4343_p1 }
  0xdb   :  { %4353 = shalt.err (!%p4350_p5)
}
  0xdc   :  { %167 = dma.hbm_to_vmem [thread:$0]  %s4931_s13, 128, %s165_s12, [#allocation20]  }
  0xdd   :  { %s4354_s21 = scalar_lea.hbm %s4932_s14, 128 }
  0xde   :  { %p4355_p6 = scmp.ne.s32.totalorder %s4932_s14, %s4354_s21  ;;  %p4358_p7 = scmp.lt.u32.totalorder %s4354_s21, %s4932_s14 }
  0xe0   :  { %p4360_p8 = pnand %p4358_p7, %p4355_p6 }
  0xe2   :  { %4363 = shalt.err (!%p4360_p8)
}
  0xe3   :  { %s4364_s19 = scalar_lea.vmem %s175_s20, 128  ;;  %p4369_p10 = scmp.lt.s32.totalorder %s175_s20, %s175_s20 }
  0xe4   :  { %p4365_p9 = scmp.ne.s32.totalorder %s175_s20, %s4364_s19  ;;  %p4370_p11 = scmp.lt.s32.totalorder %s4364_s19, %s4364_s19 }
  0xe6   :  { %p4371_p12 = por %p4370_p11, %p4369_p10 }
  0xe8   :  { %p4372_p13 = pnand %p4371_p12, %p4365_p9 }
  0xea   :  { %4375 = shalt.err (!%p4372_p13)
}
  0xeb   :  { %177 = dma.hbm_to_vmem [thread:$0]  %s4932_s14, 128, %s175_s20, [#allocation23]  }
  0xec   :  { %4376 = dma.done.wait [#allocation3], 1024  }
  0xed   :  { %4377 = vsyncadd [#allocation3], 4294966272 }
  0xee   :  { %4378 = dma.done.wait [#allocation5], 2064  }
  0xef   :  { %4379 = vsyncadd [#allocation5], 4294965232 }
  0xf0   :  { %4380 = dma.done.wait [#allocation8], 64  }
  0xf1   :  { %4381 = vsyncadd [#allocation8], 4294967232 }
  0xf2   :  { %4382 = dma.done.wait [#allocation11], 8224  }
  0xf3   :  { %4383 = vsyncadd [#allocation11], 4294959072 }
  0xf4   :  { %4384 = dma.done.wait [#allocation14], 128  }
  0xf5   :  { %4385 = vsyncadd [#allocation14], 4294967168 }
  0xf6   :  { %4386 = dma.done.wait [#allocation17], 32832  }
  0xf7   :  { %4387 = vsyncadd [#allocation17], 4294934464 }
  0xf8   :  { %4388 = dma.done.wait [#allocation20], 256  }
  0xf9   :  { %4389 = vsyncadd [#allocation20], 4294967040 }
  0xfa   :  { %4390 = dma.done.wait [#allocation23], 128  }
  0xfb   :  { %4391 = vsyncadd [#allocation23], 4294967168  ;;  %v4414_v0 = vmov 0.0   ;;  %vm4415_vm0 = vmmov 0   ;;  %v3912_v1 = vld [vmem:[#allocation2] sm:$0xff]   ;;  %v3913_v2 = vld [vmem:[#allocation2 + $0x8] sm:$0xff]  }
  0xfc   :  { %3842 = vmatprep.subr.bf16.mxu0 %v4414_v0  ;;  %3858 = vmatprep.mubr.msk.bf16.mxu0 %vm4415_vm0, %v4414_v0  ;;  %v3914_v3 = vld [vmem:[#allocation2 + $0x10] sm:$0xff]   ;;  %v3922_v5 = vld [vmem:[#allocation6] ss:$8 sps:$4 sm:$0xff]   ;;  %v3915_v6 = vld [vmem:[#allocation2 + $0x18] sm:$0xff]   ;;  %v4416_v27 = vmov 0   ;;  %vm487_vm2 = vcmask 1041408  }
  0xfd   :  { %3843 = vmatpush3.bf16.msra.mxu0 %v3912_v1  ;;  %v3920_v4 = vld [vmem:[#allocation6 + $0x4] ss:$8 sps:$4 sm:$0xff]   ;;  %v3923_v7 = vld [vmem:[#allocation6 + $0x14] ss:$8 sps:$4 sm:$0xff]   ;;  %v3925_v8 = vld [vmem:[#allocation6 + $0x10] ss:$8 sps:$4 sm:$0xff]   ;;  %478 = vmatprep.mubr.bf16.mxu1 %v4416_v27 }
  0xfe   :  { %3844 = vmatprep.subr.bf16.mxu0 %v4414_v0  ;;  %446 = vmatprep.subr.bf16.mxu1 %v3920_v4  ;;  %v3926_v9 = vld [vmem:[#allocation6 + $0x24] ss:$8 sps:$4 sm:$0xff]   ;;  %v3928_v12 = vld [vmem:[#allocation6 + $0x20] ss:$8 sps:$4 sm:$0xff]   ;;  %v3929_v13 = vld [vmem:[#allocation6 + $0x34] ss:$8 sps:$4 sm:$0xff]  }
  0xff   :  { %447 = vmatpush1.bf16.msra.mxu1 %v3922_v5  ;;  %v3916_v10 = vld [vmem:[#allocation2 + $0x20] sm:$0xff]   ;;  %v3917_v11 = vld [vmem:[#allocation2 + $0x28] sm:$0xff]   ;;  %v3931_v14 = vld [vmem:[#allocation6 + $0x30] ss:$8 sps:$4 sm:$0xff]  }
 0x100   :  { %448 = vmatprep.subr.bf16.mxu1 %v3923_v7  ;;  %v3932_v15 = vld [vmem:[#allocation6 + $0x44] ss:$8 sps:$4 sm:$0xff]   ;;  %v3934_v17 = vld [vmem:[#allocation6 + $0x40] ss:$8 sps:$4 sm:$0xff]   ;;  %v3935_v18 = vld [vmem:[#allocation6 + $0x54] ss:$8 sps:$4 sm:$0xff]  }
 0x101   :  { %3845 = vmatpush3.bf16.msra.mxu0 %v3913_v2  ;;  %v3918_v16 = vld [vmem:[#allocation2 + $0x30] sm:$0xff]   ;;  %v3919_v19 = vld [vmem:[#allocation2 + $0x38] sm:$0xff]   ;;  %v221_v20 = vld [vmem:[%s4918_s0] sm:$0x3] }
 0x102   :  { %3846 = vmatprep.subr.bf16.mxu0 %v4414_v0  ;;  %v3937_v21 = vld [vmem:[#allocation6 + $0x50] ss:$8 sps:$4 sm:$0xff]   ;;  %v222_v22 = vpack.c.bf16 %v221_v20, %v221_v20  ;;  %v3938_v23 = vld [vmem:[#allocation6 + $0x64] ss:$8 sps:$4 sm:$0xff]   ;;  %v3940_v24 = vld [vmem:[#allocation6 + $0x60] ss:$8 sps:$4 sm:$0xff]  }
 0x103   :  { %449 = vmatpush1.bf16.msra.mxu1 %v3925_v8  ;;  %v3941_v25 = vld [vmem:[#allocation6 + $0x74] ss:$8 sps:$4 sm:$0xff]   ;;  %v3943_v26 = vld [vmem:[#allocation6 + $0x70] ss:$8 sps:$4 sm:$0xff]  }
 0x104   :  { %450 = vmatprep.subr.bf16.mxu1 %v3926_v9  ;;  %v3944_v28 = vld [vmem:[#allocation12] ss:$16 sps:$4 sm:$0xff]   ;;  %v3946_v29 = vld [vmem:[#allocation12 + $0x4] ss:$16 sps:$4 sm:$0xff]   ;;  %v3949_v30 = vld [vmem:[#allocation12 + $0xc] ss:$16 sps:$4 sm:$0xff]  }
 0x105   :  { %3847 = vmatpush3.bf16.msra.mxu0 %v3914_v3  ;;  %v3484_v31 = vld [vmem:[#allocation4] ss:$0 sm:$0xff]  ;;  %v3952_v41 = vld [vmem:[#allocation12 + $0x24] ss:$16 sps:$4 sm:$0xff]   ;;  %v3955_v42 = vld [vmem:[#allocation12 + $0x2c] ss:$16 sps:$4 sm:$0xff]  }
 0x106   :  { %3848 = vmatprep.subr.bf16.mxu0 %v4414_v0  ;;  %v3947_v39 = vld [vmem:[#allocation12 + $0x8] ss:$16 sps:$4 sm:$0xff]   ;;  %v3950_v43 = vld [vmem:[#allocation12 + $0x20] ss:$16 sps:$4 sm:$0xff]   ;;  %v3958_v45 = vld [vmem:[#allocation12 + $0x44] ss:$16 sps:$4 sm:$0xff]  }
 0x107   :  { %451 = vmatpush1.bf16.msra.mxu1 %v3928_v12  ;;  %v3953_v44 = vld [vmem:[#allocation12 + $0x28] ss:$16 sps:$4 sm:$0xff]   ;;  %v3961_v46 = vld [vmem:[#allocation12 + $0x4c] ss:$16 sps:$4 sm:$0xff]   ;;  %v3956_v47 = vld [vmem:[#allocation12 + $0x40] ss:$16 sps:$4 sm:$0xff]  }
 0x108   :  { %452 = vmatprep.subr.bf16.mxu1 %v3929_v13  ;;  %v3959_v48 = vld [vmem:[#allocation12 + $0x48] ss:$16 sps:$4 sm:$0xff]   ;;  %v3964_v49 = vld [vmem:[#allocation12 + $0x64] ss:$16 sps:$4 sm:$0xff]   ;;  %v3967_v50 = vld [vmem:[#allocation12 + $0x6c] ss:$16 sps:$4 sm:$0xff]  }
 0x109   :  { %3849 = vmatpush3.bf16.msra.mxu0 %v3915_v6  ;;  %v3962_v51 = vld [vmem:[#allocation12 + $0x60] ss:$16 sps:$4 sm:$0xff]   ;;  %v3965_v52 = vld [vmem:[#allocation12 + $0x68] ss:$16 sps:$4 sm:$0xff]   ;;  %v3970_v53 = vld [vmem:[#allocation12 + $0x84] ss:$16 sps:$4 sm:$0xff]  }
 0x10a   :  { %3850 = vmatprep.subr.bf16.mxu0 %v4414_v0  ;;  %v3973_v54 = vld [vmem:[#allocation12 + $0x8c] ss:$16 sps:$4 sm:$0xff]   ;;  %v3968_v55 = vld [vmem:[#allocation12 + $0x80] ss:$16 sps:$4 sm:$0xff]   ;;  %v3971_v56 = vld [vmem:[#allocation12 + $0x88] ss:$16 sps:$4 sm:$0xff]  }
 0x10b   :  { %453 = vmatpush1.bf16.msra.mxu1 %v3931_v14  ;;  %v3976_v57 = vld [vmem:[#allocation12 + $0xa4] ss:$16 sps:$4 sm:$0xff]   ;;  %v3979_v58 = vld [vmem:[#allocation12 + $0xac] ss:$16 sps:$4 sm:$0xff]   ;;  %v3974_v59 = vld [vmem:[#allocation12 + $0xa0] ss:$16 sps:$4 sm:$0xff]  }
 0x10c   :  { %454 = vmatprep.subr.bf16.mxu1 %v3932_v15  ;;  %v3977_v60 = vld [vmem:[#allocation12 + $0xa8] ss:$16 sps:$4 sm:$0xff]   ;;  %v3982_v61 = vld [vmem:[#allocation12 + $0xc4] ss:$16 sps:$4 sm:$0xff]   ;;  %v3985_v62 = vld [vmem:[#allocation12 + $0xcc] ss:$16 sps:$4 sm:$0xff]  }
 0x10d   :  { %3851 = vmatpush3.bf16.msra.mxu0 %v3916_v10  ;;  %v3980_v63 = vld [vmem:[#allocation12 + $0xc0] ss:$16 sps:$4 sm:$0xff]   ;;  %v3988_v1 = vld [vmem:[#allocation12 + $0xe4] ss:$16 sps:$4 sm:$0xff]   ;;  %v3991_v2 = vld [vmem:[#allocation12 + $0xec] ss:$16 sps:$4 sm:$0xff]  }
 0x10e   :  { %3852 = vmatprep.subr.bf16.mxu0 %v4414_v0  ;;  %v3986_v3 = vld [vmem:[#allocation12 + $0xe0] ss:$16 sps:$4 sm:$0xff]   ;;  %v3989_v4 = vld [vmem:[#allocation12 + $0xe8] ss:$16 sps:$4 sm:$0xff]   ;;  %v3994_v5 = vld [vmem:[#allocation12 + $0x104] ss:$16 sps:$4 sm:$0xff]  }
 0x10f   :  { %455 = vmatpush1.bf16.msra.mxu1 %v3934_v17  ;;  %v3997_v6 = vld [vmem:[#allocation12 + $0x10c] ss:$16 sps:$4 sm:$0xff]   ;;  %v3992_v7 = vld [vmem:[#allocation12 + $0x100] ss:$16 sps:$4 sm:$0xff]   ;;  %v3995_v8 = vld [vmem:[#allocation12 + $0x108] ss:$16 sps:$4 sm:$0xff]  }
 0x110   :  { %456 = vmatprep.subr.bf16.mxu1 %v3935_v18  ;;  %v4000_v9 = vld [vmem:[#allocation12 + $0x124] ss:$16 sps:$4 sm:$0xff]   ;;  %v4003_v10 = vld [vmem:[#allocation12 + $0x12c] ss:$16 sps:$4 sm:$0xff]   ;;  %v4001_v12 = vld [vmem:[#allocation12 + $0x128] ss:$16 sps:$4 sm:$0xff]  }
 0x111   :  { %3853 = vmatpush3.bf16.msra.mxu0 %v3917_v11  ;;  %v3998_v11 = vld [vmem:[#allocation12 + $0x120] ss:$16 sps:$4 sm:$0xff]   ;;  %v4006_v13 = vld [vmem:[#allocation12 + $0x144] ss:$16 sps:$4 sm:$0xff]   ;;  %v4009_v14 = vld [vmem:[#allocation12 + $0x14c] ss:$16 sps:$4 sm:$0xff]  }
 0x112   :  { %3854 = vmatprep.subr.bf16.mxu0 %v4414_v0  ;;  %v4004_v15 = vld [vmem:[#allocation12 + $0x140] ss:$16 sps:$4 sm:$0xff]   ;;  %v4012_v17 = vld [vmem:[#allocation12 + $0x164] ss:$16 sps:$4 sm:$0xff]   ;;  %v4015_v18 = vld [vmem:[#allocation12 + $0x16c] ss:$16 sps:$4 sm:$0xff]  }
 0x113   :  { %457 = vmatpush1.bf16.msra.mxu1 %v3937_v21  ;;  %v4013_v20 = vld [vmem:[#allocation12 + $0x168] ss:$16 sps:$4 sm:$0xff]   ;;  %v4018_v21 = vld [vmem:[#allocation12 + $0x184] ss:$16 sps:$4 sm:$0xff]   ;;  %v4022_v27 = vld [vmem:[#allocation12 + $0x1a0] ss:$16 sps:$4 sm:$0xff]  }
 0x114   :  { %458 = vmatprep.subr.bf16.mxu1 %v3938_v23  ;;  %v4016_v23 = vld [vmem:[#allocation12 + $0x180] ss:$16 sps:$4 sm:$0xff]  }
 0x115   :  { %3855 = vmatpush3.bf16.msra.mxu0 %v3918_v16  ;;  %v4007_v16 = vld [vmem:[#allocation12 + $0x148] ss:$16 sps:$4 sm:$0xff]  }
 0x116   :  { %3856 = vmatprep.subr.bf16.mxu0 %v4414_v0  ;;  %v3983_v0 = vld [vmem:[#allocation12 + $0xc8] ss:$16 sps:$4 sm:$0xff]  }
 0x117   :  { %459 = vmatpush1.bf16.msra.mxu1 %v3940_v24  ;;  %v4019_v24 = vld [vmem:[#allocation12 + $0x188] ss:$16 sps:$4 sm:$0xff]  }
 0x118   :  { %460 = vmatprep.subr.bf16.mxu1 %v3941_v25  ;;  %v4024_v25 = vld [vmem:[#allocation12 + $0x1a4] ss:$16 sps:$4 sm:$0xff]  }
 0x119   :  { %3857 = vmatpush3.bf16.msra.mxu0 %v3919_v19  ;;  %v4010_v19 = vld [vmem:[#allocation12 + $0x160] ss:$16 sps:$4 sm:$0xff]  }
 0x11a   :  { %973 = vmatprep.subr.bf16.mxu0 %v3946_v29  ;;  %v4030_v29 = vld [vmem:[#allocation12 + $0x1c4] ss:$16 sps:$4 sm:$0xff]  }
 0x11b   :  { %461 = vmatpush1.bf16.msra.mxu1 %v3943_v26  ;;  %v4027_v26 = vld [vmem:[#allocation12 + $0x1ac] ss:$16 sps:$4 sm:$0xff]  }
 0x11c   :  { %3859 = vmatmul.mubr.bf16.vlgmr.msra.gmra.mrb[0].mxu0 %v222_v22  ;;  %1014 = vmatprep.subr.bf16.mxu1 %v3949_v30  ;;  %v4021_v22 = vld [vmem:[#allocation12 + $0x18c] ss:$16 sps:$4 sm:$0xff]  }
 0x11d   :  { %974 = vmatpush1.bf16.msra.mxu0 %v3944_v28  ;;  %v4025_v28 = vld [vmem:[#allocation12 + $0x1a8] ss:$16 sps:$4 sm:$0xff]   ;;  %v4033_v30 = vld [vmem:[#allocation12 + $0x1cc] ss:$16 sps:$4 sm:$0xff]  }
 0x11e   :  { %975 = vmatprep.subr.bf16.mxu0 %v3952_v41 }
 0x121   :  { %976 = vmatpush1.bf16.msra.mxu0 %v3950_v43 }
 0x122   :  { %977 = vmatprep.subr.bf16.mxu0 %v3958_v45  ;;  %v356_v45 = vlaneseq }
 0x125   :  { %978 = vmatpush1.bf16.msra.mxu0 %v3956_v47 }
 0x126   :  { %979 = vmatprep.subr.bf16.mxu0 %v3964_v49 }
 0x129   :  { %980 = vmatpush1.bf16.msra.mxu0 %v3962_v51 }
 0x12a   :  { %981 = vmatprep.subr.bf16.mxu0 %v3970_v53 }
 0x12d   :  { %982 = vmatpush1.bf16.msra.mxu0 %v3968_v55 }
 0x12e   :  { %983 = vmatprep.subr.bf16.mxu0 %v3976_v57 }
 0x131   :  { %984 = vmatpush1.bf16.msra.mxu0 %v3974_v59 }
 0x132   :  { %985 = vmatprep.subr.bf16.mxu0 %v3982_v61 }
 0x135   :  { %986 = vmatpush1.bf16.msra.mxu0 %v3980_v63 }
 0x136   :  { %987 = vmatprep.subr.bf16.mxu0 %v3988_v1 }
 0x139   :  { %988 = vmatpush1.bf16.msra.mxu0 %v3986_v3 }
 0x13a   :  { %989 = vmatprep.subr.bf16.mxu0 %v3994_v5 }
 0x13d   :  { %990 = vmatpush1.bf16.msra.mxu0 %v3992_v7 }
 0x13e   :  { %991 = vmatprep.subr.bf16.mxu0 %v4000_v9 }
 0x141   :  { %992 = vmatpush1.bf16.msra.mxu0 %v3998_v11 }
 0x142   :  { %993 = vmatprep.subr.bf16.mxu0 %v4006_v13 }
 0x145   :  { %994 = vmatpush1.bf16.msra.mxu0 %v4004_v15 }
 0x146   :  { %995 = vmatprep.subr.bf16.mxu0 %v4012_v17 }
 0x149   :  { %996 = vmatpush1.bf16.msra.mxu0 %v4010_v19 }
 0x14a   :  { %997 = vmatprep.subr.bf16.mxu0 %v4018_v21 }
 0x14d   :  { %998 = vmatpush1.bf16.msra.mxu0 %v4016_v23 }
 0x14e   :  { %999 = vmatprep.subr.bf16.mxu0 %v4024_v25 }
 0x151   :  { %1000 = vmatpush1.bf16.msra.mxu0 %v4022_v27 }
 0x152   :  { %1001 = vmatprep.subr.bf16.mxu0 %v4030_v29 }
 0x1ef   :  { %v328_v32 = vpop.f32.mrb[0].mxu0 }
 0x1f0   :  { %v329_v33 = vadd.f32 %v3484_v31, %v328_v32  ;;  %v3860_v34 = vpop.f32.mrb[1].mxu0  ;;  %v4028_v31 = vld [vmem:[#allocation12 + $0x1c0] ss:$16 sps:$4 sm:$0xff]   ;;  %v4031_v32 = vld [vmem:[#allocation12 + $0x1c8] ss:$16 sps:$4 sm:$0xff]  }
 0x1f1   :  { %v331_v35 = vpop.f32.mrb[2].mxu0  ;;  %1002 = vmatpush1.bf16.msra.mxu0 %v4028_v31  ;;  %v4034_v34 = vld [vmem:[#allocation12 + $0x1e0] ss:$16 sps:$4 sm:$0xff]  }
 0x1f2   :  { %vm334_vm1 = vcmp.ge.f32.partialorder %v329_v33, 0.0  ;;  %v335_v36 = vmul.f32 0.2, %v329_v33  ;;  %v3861_v37 = vpop.f32.mrb[3].mxu0  ;;  %v4037_v35 = vld [vmem:[#allocation12 + $0x1e8] ss:$16 sps:$4 sm:$0xff]  }
 0x1f3   :  { %v4683_v37 = vld [vmem:[#allocation18] sm:$0xff] }
 0x1f4   :  { %v336_v38 = vsel %vm334_vm1, %v329_v33, %v335_v36  ;;  %v4036_v33 = vld [vmem:[#allocation12 + $0x1e4] ss:$16 sps:$4 sm:$0xff]   ;;  %v4039_v36 = vld [vmem:[#allocation12 + $0x1ec] ss:$16 sps:$4 sm:$0xff]  }
 0x1f5   :  { %v337_v40 = vpack.c.bf16 %v336_v38, %v336_v38  ;;  %1003 = vmatprep.subr.bf16.mxu0 %v4036_v33  ;;  %v4685_v38 = vld [vmem:[#allocation18 + $0x20] sm:$0xff]  ;;  %v545_v33 = vld [vmem:[#allocation10] sm:$0x3] }
 0x1f6   :  { %1004 = vmatpush1.bf16.msra.mxu0 %v4034_v34  ;;  %v3574_v41 = vcombine.high %v4683_v37, %v4685_v38 }
 0x1f7   :  { %479 = vmatmul.mubr.bf16.vlgmr.msra.gmra.mrb[0].mxu1 %v337_v40  ;;  %v3573_v40 = vcombine.low %v4683_v37, %v4685_v38  ;;  %v1228_v38 = vld [vmem:[#allocation18 + $0xa8] sm:$0xff] }
 0x1f8   :  { %1015 = vmatpush1.bf16.msra.mxu1 %v3947_v39  ;;  %v4687_v39 = vld [vmem:[#allocation18 + $0x8] sm:$0xff]  ;;  %2785 = vmatprep.subr.bf16.mxu0 %v3574_v41 }
 0x1f9   :  { %1016 = vmatprep.subr.bf16.mxu1 %v3955_v42  ;;  %v4693_v42 = vld [vmem:[#allocation18 + $0x28] sm:$0xff] }
 0x1fa   :  { %v3575_v43 = vcombine.low %v4687_v39, %v4693_v42 }
 0x1fc   :  { %1017 = vmatpush1.bf16.msra.mxu1 %v3953_v44  ;;  %v3576_v44 = vcombine.high %v4687_v39, %v4693_v42 }
 0x1fd   :  { %1018 = vmatprep.subr.bf16.mxu1 %v3961_v46  ;;  %v4699_v46 = vshrl.u32 %v356_v45, 7 }
 0x1ff   :  { %v4702_v47 = vsub.s32 0, %v4699_v46  ;;  %v4705_v49 = vsub.s32 1, %v4699_v46 }
 0x200   :  { %1019 = vmatpush1.bf16.msra.mxu1 %v3959_v48  ;;  %v354_v48 = vld [vmem:[#allocation7] sm:$0x3] }
 0x201   :  { %1020 = vmatprep.subr.bf16.mxu1 %v3967_v50  ;;  %v359_v50 = vrot.slane %v354_v48, %v4702_v47  ;;  %v363_v51 = vrot.slane %v354_v48, %v4705_v49  ;;  %v550_v45 = vrot.slane %v545_v33, %v4702_v47 }
 0x204   :  { %1021 = vmatpush1.bf16.msra.mxu1 %v3965_v52 }
 0x205   :  { %1022 = vmatprep.subr.bf16.mxu1 %v3973_v54 }
 0x208   :  { %1023 = vmatpush1.bf16.msra.mxu1 %v3971_v56 }
 0x209   :  { %1024 = vmatprep.subr.bf16.mxu1 %v3979_v58 }
 0x20c   :  { %1025 = vmatpush1.bf16.msra.mxu1 %v3977_v60 }
 0x20d   :  { %1026 = vmatprep.subr.bf16.mxu1 %v3985_v62 }
 0x210   :  { %1027 = vmatpush1.bf16.msra.mxu1 %v3983_v0 }
 0x211   :  { %1028 = vmatprep.subr.bf16.mxu1 %v3991_v2 }
 0x214   :  { %1029 = vmatpush1.bf16.msra.mxu1 %v3989_v4 }
 0x215   :  { %1030 = vmatprep.subr.bf16.mxu1 %v3997_v6 }
 0x218   :  { %1031 = vmatpush1.bf16.msra.mxu1 %v3995_v8 }
 0x219   :  { %1032 = vmatprep.subr.bf16.mxu1 %v4003_v10 }
 0x21c   :  { %1033 = vmatpush1.bf16.msra.mxu1 %v4001_v12 }
 0x21d   :  { %1034 = vmatprep.subr.bf16.mxu1 %v4009_v14 }
 0x220   :  { %1035 = vmatpush1.bf16.msra.mxu1 %v4007_v16 }
 0x221   :  { %1036 = vmatprep.subr.bf16.mxu1 %v4015_v18 }
 0x224   :  { %1037 = vmatpush1.bf16.msra.mxu1 %v4013_v20 }
 0x225   :  { %1038 = vmatprep.subr.bf16.mxu1 %v4021_v22 }
 0x228   :  { %1039 = vmatpush1.bf16.msra.mxu1 %v4019_v24 }
 0x229   :  { %1040 = vmatprep.subr.bf16.mxu1 %v4027_v26 }
 0x22c   :  { %1041 = vmatpush1.bf16.msra.mxu1 %v4025_v28 }
 0x22d   :  { %1042 = vmatprep.subr.bf16.mxu1 %v4033_v30 }
 0x230   :  { %1043 = vmatpush1.bf16.msra.mxu1 %v4031_v32  ;;  %v531_v32 = vld [vmem:[#allocation9] sm:$0x3] }
 0x231   :  { %1044 = vmatprep.subr.bf16.mxu1 %v4039_v36  ;;  %v536_v34 = vrot.slane %v531_v32, %v4702_v47  ;;  %v540_v36 = vrot.slane %v531_v32, %v4705_v49  ;;  %v1259_v32 = vld [vmem:[#allocation18 + $0x1a0] sm:$0xff] }
 0x234   :  { %1045 = vmatpush1.bf16.msra.mxu1 %v4037_v35 }
 0x235   :  { %2867 = vmatprep.subr.bf16.mxu1 %v3576_v44 }
 0x2ca   :  { %v480_v52 = vpop.f32.mrb[0].mxu1 }
 0x2cb   :  { %v481_v53 = vadd.f32 %v480_v52, %v359_v50  ;;  %v482_v54 = vpop.f32.mrb[1].mxu1  ;;  %v554_v50 = vrot.slane %v545_v33, %v4705_v49  ;;  %v1256_v33 = vld [vmem:[#allocation18 + $0x188] sm:$0xff] }
 0x2cc   :  { %v483_v55 = vadd.f32 %v482_v54, %v363_v51  ;;  %v484_v56 = vpop.f32.mrb[2].mxu1 }
 0x2cd   :  { %v488_v57 = vsel %vm487_vm2, %v481_v53, 0.0  ;;  %v485_v58 = vpop.f32.mrb[3].mxu1 }
 0x2ce   :  { %v489_v59 = vrot.slane %v488_v57, 4  ;;  %v495_v60 = vsel %vm487_vm2, %v483_v55, 0.0 }
 0x2cf   :  { %v496_v61 = vrot.slane %v495_v60, 4 }
 0x2d0   :  { %v490_v62 = vadd.f32 %v489_v59, %v488_v57 }
 0x2d1   :  { %v497_v63 = vadd.f32 %v496_v61, %v495_v60  ;;  %v1215_v61 = vld [vmem:[#allocation18 + $0x40] sm:$0xff] }
 0x2d2   :  { %v491_v0 = vrot.slane %v490_v62, 2 }
 0x2d3   :  { %v498_v1 = vrot.slane %v497_v63, 2 }
 0x2d4   :  { %v492_v2 = vadd.f32 %v491_v0, %v490_v62  ;;  %v1219_v62 = vld [vmem:[#allocation18 + $0x60] sm:$0xff] }
 0x2d5   :  { %v499_v3 = vadd.f32 %v498_v1, %v497_v63  ;;  %v1216_v63 = vld [vmem:[#allocation18 + $0x48] sm:$0xff]  ;;  %v3582_v0 = vcombine.high %v1215_v61, %v1219_v62 }
 0x2d6   :  { %v493_v4 = vrot.slane %v492_v2, 1  ;;  %v1220_v1 = vld [vmem:[#allocation18 + $0x68] sm:$0xff] }
 0x2d7   :  { %v500_v5 = vrot.slane %v499_v3, 1 }
 0x2d8   :  { %v494_v6 = vadd.f32 %v493_v4, %v492_v2  ;;  %v3581_v2 = vcombine.low %v1215_v61, %v1219_v62  ;;  %v3584_v4 = vcombine.high %v1216_v63, %v1220_v1 }
 0x2d9   :  { %v501_v7 = vadd.f32 %v500_v5, %v499_v3  ;;  %v3583_v3 = vcombine.low %v1216_v63, %v1220_v1  ;;  %v1223_v5 = vld [vmem:[#allocation18 + $0x80] sm:$0xff] }
 0x2da   :  { %v503_v8 = vmul.f32 0.5, %v494_v6  ;;  %v1227_v6 = vld [vmem:[#allocation18 + $0xa0] sm:$0xff] }
 0x2db   :  { %v504_v9 = vmul.f32 0.5, %v501_v7  ;;  %v1224_v7 = vld [vmem:[#allocation18 + $0x88] sm:$0xff]  ;;  %v3590_v37 = vcombine.high %v1223_v5, %v1227_v6  ;;  %v1283_v1 = vld [vmem:[#allocation18 + $0x260] sm:$0xff] }
 0x2dc   :  { %v505_v10 = vsub.f32 %v481_v53, %v503_v8  ;;  %v3591_v39 = vcombine.low %v1224_v7, %v1228_v38  ;;  %v3592_v42 = vcombine.high %v1224_v7, %v1228_v38  ;;  %v1235_v8 = vld [vmem:[#allocation18 + $0xe0] sm:$0xff] }
 0x2dd   :  { %v506_v11 = vsub.f32 %v483_v55, %v504_v9  ;;  %v1232_v9 = vld [vmem:[#allocation18 + $0xc8] sm:$0xff]  ;;  %v1291_v38 = vld [vmem:[#allocation18 + $0x2a0] sm:$0xff] }
 0x2de   :  { %v507_v12 = vmul.f32 %v505_v10, %v505_v10 }
 0x2df   :  { %v508_v13 = vmul.f32 %v506_v11, %v506_v11 }
 0x2e0   :  { %v509_v14 = vsel %vm487_vm2, %v507_v12, 0.0 }
 0x2e1   :  { %v510_v15 = vrot.slane %v509_v14, 4  ;;  %v516_v16 = vsel %vm487_vm2, %v508_v13, 0.0 }
 0x2e2   :  { %v517_v17 = vrot.slane %v516_v16, 4 }
 0x2e3   :  { %v511_v18 = vadd.f32 %v510_v15, %v509_v14  ;;  %v1239_v15 = vld [vmem:[#allocation18 + $0x100] sm:$0xff] }
 0x2e4   :  { %v518_v19 = vadd.f32 %v517_v17, %v516_v16  ;;  %v1243_v16 = vld [vmem:[#allocation18 + $0x120] sm:$0xff]  ;;  %v1240_v17 = vld [vmem:[#allocation18 + $0x108] sm:$0xff] }
 0x2e5   :  { %v512_v20 = vrot.slane %v511_v18, 2 }
 0x2e6   :  { %v519_v21 = vrot.slane %v518_v19, 2 }
 0x2e7   :  { %v513_v22 = vadd.f32 %v512_v20, %v511_v18  ;;  %v3606_v18 = vcombine.high %v1239_v15, %v1243_v16  ;;  %v3605_v20 = vcombine.low %v1239_v15, %v1243_v16 }
 0x2e8   :  { %v520_v23 = vadd.f32 %v519_v21, %v518_v19  ;;  %v1244_v19 = vld [vmem:[#allocation18 + $0x128] sm:$0xff] }
 0x2e9   :  { %v514_v24 = vrot.slane %v513_v22, 1  ;;  %v3607_v21 = vcombine.low %v1240_v17, %v1244_v19 }
 0x2ea   :  { %v521_v25 = vrot.slane %v520_v23, 1 }
 0x2eb   :  { %v515_v26 = vadd.f32 %v514_v24, %v513_v22  ;;  %v3608_v22 = vcombine.high %v1240_v17, %v1244_v19  ;;  %v1251_v24 = vld [vmem:[#allocation18 + $0x160] sm:$0xff] }
 0x2ec   :  { %v522_v27 = vadd.f32 %v521_v25, %v520_v23  ;;  %v1247_v23 = vld [vmem:[#allocation18 + $0x140] sm:$0xff]  ;;  %v1248_v25 = vld [vmem:[#allocation18 + $0x148] sm:$0xff] }
 0x2ed   :  { %v523_v28 = vmul.f32 0.5, %v515_v26  ;;  %v3614_v26 = vcombine.high %v1247_v23, %v1251_v24  ;;  %v1307_v19 = vld [vmem:[#allocation18 + $0x320] sm:$0xff] }
 0x2ee   :  { %v524_v29 = vmul.f32 0.5, %v522_v27  ;;  %v1252_v27 = vld [vmem:[#allocation18 + $0x168] sm:$0xff] }
 0x2ef   :  { %v525_v30 = vadd.f32 0.8, %v523_v28  ;;  %v3613_v28 = vcombine.low %v1247_v23, %v1251_v24 }
 0x2f0   :  { %v526_v31 = vadd.f32 0.8, %v524_v29  ;;  %v3615_v29 = vcombine.low %v1248_v25, %v1252_v27 }
 0x2f1   :  { %4040 = vrsqrt.f32 %v525_v30  ;;  %v3616_v30 = vcombine.high %v1248_v25, %v1252_v27  ;;  %v1315_v27 = vld [vmem:[#allocation18 + $0x360] sm:$0xff] }
 0x2f2   :  { %4042 = vrsqrt.f32 %v526_v31  ;;  %v1255_v31 = vld [vmem:[#allocation18 + $0x180] sm:$0xff] }
 0x2fb   :  { %v4041_v35 = vpop.eup %4040 }
 0x2fc   :  { %v4043_v41 = vpop.eup %4042  ;;  %v529_v44 = vmul.f32 %v4041_v35, %v505_v10  ;;  %v1260_v35 = vld [vmem:[#allocation18 + $0x1a8] sm:$0xff] }
 0x2fd   :  { %v530_v48 = vmul.f32 %v4043_v41, %v506_v11  ;;  %v1236_v11 = vld [vmem:[#allocation18 + $0xe8] sm:$0xff]  ;;  %v3623_v41 = vcombine.low %v1256_v33, %v1260_v35 }
 0x2fe   :  { %v543_v51 = vmul.f32 %v536_v34, %v529_v44  ;;  %v3599_v13 = vcombine.low %v1232_v9, %v1236_v11  ;;  %v3600_v14 = vcombine.high %v1232_v9, %v1236_v11  ;;  %v3622_v34 = vcombine.high %v1255_v31, %v1259_v32  ;;  %v1299_v11 = vld [vmem:[#allocation18 + $0x2e0] sm:$0xff] }
 0x2ff   :  { %v544_v52 = vmul.f32 %v540_v36, %v530_v48  ;;  %v3621_v36 = vcombine.low %v1255_v31, %v1259_v32  ;;  %v3624_v44 = vcombine.high %v1256_v33, %v1260_v35  ;;  %v1267_v48 = vld [vmem:[#allocation18 + $0x1e0] sm:$0xff] }
 0x300   :  { %v557_v53 = vadd.f32 %v550_v45, %v543_v51  ;;  %v1263_v45 = vld [vmem:[#allocation18 + $0x1c0] sm:$0xff] }
 0x301   :  { %v558_v54 = vadd.f32 %v554_v50, %v544_v52  ;;  %v1264_v50 = vld [vmem:[#allocation18 + $0x1c8] sm:$0xff]  ;;  %v3630_v51 = vcombine.high %v1263_v45, %v1267_v48  ;;  %v1323_v35 = vld [vmem:[#allocation18 + $0x3a0] sm:$0xff] }
 0x302   :  { %vm559_vm3 = vcmp.ge.f32.partialorder %v557_v53, 0.0  ;;  %v561_v55 = vmul.f32 0.2, %v557_v53  ;;  %v1268_v52 = vld [vmem:[#allocation18 + $0x1e8] sm:$0xff] }
 0x303   :  { %vm560_vm4 = vcmp.ge.f32.partialorder %v558_v54, 0.0  ;;  %v562_v56 = vmul.f32 0.2, %v558_v54 }
 0x304   :  { %v563_v57 = vsel %vm559_vm3, %v557_v53, %v561_v55  ;;  %v3629_v53 = vcombine.low %v1263_v45, %v1267_v48  ;;  %v3632_v55 = vcombine.high %v1264_v50, %v1268_v52 }
 0x305   :  { %v564_v58 = vsel %vm560_vm4, %v558_v54, %v562_v56  ;;  %v565_v60 = vpack.c.bf16 %v563_v57, %v563_v57  ;;  %v3631_v54 = vcombine.low %v1264_v50, %v1268_v52  ;;  %v1271_v56 = vld [vmem:[#allocation18 + $0x200] sm:$0xff] }
 0x306   :  { %v566_v59 = vpack.c.bf16 %v564_v58, %v564_v58  ;;  %v1275_v57 = vld [vmem:[#allocation18 + $0x220] sm:$0xff]  ;;  %v1272_v58 = vld [vmem:[#allocation18 + $0x208] sm:$0xff] }
 0x307   :  { %v3637_v61 = vcombine.low %v1271_v56, %v1275_v57  ;;  %v1331_v52 = vld [vmem:[#allocation18 + $0x3e0] sm:$0xff] }
 0x308   :  { %1005 = vmatprep.mubr.bf16.mxu0 %v566_v59  ;;  %1046 = vmatprep.mubr.bf16.mxu1 %v566_v59  ;;  %v3638_v59 = vcombine.high %v1271_v56, %v1275_v57  ;;  %v1332_v56 = vld [vmem:[#allocation18 + $0x3e8] sm:$0xff] }
 0x309   :  { %1006 = vmatmul.mubr.bf16.vlgmr.msra.gmra.mrb[4].mxu0 %v565_v60  ;;  %1047 = vmatmul.mubr.bf16.vlgmr.msra.gmra.mrb[4].mxu1 %v565_v60  ;;  %v1276_v60 = vld [vmem:[#allocation18 + $0x228] sm:$0xff] }
 0x30a   :  { %2786 = vmatpush1.bf16.msra.mxu0 %v3573_v40  ;;  %2868 = vmatpush1.bf16.msra.mxu1 %v3575_v43  ;;  %v3589_v40 = vcombine.low %v1223_v5, %v1227_v6  ;;  %v1231_v43 = vld [vmem:[#allocation18 + $0xc0] sm:$0xff]  ;;  %v3639_v62 = vcombine.low %v1272_v58, %v1276_v60  ;;  %v3640_v63 = vcombine.high %v1272_v58, %v1276_v60 }
 0x30b   :  { %2787 = vmatprep.subr.bf16.mxu0 %v3582_v0  ;;  %2869 = vmatprep.subr.bf16.mxu1 %v3584_v4  ;;  %v3598_v10 = vcombine.high %v1231_v43, %v1235_v8  ;;  %v3597_v12 = vcombine.low %v1231_v43, %v1235_v8  ;;  %v1279_v0 = vld [vmem:[#allocation18 + $0x240] sm:$0xff]  ;;  %v1284_v4 = vld [vmem:[#allocation18 + $0x268] sm:$0xff] }
 0x30c   :  { %v3645_v5 = vcombine.low %v1279_v0, %v1283_v1  ;;  %v4725_v60 = vld [vmem:[#allocation18 + $0x420] sm:$0xff] }
 0x30e   :  { %2788 = vmatpush1.bf16.msra.mxu0 %v3581_v2  ;;  %2870 = vmatpush1.bf16.msra.mxu1 %v3583_v3  ;;  %v1280_v2 = vld [vmem:[#allocation18 + $0x248] sm:$0xff]  ;;  %v3646_v3 = vcombine.high %v1279_v0, %v1283_v1 }
 0x30f   :  { %2789 = vmatprep.subr.bf16.mxu0 %v3590_v37  ;;  %2871 = vmatprep.subr.bf16.mxu1 %v3592_v42  ;;  %v3647_v6 = vcombine.low %v1280_v2, %v1284_v4  ;;  %v3648_v7 = vcombine.high %v1280_v2, %v1284_v4  ;;  %v1287_v37 = vld [vmem:[#allocation18 + $0x280] sm:$0xff]  ;;  %v1292_v42 = vld [vmem:[#allocation18 + $0x2a8] sm:$0xff]  ;;  %v631_v4 = vld [vmem:[#allocation13] sm:$0xf] }
 0x310   :  { %v3653_v43 = vcombine.low %v1287_v37, %v1291_v38 }
 0x312   :  { %2790 = vmatpush1.bf16.msra.mxu0 %v3589_v40  ;;  %2872 = vmatpush1.bf16.msra.mxu1 %v3591_v39  ;;  %v1288_v40 = vld [vmem:[#allocation18 + $0x288] sm:$0xff]  ;;  %v3654_v39 = vcombine.high %v1287_v37, %v1291_v38  ;;  %v640_v37 = vrot.slane %v631_v4, %v4705_v49 }
 0x313   :  { %2791 = vmatprep.subr.bf16.mxu0 %v3598_v10  ;;  %2873 = vmatprep.subr.bf16.mxu1 %v3600_v14  ;;  %v3655_v8 = vcombine.low %v1288_v40, %v1292_v42  ;;  %v3656_v9 = vcombine.high %v1288_v40, %v1292_v42  ;;  %v1295_v10 = vld [vmem:[#allocation18 + $0x2c0] sm:$0xff]  ;;  %v1300_v14 = vld [vmem:[#allocation18 + $0x2e8] sm:$0xff] }
 0x314   :  { %v3661_v15 = vcombine.low %v1295_v10, %v1299_v11 }
 0x316   :  { %2792 = vmatpush1.bf16.msra.mxu0 %v3597_v12  ;;  %2874 = vmatpush1.bf16.msra.mxu1 %v3599_v13  ;;  %v1296_v12 = vld [vmem:[#allocation18 + $0x2c8] sm:$0xff]  ;;  %v3662_v13 = vcombine.high %v1295_v10, %v1299_v11 }
 0x317   :  { %2793 = vmatprep.subr.bf16.mxu0 %v3606_v18  ;;  %2875 = vmatprep.subr.bf16.mxu1 %v3608_v22  ;;  %v3663_v16 = vcombine.low %v1296_v12, %v1300_v14  ;;  %v3664_v17 = vcombine.high %v1296_v12, %v1300_v14  ;;  %v1303_v18 = vld [vmem:[#allocation18 + $0x300] sm:$0xff]  ;;  %v1308_v22 = vld [vmem:[#allocation18 + $0x328] sm:$0xff] }
 0x318   :  { %v3669_v23 = vcombine.low %v1303_v18, %v1307_v19 }
 0x31a   :  { %2794 = vmatpush1.bf16.msra.mxu0 %v3605_v20  ;;  %2876 = vmatpush1.bf16.msra.mxu1 %v3607_v21  ;;  %v1304_v20 = vld [vmem:[#allocation18 + $0x308] sm:$0xff]  ;;  %v3670_v21 = vcombine.high %v1303_v18, %v1307_v19 }
 0x31b   :  { %2795 = vmatprep.subr.bf16.mxu0 %v3614_v26  ;;  %2877 = vmatprep.subr.bf16.mxu1 %v3616_v30  ;;  %v3671_v24 = vcombine.low %v1304_v20, %v1308_v22  ;;  %v3672_v25 = vcombine.high %v1304_v20, %v1308_v22  ;;  %v1311_v26 = vld [vmem:[#allocation18 + $0x340] sm:$0xff]  ;;  %v1316_v30 = vld [vmem:[#allocation18 + $0x368] sm:$0xff] }
 0x31c   :  { %v3677_v31 = vcombine.low %v1311_v26, %v1315_v27 }
 0x31e   :  { %2796 = vmatpush1.bf16.msra.mxu0 %v3613_v28  ;;  %2878 = vmatpush1.bf16.msra.mxu1 %v3615_v29  ;;  %v3678_v28 = vcombine.high %v1311_v26, %v1315_v27  ;;  %v1312_v29 = vld [vmem:[#allocation18 + $0x348] sm:$0xff] }
 0x31f   :  { %2797 = vmatprep.subr.bf16.mxu0 %v3622_v34  ;;  %2879 = vmatprep.subr.bf16.mxu1 %v3624_v44  ;;  %v3679_v32 = vcombine.low %v1312_v29, %v1316_v30  ;;  %v3680_v33 = vcombine.high %v1312_v29, %v1316_v30  ;;  %v1319_v34 = vld [vmem:[#allocation18 + $0x380] sm:$0xff]  ;;  %v1324_v44 = vld [vmem:[#allocation18 + $0x3a8] sm:$0xff] }
 0x320   :  { %v3685_v45 = vcombine.low %v1319_v34, %v1323_v35 }
 0x322   :  { %2798 = vmatpush1.bf16.msra.mxu0 %v3621_v36  ;;  %2880 = vmatpush1.bf16.msra.mxu1 %v3623_v41  ;;  %v1320_v36 = vld [vmem:[#allocation18 + $0x388] sm:$0xff]  ;;  %v3686_v41 = vcombine.high %v1319_v34, %v1323_v35 }
 0x323   :  { %2799 = vmatprep.subr.bf16.mxu0 %v3630_v51  ;;  %2881 = vmatprep.subr.bf16.mxu1 %v3632_v55  ;;  %v3687_v48 = vcombine.low %v1320_v36, %v1324_v44  ;;  %v3688_v50 = vcombine.high %v1320_v36, %v1324_v44  ;;  %v1327_v51 = vld [vmem:[#allocation18 + $0x3c0] sm:$0xff] }
 0x324   :  { %v3694_v55 = vcombine.high %v1327_v51, %v1331_v52 }
 0x326   :  { %2800 = vmatpush1.bf16.msra.mxu0 %v3629_v53  ;;  %2882 = vmatpush1.bf16.msra.mxu1 %v3631_v54  ;;  %v1328_v53 = vld [vmem:[#allocation18 + $0x3c8] sm:$0xff]  ;;  %v3693_v54 = vcombine.low %v1327_v51, %v1331_v52 }
 0x327   :  { %2801 = vmatprep.subr.bf16.mxu0 %v3638_v59  ;;  %2883 = vmatprep.subr.bf16.mxu1 %v3640_v63  ;;  %v3695_v57 = vcombine.low %v1328_v53, %v1332_v56  ;;  %v3696_v58 = vcombine.high %v1328_v53, %v1332_v56  ;;  %v4723_v59 = vld [vmem:[#allocation18 + $0x400] sm:$0xff]  ;;  %v4731_v63 = vld [vmem:[#allocation18 + $0x428] sm:$0xff] }
 0x328   :  { %v3701_v0 = vcombine.low %v4723_v59, %v4725_v60 }
 0x32a   :  { %2802 = vmatpush1.bf16.msra.mxu0 %v3637_v61  ;;  %2884 = vmatpush1.bf16.msra.mxu1 %v3639_v62  ;;  %v4727_v61 = vld [vmem:[#allocation18 + $0x408] sm:$0xff]  ;;  %v3702_v62 = vcombine.high %v4723_v59, %v4725_v60 }
 0x32b   :  { %2803 = vmatprep.subr.bf16.mxu0 %v3646_v3  ;;  %2885 = vmatprep.subr.bf16.mxu1 %v3648_v7  ;;  %v3703_v1 = vcombine.low %v4727_v61, %v4731_v63  ;;  %v3704_v2 = vcombine.high %v4727_v61, %v4731_v63  ;;  %v4740_v3 = vsub.s32 2, %v4699_v46 }
 0x32d   :  { %v644_v7 = vrot.slane %v631_v4, %v4740_v3 }
 0x32e   :  { %2804 = vmatpush1.bf16.msra.mxu0 %v3645_v5  ;;  %2886 = vmatpush1.bf16.msra.mxu1 %v3647_v6  ;;  %v4743_v5 = vsub.s32 3, %v4699_v46  ;;  %v636_v6 = vrot.slane %v631_v4, %v4702_v47 }
 0x32f   :  { %2805 = vmatprep.subr.bf16.mxu0 %v3654_v39  ;;  %2887 = vmatprep.subr.bf16.mxu1 %v3656_v9 }
 0x330   :  { %v648_v38 = vrot.slane %v631_v4, %v4743_v5 }
 0x332   :  { %2806 = vmatpush1.bf16.msra.mxu0 %v3653_v43  ;;  %2888 = vmatpush1.bf16.msra.mxu1 %v3655_v8 }
 0x333   :  { %2807 = vmatprep.subr.bf16.mxu0 %v3662_v13  ;;  %2889 = vmatprep.subr.bf16.mxu1 %v3664_v17 }
 0x336   :  { %2808 = vmatpush1.bf16.msra.mxu0 %v3661_v15  ;;  %2890 = vmatpush1.bf16.msra.mxu1 %v3663_v16 }
 0x337   :  { %2809 = vmatprep.subr.bf16.mxu0 %v3670_v21  ;;  %2891 = vmatprep.subr.bf16.mxu1 %v3672_v25 }
 0x33a   :  { %2810 = vmatpush1.bf16.msra.mxu0 %v3669_v23  ;;  %2892 = vmatpush1.bf16.msra.mxu1 %v3671_v24 }
 0x33b   :  { %2811 = vmatprep.subr.bf16.mxu0 %v3678_v28  ;;  %2893 = vmatprep.subr.bf16.mxu1 %v3680_v33 }
 0x33e   :  { %2812 = vmatpush1.bf16.msra.mxu0 %v3677_v31  ;;  %2894 = vmatpush1.bf16.msra.mxu1 %v3679_v32 }
 0x33f   :  { %2813 = vmatprep.subr.bf16.mxu0 %v3686_v41  ;;  %2895 = vmatprep.subr.bf16.mxu1 %v3688_v50 }
 0x342   :  { %2814 = vmatpush1.bf16.msra.mxu0 %v3685_v45  ;;  %2896 = vmatpush1.bf16.msra.mxu1 %v3687_v48 }
 0x343   :  { %2815 = vmatprep.subr.bf16.mxu0 %v3694_v55  ;;  %2897 = vmatprep.subr.bf16.mxu1 %v3696_v58 }
 0x346   :  { %2816 = vmatpush1.bf16.msra.mxu0 %v3693_v54  ;;  %2898 = vmatpush1.bf16.msra.mxu1 %v3695_v57 }
 0x347   :  { %2826 = vmatprep.subr.bf16.mxu0 %v3702_v62  ;;  %2908 = vmatprep.subr.bf16.mxu1 %v3704_v2 }
 0x3dc   :  { %v1007_v40 = vpop.f32.mrb[4].mxu0  ;;  %v1048_v39 = vpop.f32.mrb[4].mxu1 }
 0x3dd   :  { %v1008_v42 = vadd.f32 %v1007_v40, %v636_v6  ;;  %v1049_v43 = vadd.f32 %v1048_v39, %v644_v7  ;;  %v1009_v8 = vpop.f32.mrb[5].mxu0  ;;  %v1050_v9 = vpop.f32.mrb[5].mxu1 }
 0x3de   :  { %v1010_v10 = vadd.f32 %v1009_v8, %v640_v37  ;;  %v1051_v11 = vadd.f32 %v1050_v9, %v648_v38  ;;  %v1011_v12 = vpop.f32.mrb[6].mxu0  ;;  %v1052_v13 = vpop.f32.mrb[6].mxu1 }
 0x3df   :  { %v1055_v14 = vsel %vm487_vm2, %v1008_v42, 0.0  ;;  %v1069_v15 = vsel %vm487_vm2, %v1049_v43, 0.0  ;;  %v1012_v16 = vpop.f32.mrb[7].mxu0  ;;  %v1053_v17 = vpop.f32.mrb[7].mxu1 }
 0x3e0   :  { %v1056_v18 = vrot.slane %v1055_v14, 4  ;;  %v1070_v19 = vrot.slane %v1069_v15, 4  ;;  %v1062_v20 = vsel %vm487_vm2, %v1010_v10, 0.0  ;;  %v1076_v21 = vsel %vm487_vm2, %v1051_v11, 0.0 }
 0x3e1   :  { %v1063_v22 = vrot.slane %v1062_v20, 4  ;;  %v1077_v23 = vrot.slane %v1076_v21, 4 }
 0x3e2   :  { %v1057_v24 = vadd.f32 %v1056_v18, %v1055_v14  ;;  %v1071_v25 = vadd.f32 %v1070_v19, %v1069_v15 }
 0x3e3   :  { %v1064_v26 = vadd.f32 %v1063_v22, %v1062_v20  ;;  %v1078_v27 = vadd.f32 %v1077_v23, %v1076_v21 }
 0x3e4   :  { %v1058_v28 = vrot.slane %v1057_v24, 2  ;;  %v1072_v29 = vrot.slane %v1071_v25, 2 }
 0x3e5   :  { %v1065_v30 = vrot.slane %v1064_v26, 2  ;;  %v1079_v31 = vrot.slane %v1078_v27, 2 }
 0x3e6   :  { %v1059_v32 = vadd.f32 %v1058_v28, %v1057_v24  ;;  %v1073_v33 = vadd.f32 %v1072_v29, %v1071_v25 }
 0x3e7   :  { %v1066_v34 = vadd.f32 %v1065_v30, %v1064_v26  ;;  %v1080_v35 = vadd.f32 %v1079_v31, %v1078_v27 }
 0x3e8   :  { %v1060_v36 = vrot.slane %v1059_v32, 1  ;;  %v1074_v41 = vrot.slane %v1073_v33, 1 }
 0x3e9   :  { %v1067_v44 = vrot.slane %v1066_v34, 1  ;;  %v1081_v45 = vrot.slane %v1080_v35, 1 }
 0x3ea   :  { %v1061_v48 = vadd.f32 %v1060_v36, %v1059_v32  ;;  %v1075_v50 = vadd.f32 %v1074_v41, %v1073_v33 }
 0x3eb   :  { %v1068_v51 = vadd.f32 %v1067_v44, %v1066_v34  ;;  %v1082_v52 = vadd.f32 %v1081_v45, %v1080_v35  ;;  %v1139_v45 = vld [vmem:[#allocation15] sm:$0xf] }
 0x3ec   :  { %v1083_v53 = vmul.f32 0.5, %v1061_v48  ;;  %v1085_v54 = vmul.f32 0.5, %v1075_v50  ;;  %v1165_v48 = vld [vmem:[#allocation16] sm:$0xf]  ;;  %v1144_v50 = vrot.slane %v1139_v45, %v4702_v47 }
 0x3ed   :  { %v1084_v55 = vmul.f32 0.5, %v1068_v51  ;;  %v1086_v56 = vmul.f32 0.5, %v1082_v52  ;;  %v1152_v52 = vrot.slane %v1139_v45, %v4740_v3 }
 0x3ee   :  { %v1087_v57 = vsub.f32 %v1008_v42, %v1083_v53  ;;  %v1089_v58 = vsub.f32 %v1049_v43, %v1085_v54 }
 0x3ef   :  { %v1088_v62 = vsub.f32 %v1010_v10, %v1084_v55  ;;  %v4753_v2 = vsub.f32 %v1051_v11, %v1086_v56  ;;  %v1170_v55 = vrot.slane %v1165_v48, %v4702_v47  ;;  %v1148_v56 = vrot.slane %v1139_v45, %v4705_v49 }
 0x3f0   :  { %v1091_v4 = vmul.f32 %v1087_v57, %v1087_v57  ;;  %v1093_v6 = vmul.f32 %v1089_v58, %v1089_v58 }
 0x3f1   :  { %v1092_v7 = vmul.f32 %v1088_v62, %v1088_v62  ;;  %v1094_v37 = vmul.f32 %v4753_v2, %v4753_v2 }
 0x3f2   :  { %v1095_v38 = vsel %vm487_vm2, %v1091_v4, 0.0  ;;  %v1109_v40 = vsel %vm487_vm2, %v1093_v6, 0.0 }
 0x3f3   :  { %v1096_v39 = vrot.slane %v1095_v38, 4  ;;  %v1110_v8 = vrot.slane %v1109_v40, 4  ;;  %v1102_v9 = vsel %vm487_vm2, %v1092_v7, 0.0  ;;  %v1116_v42 = vsel %vm487_vm2, %v1094_v37, 0.0 }
 0x3f4   :  { %v1103_v43 = vrot.slane %v1102_v9, 4  ;;  %v1117_v10 = vrot.slane %v1116_v42, 4  ;;  %v1178_v7 = vrot.slane %v1165_v48, %v4740_v3  ;;  %v1156_v37 = vrot.slane %v1139_v45, %v4743_v5  ;;  %v1368_v45 = vld [vmem:[#allocation18 + $0x508] sm:$0xff] }
 0x3f5   :  { %v1097_v11 = vadd.f32 %v1096_v39, %v1095_v38  ;;  %v1111_v12 = vadd.f32 %v1110_v8, %v1109_v40  ;;  %v1174_v8 = vrot.slane %v1165_v48, %v4705_v49 }
 0x3f6   :  { %v1104_v13 = vadd.f32 %v1103_v43, %v1102_v9  ;;  %v1118_v14 = vadd.f32 %v1117_v10, %v1116_v42 }
 0x3f7   :  { %v1098_v15 = vrot.slane %v1097_v11, 2  ;;  %v1112_v16 = vrot.slane %v1111_v12, 2 }
 0x3f8   :  { %v1105_v17 = vrot.slane %v1104_v13, 2  ;;  %v1119_v18 = vrot.slane %v1118_v14, 2 }
 0x3f9   :  { %v1099_v19 = vadd.f32 %v1098_v15, %v1097_v11  ;;  %v1113_v20 = vadd.f32 %v1112_v16, %v1111_v12 }
 0x3fa   :  { %v1106_v21 = vadd.f32 %v1105_v17, %v1104_v13  ;;  %v1120_v22 = vadd.f32 %v1119_v18, %v1118_v14  ;;  %v1343_v17 = vld [vmem:[#allocation18 + $0x440] sm:$0xff] }
 0x3fb   :  { %v1100_v23 = vrot.slane %v1099_v19, 1  ;;  %v1114_v24 = vrot.slane %v1113_v20, 1 }
 0x3fc   :  { %v1107_v25 = vrot.slane %v1106_v21, 1  ;;  %v1121_v26 = vrot.slane %v1120_v22, 1 }
 0x3fd   :  { %v1101_v27 = vadd.f32 %v1100_v23, %v1099_v19  ;;  %v1115_v28 = vadd.f32 %v1114_v24, %v1113_v20  ;;  %v1347_v19 = vld [vmem:[#allocation18 + $0x460] sm:$0xff]  ;;  %v1348_v20 = vld [vmem:[#allocation18 + $0x468] sm:$0xff] }
 0x3fe   :  { %v1108_v29 = vadd.f32 %v1107_v25, %v1106_v21  ;;  %v1122_v30 = vadd.f32 %v1121_v26, %v1120_v22  ;;  %v1351_v24 = vld [vmem:[#allocation18 + $0x480] sm:$0xff]  ;;  %v3710_v25 = vcombine.high %v1343_v17, %v1347_v19 }
 0x3ff   :  { %v1123_v31 = vmul.f32 0.5, %v1101_v27  ;;  %v1125_v32 = vmul.f32 0.5, %v1115_v28  ;;  %v1355_v27 = vld [vmem:[#allocation18 + $0x4a0] sm:$0xff]  ;;  %v1352_v28 = vld [vmem:[#allocation18 + $0x488] sm:$0xff] }
 0x400   :  { %v1124_v33 = vmul.f32 0.5, %v1108_v29  ;;  %v1126_v34 = vmul.f32 0.5, %v1122_v30  ;;  %v1356_v29 = vld [vmem:[#allocation18 + $0x4a8] sm:$0xff]  ;;  %v3717_v59 = vcombine.low %v1351_v24, %v1355_v27 }
 0x401   :  { %v1127_v35 = vadd.f32 0.8, %v1123_v31  ;;  %v1129_v36 = vadd.f32 0.8, %v1125_v32  ;;  %v3709_v31 = vcombine.low %v1343_v17, %v1347_v19  ;;  %v3719_v60 = vcombine.low %v1352_v28, %v1356_v29  ;;  %v1403_v19 = vld [vmem:[#allocation18 + $0x620] sm:$0xff] }
 0x402   :  { %v1128_v41 = vadd.f32 0.8, %v1124_v33  ;;  %v1130_v44 = vadd.f32 0.8, %v1126_v34  ;;  %v3718_v33 = vcombine.high %v1351_v24, %v1355_v27  ;;  %v3720_v34 = vcombine.high %v1352_v28, %v1356_v29  ;;  %v1407_v27 = vld [vmem:[#allocation18 + $0x640] sm:$0xff]  ;;  %v1408_v29 = vld [vmem:[#allocation18 + $0x648] sm:$0xff] }
 0x403   :  { %4044 = vrsqrt.f32 %v1127_v35  ;;  %v1359_v35 = vld [vmem:[#allocation18 + $0x4c0] sm:$0xff] }
 0x404   :  { %4046 = vrsqrt.f32 %v1129_v36  ;;  %v1363_v36 = vld [vmem:[#allocation18 + $0x4e0] sm:$0xff] }
 0x405   :  { %4048 = vrsqrt.f32 %v1128_v41  ;;  %v1360_v41 = vld [vmem:[#allocation18 + $0x4c8] sm:$0xff]  ;;  %v3726_v61 = vcombine.high %v1359_v35, %v1363_v36  ;;  %v1411_v28 = vld [vmem:[#allocation18 + $0x660] sm:$0xff] }
 0x406   :  { %4050 = vrsqrt.f32 %v1130_v44  ;;  %v1364_v44 = vld [vmem:[#allocation18 + $0x4e8] sm:$0xff] }
 0x407   :  { %v3728_v63 = vcombine.high %v1360_v41, %v1364_v44 }
 0x40d   :  { %v4045_v51 = vpop.eup %4044 }
 0x40e   :  { %v4047_v53 = vpop.eup %4046  ;;  %v1135_v54 = vmul.f32 %v4045_v51, %v1087_v57  ;;  %v1182_v57 = vrot.slane %v1165_v48, %v4743_v5  ;;  %v1372_v48 = vld [vmem:[#allocation18 + $0x528] sm:$0xff]  ;;  %v3727_v51 = vcombine.low %v1360_v41, %v1364_v44  ;;  %v1419_v41 = vld [vmem:[#allocation18 + $0x6a0] sm:$0xff] }
 0x40f   :  { %v4049_v4 = vpop.eup %4048  ;;  %v1137_v6 = vmul.f32 %v4047_v53, %v1089_v58  ;;  %v3736_v53 = vcombine.high %v1368_v45, %v1372_v48  ;;  %v1416_v44 = vld [vmem:[#allocation18 + $0x688] sm:$0xff] }
 0x410   :  { %v4051_v38 = vpop.eup %4050  ;;  %v1161_v40 = vmul.f32 %v1144_v50, %v1135_v54  ;;  %v1136_v39 = vmul.f32 %v4049_v4, %v1088_v62  ;;  %v3725_v50 = vcombine.low %v1359_v35, %v1363_v36  ;;  %v1375_v54 = vld [vmem:[#allocation18 + $0x540] sm:$0xff]  ;;  %v1380_v4 = vld [vmem:[#allocation18 + $0x568] sm:$0xff] }
 0x411   :  { %v1163_v9 = vmul.f32 %v1152_v52, %v1137_v6  ;;  %v1138_v42 = vmul.f32 %v4051_v38, %v4753_v2  ;;  %v1344_v2 = vld [vmem:[#allocation18 + $0x448] sm:$0xff]  ;;  %v1415_v36 = vld [vmem:[#allocation18 + $0x680] sm:$0xff] }
 0x412   :  { %v1187_v43 = vadd.f32 %v1170_v55, %v1161_v40  ;;  %v1162_v10 = vmul.f32 %v1148_v56, %v1136_v39  ;;  %v3712_v26 = vcombine.high %v1344_v2, %v1348_v20  ;;  %v3711_v32 = vcombine.low %v1344_v2, %v1348_v20  ;;  %v1379_v55 = vld [vmem:[#allocation18 + $0x560] sm:$0xff]  ;;  %v1376_v56 = vld [vmem:[#allocation18 + $0x548] sm:$0xff] }
 0x413   :  { %v4770_v11 = vadd.f32 %v1178_v7, %v1163_v9  ;;  %v1164_v12 = vmul.f32 %v1156_v37, %v1138_v42  ;;  %v3735_v7 = vcombine.low %v1368_v45, %v1372_v48  ;;  %v3742_v37 = vcombine.high %v1375_v54, %v1379_v55  ;;  %v1383_v40 = vld [vmem:[#allocation18 + $0x580] sm:$0xff]  ;;  %v1388_v9 = vld [vmem:[#allocation18 + $0x5a8] sm:$0xff] }
 0x414   :  { %v1188_v58 = vadd.f32 %v1174_v8, %v1162_v10  ;;  %vm1191_vm5 = vcmp.ge.f32.partialorder %v1187_v43, 0.0  ;;  %v1195_v13 = vmul.f32 0.2, %v1187_v43  ;;  %v3744_v38 = vcombine.high %v1376_v56, %v1380_v4  ;;  %v1387_v39 = vld [vmem:[#allocation18 + $0x5a0] sm:$0xff]  ;;  %v1384_v8 = vld [vmem:[#allocation18 + $0x588] sm:$0xff] }
 0x415   :  { %v1190_v14 = vadd.f32 %v1182_v57, %v1164_v12  ;;  %v3741_v42 = vcombine.low %v1375_v54, %v1379_v55  ;;  %v3743_v57 = vcombine.low %v1376_v56, %v1380_v4  ;;  %v3752_v10 = vcombine.high %v1384_v8, %v1388_v9  ;;  %v1391_v12 = vld [vmem:[#allocation18 + $0x5c0] sm:$0xff]  ;;  %v1400_v2 = vld [vmem:[#allocation18 + $0x608] sm:$0xff] }
 0x416   :  { %vm1192_vm6 = vcmp.ge.f32.partialorder %v1188_v58, 0.0  ;;  %v1196_v15 = vmul.f32 0.2, %v1188_v58  ;;  %v1199_v16 = vsel %vm1191_vm5, %v1187_v43, %v1195_v13  ;;  %v3750_v43 = vcombine.high %v1383_v40, %v1387_v39  ;;  %v1392_v13 = vld [vmem:[#allocation18 + $0x5c8] sm:$0xff]  ;;  %v1427_v45 = vld [vmem:[#allocation18 + $0x6e0] sm:$0xff] }
 0x417   :  { %vm1194_vm7 = vcmp.ge.f32.partialorder %v1190_v14, 0.0  ;;  %v1198_v62 = vmul.f32 0.2, %v1190_v14  ;;  %v4774_v23 = vpack.c.bf16 %v1199_v16, %v1199_v16  ;;  %v3751_v16 = vcombine.low %v1384_v8, %v1388_v9  ;;  %v1404_v20 = vld [vmem:[#allocation18 + $0x628] sm:$0xff]  ;;  %v1431_v55 = vld [vmem:[#allocation18 + $0x700] sm:$0xff] }
 0x418   :  { %v1200_v18 = vsel %vm1192_vm6, %v1188_v58, %v1196_v15  ;;  %v1395_v58 = vld [vmem:[#allocation18 + $0x5e0] sm:$0xff]  ;;  %v3749_v15 = vcombine.low %v1383_v40, %v1387_v39  ;;  %v1424_v48 = vld [vmem:[#allocation18 + $0x6c8] sm:$0xff]  ;;  %vm1193_vm8 = vcmp.ge.f32.partialorder %v4770_v11, 0.0 }
 0x419   :  { %v4772_v21 = vpack.c.bf16 %v1200_v18, %v1200_v18  ;;  %v1202_v22 = vsel %vm1194_vm7, %v1190_v14, %v1198_v62  ;;  %v1396_v14 = vld [vmem:[#allocation18 + $0x5e8] sm:$0xff]  ;;  %v3758_v62 = vcombine.high %v1391_v12, %v1395_v58  ;;  %v1399_v18 = vld [vmem:[#allocation18 + $0x600] sm:$0xff] }
 0x41a   :  { %v4780_v30 = vpack.c.bf16 %v1202_v22, %v1202_v22  ;;  %v3760_v17 = vcombine.high %v1392_v13, %v1396_v14  ;;  %v3757_v22 = vcombine.low %v1391_v12, %v1395_v58  ;;  %v3759_v24 = vcombine.low %v1392_v13, %v1396_v14  ;;  %v1435_v56 = vld [vmem:[#allocation18 + $0x720] sm:$0xff]  ;;  %v1432_v4 = vld [vmem:[#allocation18 + $0x708] sm:$0xff] }
 0x41b   :  { %2817 = vmatprep.mubr.bf16.mxu0 %v4772_v21  ;;  %2899 = vmatprep.mubr.bf16.mxu1 %v4772_v21  ;;  %v1439_v39 = vld [vmem:[#allocation18 + $0x740] sm:$0xff]  ;;  %v1440_v9 = vld [vmem:[#allocation18 + $0x748] sm:$0xff] }
 0x41c   :  { %2818 = vmatmul.mubr.bf16.vlgmr.msra.gmra.mrb[8].mxu0 %v4774_v23  ;;  %2900 = vmatmul.mubr.bf16.vlgmr.msra.gmra.mrb[8].mxu1 %v4774_v23  ;;  %v1443_v8 = vld [vmem:[#allocation18 + $0x760] sm:$0xff]  ;;  %v1448_v14 = vld [vmem:[#allocation18 + $0x788] sm:$0xff] }
 0x41d   :  { %2827 = vmatpush1.bf16.msra.mxu0 %v3701_v0  ;;  %2909 = vmatpush1.bf16.msra.mxu1 %v3703_v1  ;;  %v1367_v0 = vld [vmem:[#allocation18 + $0x500] sm:$0xff] }
 0x41e   :  { %2858 = vmatprep.mubr.bf16.mxu0 %v4780_v30  ;;  %2940 = vmatprep.mubr.bf16.mxu1 %v4780_v30  ;;  %v1371_v1 = vld [vmem:[#allocation18 + $0x520] sm:$0xff] }
 0x41f   :  { %2828 = vmatprep.subr.bf16.mxu0 %v3710_v25  ;;  %2910 = vmatprep.subr.bf16.mxu1 %v3712_v26  ;;  %v3734_v52 = vcombine.high %v1367_v0, %v1371_v1  ;;  %v3733_v6 = vcombine.low %v1367_v0, %v1371_v1  ;;  %v3766_v25 = vcombine.high %v1399_v18, %v1403_v19  ;;  %v1423_v1 = vld [vmem:[#allocation18 + $0x6c0] sm:$0xff] }
 0x420   :  { %v3768_v26 = vcombine.high %v1400_v2, %v1404_v20  ;;  %v1447_v58 = vld [vmem:[#allocation18 + $0x780] sm:$0xff] }
 0x421   :  { %2829 = vmatpush1.bf16.msra.mxu0 %v3709_v31  ;;  %2911 = vmatpush1.bf16.msra.mxu1 %v3711_v32  ;;  %v1412_v31 = vld [vmem:[#allocation18 + $0x668] sm:$0xff]  ;;  %v3765_v32 = vcombine.low %v1399_v18, %v1403_v19  ;;  %v1451_v13 = vld [vmem:[#allocation18 + $0x7a0] sm:$0xff] }
 0x422   :  { %2830 = vmatprep.subr.bf16.mxu0 %v3718_v33  ;;  %2912 = vmatprep.subr.bf16.mxu1 %v3720_v34  ;;  %v3767_v33 = vcombine.low %v1400_v2, %v1404_v20  ;;  %v3774_v34 = vcombine.high %v1407_v27, %v1411_v28  ;;  %v3776_v35 = vcombine.high %v1408_v29, %v1412_v31  ;;  %v1455_v19 = vld [vmem:[#allocation18 + $0x7c0] sm:$0xff]  ;;  %v1456_v20 = vld [vmem:[#allocation18 + $0x7c8] sm:$0xff] }
 0x423   :  { %v1459_v2 = vld [vmem:[#allocation18 + $0x7e0] sm:$0xff] }
 0x425   :  { %2831 = vmatpush1.bf16.msra.mxu0 %v3717_v59  ;;  %2913 = vmatpush1.bf16.msra.mxu1 %v3719_v60  ;;  %v1420_v59 = vld [vmem:[#allocation18 + $0x6a8] sm:$0xff]  ;;  %v3773_v60 = vcombine.low %v1407_v27, %v1411_v28  ;;  %v1209_v28 = vld [vmem:[#allocation18 + $0x10] sm:$0xff] }
 0x426   :  { %2832 = vmatprep.subr.bf16.mxu0 %v3726_v61  ;;  %2914 = vmatprep.subr.bf16.mxu1 %v3728_v63  ;;  %v3775_v61 = vcombine.low %v1408_v29, %v1412_v31  ;;  %v3782_v63 = vcombine.high %v1415_v36, %v1419_v41  ;;  %v3784_v0 = vcombine.high %v1416_v44, %v1420_v59  ;;  %v1197_v29 = vmul.f32 0.2, %v4770_v11  ;;  %v1213_v31 = vld [vmem:[#allocation18 + $0x30] sm:$0xff] }
 0x429   :  { %2833 = vmatpush1.bf16.msra.mxu0 %v3725_v50  ;;  %2915 = vmatpush1.bf16.msra.mxu1 %v3727_v51  ;;  %v1428_v50 = vld [vmem:[#allocation18 + $0x6e8] sm:$0xff]  ;;  %v3781_v51 = vcombine.low %v1415_v36, %v1419_v41  ;;  %v3578_v36 = vcombine.high %v1209_v28, %v1213_v31 }
 0x42a   :  { %2834 = vmatprep.subr.bf16.mxu0 %v3734_v52  ;;  %2916 = vmatprep.subr.bf16.mxu1 %v3736_v53  ;;  %v3783_v52 = vcombine.low %v1416_v44, %v1420_v59  ;;  %v3790_v53 = vcombine.high %v1423_v1, %v1427_v45  ;;  %v3792_v54 = vcombine.high %v1424_v48, %v1428_v50  ;;  %v1217_v59 = vld [vmem:[#allocation18 + $0x50] sm:$0xff] }
 0x42b   :  { %v1201_v44 = vsel %vm1193_vm8, %v4770_v11, %v1197_v29  ;;  %v1226_v11 = vld [vmem:[#allocation18 + $0x98] sm:$0xff] }
 0x42d   :  { %2835 = vmatpush1.bf16.msra.mxu0 %v3733_v6  ;;  %2917 = vmatpush1.bf16.msra.mxu1 %v3735_v7  ;;  %v1436_v6 = vld [vmem:[#allocation18 + $0x728] sm:$0xff]  ;;  %v3789_v7 = vcombine.low %v1423_v1, %v1427_v45  ;;  %v4793_v1 = vpack.c.bf16 %v1201_v44, %v1201_v44 }
 0x42e   :  { %2836 = vmatprep.subr.bf16.mxu0 %v3742_v37  ;;  %2918 = vmatprep.subr.bf16.mxu1 %v3744_v38  ;;  %v3791_v37 = vcombine.low %v1424_v48, %v1428_v50  ;;  %v3798_v38 = vcombine.high %v1431_v55, %v1435_v56  ;;  %v3800_v40 = vcombine.high %v1432_v4, %v1436_v6 }
 0x431   :  { %2837 = vmatpush1.bf16.msra.mxu0 %v3741_v42  ;;  %2919 = vmatpush1.bf16.msra.mxu1 %v3743_v57  ;;  %v1444_v42 = vld [vmem:[#allocation18 + $0x768] sm:$0xff]  ;;  %v3797_v57 = vcombine.low %v1431_v55, %v1435_v56 }
 0x432   :  { %2838 = vmatprep.subr.bf16.mxu0 %v3750_v43  ;;  %2920 = vmatprep.subr.bf16.mxu1 %v3752_v10  ;;  %v3799_v43 = vcombine.low %v1432_v4, %v1436_v6  ;;  %v3806_v10 = vcombine.high %v1439_v39, %v1443_v8  ;;  %v3808_v12 = vcombine.high %v1440_v9, %v1444_v42  ;;  %v1233_v6 = vld [vmem:[#allocation18 + $0xd0] sm:$0xff] }
 0x435   :  { %2839 = vmatpush1.bf16.msra.mxu0 %v3749_v15  ;;  %2921 = vmatpush1.bf16.msra.mxu1 %v3751_v16  ;;  %v1452_v15 = vld [vmem:[#allocation18 + $0x7a8] sm:$0xff]  ;;  %v3805_v16 = vcombine.low %v1439_v39, %v1443_v8 }
 0x436   :  { %2840 = vmatprep.subr.bf16.mxu0 %v3758_v62  ;;  %2922 = vmatprep.subr.bf16.mxu1 %v3760_v17  ;;  %v3807_v62 = vcombine.low %v1440_v9, %v1444_v42  ;;  %v3814_v17 = vcombine.high %v1447_v58, %v1451_v13  ;;  %v3816_v18 = vcombine.high %v1448_v14, %v1452_v15  ;;  %v1241_v42 = vld [vmem:[#allocation18 + $0x110] sm:$0xff] }
 0x439   :  { %2841 = vmatpush1.bf16.msra.mxu0 %v3757_v22  ;;  %2923 = vmatpush1.bf16.msra.mxu1 %v3759_v24  ;;  %v1460_v22 = vld [vmem:[#allocation18 + $0x7e8] sm:$0xff]  ;;  %v3813_v24 = vcombine.low %v1447_v58, %v1451_v13 }
 0x43a   :  { %2842 = vmatprep.subr.bf16.mxu0 %v3766_v25  ;;  %2924 = vmatprep.subr.bf16.mxu1 %v3768_v26  ;;  %v3815_v25 = vcombine.low %v1448_v14, %v1452_v15  ;;  %v3822_v26 = vcombine.high %v1455_v19, %v1459_v2  ;;  %v3824_v27 = vcombine.high %v1456_v20, %v1460_v22  ;;  %v1249_v14 = vld [vmem:[#allocation18 + $0x150] sm:$0xff] }
 0x43b   :  { %v1253_v15 = vld [vmem:[#allocation18 + $0x170] sm:$0xff] }
 0x43d   :  { %2843 = vmatpush1.bf16.msra.mxu0 %v3765_v32  ;;  %2925 = vmatpush1.bf16.msra.mxu1 %v3767_v33  ;;  %v1210_v32 = vld [vmem:[#allocation18 + $0x18] sm:$0xff] }
 0x43e   :  { %2844 = vmatprep.subr.bf16.mxu0 %v3774_v34  ;;  %2926 = vmatprep.subr.bf16.mxu1 %v3776_v35  ;;  %v1214_v33 = vld [vmem:[#allocation18 + $0x38] sm:$0xff]  ;;  %v3821_v34 = vcombine.low %v1455_v19, %v1459_v2  ;;  %v3823_v35 = vcombine.low %v1456_v20, %v1460_v22  ;;  %v3618_v19 = vcombine.high %v1249_v14, %v1253_v15  ;;  %v1257_v20 = vld [vmem:[#allocation18 + $0x190] sm:$0xff] }
 0x43f   :  { %v3580_v41 = vcombine.high %v1210_v32, %v1214_v33  ;;  %v3579_v45 = vcombine.low %v1210_v32, %v1214_v33  ;;  %v1261_v22 = vld [vmem:[#allocation18 + $0x1b0] sm:$0xff]  ;;  %v1266_v33 = vld [vmem:[#allocation18 + $0x1d8] sm:$0xff] }
 0x440   :  { %v1269_v32 = vld [vmem:[#allocation18 + $0x1f0] sm:$0xff] }
 0x441   :  { %2845 = vmatpush1.bf16.msra.mxu0 %v3773_v60  ;;  %2927 = vmatpush1.bf16.msra.mxu1 %v3775_v61  ;;  %v1221_v60 = vld [vmem:[#allocation18 + $0x70] sm:$0xff]  ;;  %v1218_v61 = vld [vmem:[#allocation18 + $0x58] sm:$0xff] }
 0x442   :  { %2846 = vmatprep.subr.bf16.mxu0 %v3782_v63  ;;  %2928 = vmatprep.subr.bf16.mxu1 %v3784_v0  ;;  %v1222_v63 = vld [vmem:[#allocation18 + $0x78] sm:$0xff]  ;;  %v3577_v0 = vcombine.low %v1209_v28, %v1213_v31  ;;  %v3586_v48 = vcombine.high %v1217_v59, %v1221_v60  ;;  %v3626_v28 = vcombine.high %v1257_v20, %v1261_v22  ;;  %v1265_v31 = vld [vmem:[#allocation18 + $0x1d0] sm:$0xff] }
 0x443   :  { %v3588_v50 = vcombine.high %v1218_v61, %v1222_v63  ;;  %v3587_v55 = vcombine.low %v1218_v61, %v1222_v63  ;;  %v1274_v61 = vld [vmem:[#allocation18 + $0x218] sm:$0xff] }
 0x444   :  { %v1278_v63 = vld [vmem:[#allocation18 + $0x238] sm:$0xff] }
 0x445   :  { %2847 = vmatpush1.bf16.msra.mxu0 %v3781_v51  ;;  %2929 = vmatpush1.bf16.msra.mxu1 %v3783_v52  ;;  %v1225_v51 = vld [vmem:[#allocation18 + $0x90] sm:$0xff] }
 0x446   :  { %2848 = vmatprep.subr.bf16.mxu0 %v3790_v53  ;;  %2930 = vmatprep.subr.bf16.mxu1 %v3792_v54  ;;  %v1229_v52 = vld [vmem:[#allocation18 + $0xb0] sm:$0xff]  ;;  %v1230_v53 = vld [vmem:[#allocation18 + $0xb8] sm:$0xff]  ;;  %v3585_v54 = vcombine.low %v1217_v59, %v1221_v60 }
 0x447   :  { %v3594_v56 = vcombine.high %v1225_v51, %v1229_v52  ;;  %v3596_v4 = vcombine.high %v1226_v11, %v1230_v53  ;;  %v3595_v39 = vcombine.low %v1226_v11, %v1230_v53  ;;  %v1273_v59 = vld [vmem:[#allocation18 + $0x210] sm:$0xff]  ;;  %v1282_v11 = vld [vmem:[#allocation18 + $0x258] sm:$0xff] }
 0x448   :  { %v1277_v60 = vld [vmem:[#allocation18 + $0x230] sm:$0xff]  ;;  %v1286_v53 = vld [vmem:[#allocation18 + $0x278] sm:$0xff] }
 0x449   :  { %2849 = vmatpush1.bf16.msra.mxu0 %v3789_v7  ;;  %2931 = vmatpush1.bf16.msra.mxu1 %v3791_v37  ;;  %v1237_v7 = vld [vmem:[#allocation18 + $0xf0] sm:$0xff]  ;;  %v1234_v37 = vld [vmem:[#allocation18 + $0xd8] sm:$0xff] }
 0x44a   :  { %2850 = vmatprep.subr.bf16.mxu0 %v3798_v38  ;;  %2932 = vmatprep.subr.bf16.mxu1 %v3800_v40  ;;  %v1238_v38 = vld [vmem:[#allocation18 + $0xf8] sm:$0xff]  ;;  %v3593_v40 = vcombine.low %v1225_v51, %v1229_v52  ;;  %v3602_v8 = vcombine.high %v1233_v6, %v1237_v7  ;;  %v1281_v51 = vld [vmem:[#allocation18 + $0x250] sm:$0xff] }
 0x44b   :  { %v3604_v9 = vcombine.high %v1234_v37, %v1238_v38  ;;  %v1285_v52 = vld [vmem:[#allocation18 + $0x270] sm:$0xff] }
 0x44d   :  { %2851 = vmatpush1.bf16.msra.mxu0 %v3797_v57  ;;  %2933 = vmatpush1.bf16.msra.mxu1 %v3799_v43  ;;  %v1245_v57 = vld [vmem:[#allocation18 + $0x130] sm:$0xff]  ;;  %v1246_v43 = vld [vmem:[#allocation18 + $0x138] sm:$0xff] }
 0x44e   :  { %2852 = vmatprep.subr.bf16.mxu0 %v3806_v10  ;;  %2934 = vmatprep.subr.bf16.mxu1 %v3808_v12  ;;  %v3601_v10 = vcombine.low %v1233_v6, %v1237_v7  ;;  %v3603_v12 = vcombine.low %v1234_v37, %v1238_v38  ;;  %v3610_v58 = vcombine.high %v1241_v42, %v1245_v57  ;;  %v1289_v6 = vld [vmem:[#allocation18 + $0x290] sm:$0xff]  ;;  %v1290_v37 = vld [vmem:[#allocation18 + $0x298] sm:$0xff] }
 0x44f   :  { %v1293_v7 = vld [vmem:[#allocation18 + $0x2b0] sm:$0xff]  ;;  %v1294_v38 = vld [vmem:[#allocation18 + $0x2b8] sm:$0xff] }
 0x451   :  { %2853 = vmatpush1.bf16.msra.mxu0 %v3805_v16  ;;  %2935 = vmatpush1.bf16.msra.mxu1 %v3807_v62  ;;  %v1250_v16 = vld [vmem:[#allocation18 + $0x158] sm:$0xff] }
 0x452   :  { %2854 = vmatprep.subr.bf16.mxu0 %v3814_v17  ;;  %2936 = vmatprep.subr.bf16.mxu1 %v3816_v18  ;;  %v1254_v62 = vld [vmem:[#allocation18 + $0x178] sm:$0xff]  ;;  %v3609_v17 = vcombine.low %v1241_v42, %v1245_v57  ;;  %v1297_v42 = vld [vmem:[#allocation18 + $0x2d0] sm:$0xff] }
 0x453   :  { %v3620_v2 = vcombine.high %v1250_v16, %v1254_v62  ;;  %v1301_v57 = vld [vmem:[#allocation18 + $0x2f0] sm:$0xff] }
 0x455   :  { %2855 = vmatpush1.bf16.msra.mxu0 %v3813_v24  ;;  %2937 = vmatpush1.bf16.msra.mxu1 %v3815_v25  ;;  %v1258_v24 = vld [vmem:[#allocation18 + $0x198] sm:$0xff] }
 0x456   :  { %2856 = vmatprep.subr.bf16.mxu0 %v3822_v26  ;;  %2938 = vmatprep.subr.bf16.mxu1 %v3824_v27  ;;  %v1262_v25 = vld [vmem:[#allocation18 + $0x1b8] sm:$0xff]  ;;  %v3617_v26 = vcombine.low %v1249_v14, %v1253_v15  ;;  %v3619_v27 = vcombine.low %v1250_v16, %v1254_v62  ;;  %v1305_v14 = vld [vmem:[#allocation18 + $0x310] sm:$0xff] }
 0x457   :  { %v3628_v29 = vcombine.high %v1258_v24, %v1262_v25  ;;  %v1309_v15 = vld [vmem:[#allocation18 + $0x330] sm:$0xff]  ;;  %v1306_v16 = vld [vmem:[#allocation18 + $0x318] sm:$0xff] }
 0x458   :  { %v1310_v62 = vld [vmem:[#allocation18 + $0x338] sm:$0xff] }
 0x459   :  { %2857 = vmatpush1.bf16.msra.mxu0 %v3821_v34  ;;  %2939 = vmatpush1.bf16.msra.mxu1 %v3823_v35  ;;  %v1270_v34 = vld [vmem:[#allocation18 + $0x1f8] sm:$0xff]  ;;  %v3625_v35 = vcombine.low %v1257_v20, %v1261_v22  ;;  %v1313_v20 = vld [vmem:[#allocation18 + $0x350] sm:$0xff] }
 0x45a   :  { %2949 = vmatprep.subr.bf16.mxu0 %v3578_v36  ;;  %3031 = vmatprep.subr.bf16.mxu1 %v3580_v41  ;;  %v3627_v36 = vcombine.low %v1258_v24, %v1262_v25  ;;  %v3634_v41 = vcombine.high %v1265_v31, %v1269_v32  ;;  %v3636_v44 = vcombine.high %v1266_v33, %v1270_v34  ;;  %v1317_v22 = vld [vmem:[#allocation18 + $0x370] sm:$0xff]  ;;  %v1314_v24 = vld [vmem:[#allocation18 + $0x358] sm:$0xff] }
 0x45b   :  { %v1318_v25 = vld [vmem:[#allocation18 + $0x378] sm:$0xff] }
 0x45c   :  { %2859 = vmatmul.mubr.bf16.vlgmr.msra.gmra.mrb[8].mxu0 %v4793_v1  ;;  %2941 = vmatmul.mubr.bf16.vlgmr.msra.gmra.mrb[8].mxu1 %v4793_v1 }
 0x45d   :  { %2950 = vmatpush1.bf16.msra.mxu0 %v3577_v0  ;;  %2981 = vmatprep.mubr.bf16.mxu0 %v4772_v21  ;;  %v3633_v0 = vcombine.low %v1265_v31, %v1269_v32  ;;  %v1321_v31 = vld [vmem:[#allocation18 + $0x390] sm:$0xff] }
 0x45e   :  { %3032 = vmatpush1.bf16.msra.mxu1 %v3579_v45  ;;  %3063 = vmatprep.mubr.bf16.mxu1 %v4772_v21  ;;  %v1242_v21 = vld [vmem:[#allocation18 + $0x118] sm:$0xff]  ;;  %v3635_v45 = vcombine.low %v1266_v33, %v1270_v34  ;;  %v1325_v32 = vld [vmem:[#allocation18 + $0x3b0] sm:$0xff] }
 0x45f   :  { %2951 = vmatprep.subr.bf16.mxu0 %v3586_v48  ;;  %3033 = vmatprep.subr.bf16.mxu1 %v3588_v50  ;;  %v3612_v13 = vcombine.high %v1242_v21, %v1246_v43  ;;  %v3611_v18 = vcombine.low %v1242_v21, %v1246_v43  ;;  %v3642_v48 = vcombine.high %v1273_v59, %v1277_v60  ;;  %v1298_v21 = vld [vmem:[#allocation18 + $0x2d8] sm:$0xff] }
 0x460   :  { %v3644_v50 = vcombine.high %v1274_v61, %v1278_v63  ;;  %v1302_v43 = vld [vmem:[#allocation18 + $0x2f8] sm:$0xff] }
 0x461   :  { %2952 = vmatpush1.bf16.msra.mxu0 %v3585_v54  ;;  %v3641_v54 = vcombine.low %v1273_v59, %v1277_v60  ;;  %v1322_v33 = vld [vmem:[#allocation18 + $0x398] sm:$0xff]  ;;  %v1329_v59 = vld [vmem:[#allocation18 + $0x3d0] sm:$0xff] }
 0x462   :  { %3034 = vmatpush1.bf16.msra.mxu1 %v3587_v55  ;;  %2953 = vmatprep.subr.bf16.mxu0 %v3594_v56  ;;  %v3643_v55 = vcombine.low %v1274_v61, %v1278_v63  ;;  %v3650_v56 = vcombine.high %v1281_v51, %v1285_v52  ;;  %v1326_v34 = vld [vmem:[#allocation18 + $0x3b8] sm:$0xff]  ;;  %v1333_v60 = vld [vmem:[#allocation18 + $0x3f0] sm:$0xff] }
 0x463   :  { %3035 = vmatprep.subr.bf16.mxu1 %v3596_v4  ;;  %v3652_v4 = vcombine.high %v1282_v11, %v1286_v53  ;;  %v1330_v61 = vld [vmem:[#allocation18 + $0x3d8] sm:$0xff] }
 0x464   :  { %v1334_v63 = vld [vmem:[#allocation18 + $0x3f8] sm:$0xff] }
 0x465   :  { %2954 = vmatpush1.bf16.msra.mxu0 %v3593_v40  ;;  %v3649_v40 = vcombine.low %v1281_v51, %v1285_v52  ;;  %v1337_v51 = vld [vmem:[#allocation18 + $0x410] sm:$0xff] }
 0x466   :  { %3036 = vmatpush1.bf16.msra.mxu1 %v3595_v39  ;;  %2955 = vmatprep.subr.bf16.mxu0 %v3602_v8  ;;  %v3651_v39 = vcombine.low %v1282_v11, %v1286_v53  ;;  %v3658_v8 = vcombine.high %v1289_v6, %v1293_v7  ;;  %v1341_v52 = vld [vmem:[#allocation18 + $0x430] sm:$0xff]  ;;  %v1338_v11 = vld [vmem:[#allocation18 + $0x418] sm:$0xff] }
 0x467   :  { %3037 = vmatprep.subr.bf16.mxu1 %v3604_v9  ;;  %v3660_v9 = vcombine.high %v1290_v37, %v1294_v38  ;;  %v1342_v53 = vld [vmem:[#allocation18 + $0x438] sm:$0xff] }
 0x469   :  { %2956 = vmatpush1.bf16.msra.mxu0 %v3601_v10  ;;  %v3657_v10 = vcombine.low %v1289_v6, %v1293_v7  ;;  %v1345_v6 = vld [vmem:[#allocation18 + $0x450] sm:$0xff] }
 0x46a   :  { %3038 = vmatpush1.bf16.msra.mxu1 %v3603_v12  ;;  %2957 = vmatprep.subr.bf16.mxu0 %v3610_v58  ;;  %v3659_v12 = vcombine.low %v1290_v37, %v1294_v38  ;;  %v3666_v58 = vcombine.high %v1297_v42, %v1301_v57  ;;  %v1349_v7 = vld [vmem:[#allocation18 + $0x470] sm:$0xff]  ;;  %v3705_v37 = vcombine.low %v1337_v51, %v1341_v52  ;;  %v1346_v38 = vld [vmem:[#allocation18 + $0x458] sm:$0xff] }
 0x46b   :  { %3039 = vmatprep.subr.bf16.mxu1 %v3612_v13  ;;  %v3668_v13 = vcombine.high %v1298_v21, %v1302_v43 }
 0x46d   :  { %2958 = vmatpush1.bf16.msra.mxu0 %v3609_v17  ;;  %v3665_v17 = vcombine.low %v1297_v42, %v1301_v57  ;;  %v1357_v42 = vld [vmem:[#allocation18 + $0x4b0] sm:$0xff] }
 0x46e   :  { %3040 = vmatpush1.bf16.msra.mxu1 %v3611_v18  ;;  %2959 = vmatprep.subr.bf16.mxu0 %v3618_v19  ;;  %v3667_v18 = vcombine.low %v1298_v21, %v1302_v43  ;;  %v3674_v19 = vcombine.high %v1305_v14, %v1309_v15  ;;  %v1354_v21 = vld [vmem:[#allocation18 + $0x498] sm:$0xff] }
 0x46f   :  { %3041 = vmatprep.subr.bf16.mxu1 %v3620_v2  ;;  %v3676_v2 = vcombine.high %v1306_v16, %v1310_v62  ;;  %v1358_v43 = vld [vmem:[#allocation18 + $0x4b8] sm:$0xff] }
 0x471   :  { %2960 = vmatpush1.bf16.msra.mxu0 %v3617_v26  ;;  %v3673_v26 = vcombine.low %v1305_v14, %v1309_v15  ;;  %v1361_v14 = vld [vmem:[#allocation18 + $0x4d0] sm:$0xff] }
 0x472   :  { %3042 = vmatpush1.bf16.msra.mxu1 %v3619_v27  ;;  %2961 = vmatprep.subr.bf16.mxu0 %v3626_v28  ;;  %v3675_v27 = vcombine.low %v1306_v16, %v1310_v62  ;;  %v3682_v28 = vcombine.high %v1313_v20, %v1317_v22  ;;  %v1365_v15 = vld [vmem:[#allocation18 + $0x4f0] sm:$0xff]  ;;  %v1362_v16 = vld [vmem:[#allocation18 + $0x4d8] sm:$0xff] }
 0x473   :  { %3043 = vmatprep.subr.bf16.mxu1 %v3628_v29  ;;  %v3684_v29 = vcombine.high %v1314_v24, %v1318_v25  ;;  %v1366_v62 = vld [vmem:[#allocation18 + $0x4f8] sm:$0xff] }
 0x475   :  { %2962 = vmatpush1.bf16.msra.mxu0 %v3625_v35  ;;  %v3681_v35 = vcombine.low %v1313_v20, %v1317_v22  ;;  %v1373_v20 = vld [vmem:[#allocation18 + $0x530] sm:$0xff]  ;;  %v1370_v22 = vld [vmem:[#allocation18 + $0x518] sm:$0xff] }
 0x476   :  { %3044 = vmatpush1.bf16.msra.mxu1 %v3627_v36  ;;  %2963 = vmatprep.subr.bf16.mxu0 %v3634_v41  ;;  %v3683_v36 = vcombine.low %v1314_v24, %v1318_v25  ;;  %v3690_v41 = vcombine.high %v1321_v31, %v1325_v32  ;;  %v1374_v24 = vld [vmem:[#allocation18 + $0x538] sm:$0xff]  ;;  %v3731_v25 = vcombine.low %v1362_v16, %v1366_v62 }
 0x477   :  { %3045 = vmatprep.subr.bf16.mxu1 %v3636_v44  ;;  %v3692_v44 = vcombine.high %v1322_v33, %v1326_v34 }
 0x479   :  { %2964 = vmatpush1.bf16.msra.mxu0 %v3633_v0  ;;  %v3689_v0 = vcombine.low %v1321_v31, %v1325_v32  ;;  %v1378_v31 = vld [vmem:[#allocation18 + $0x558] sm:$0xff] }
 0x47a   :  { %3046 = vmatpush1.bf16.msra.mxu1 %v3635_v45  ;;  %2965 = vmatprep.subr.bf16.mxu0 %v3642_v48  ;;  %v3691_v45 = vcombine.low %v1322_v33, %v1326_v34  ;;  %v3698_v48 = vcombine.high %v1329_v59, %v1333_v60  ;;  %v1382_v32 = vld [vmem:[#allocation18 + $0x578] sm:$0xff]  ;;  %v3739_v34 = vcombine.low %v1370_v22, %v1374_v24 }
 0x47b   :  { %3047 = vmatprep.subr.bf16.mxu1 %v3644_v50  ;;  %v3700_v50 = vcombine.high %v1330_v61, %v1334_v63 }
 0x47d   :  { %2966 = vmatpush1.bf16.msra.mxu0 %v3641_v54  ;;  %v3697_v54 = vcombine.low %v1329_v59, %v1333_v60  ;;  %v1386_v59 = vld [vmem:[#allocation18 + $0x598] sm:$0xff] }
 0x47e   :  { %3048 = vmatpush1.bf16.msra.mxu1 %v3643_v55  ;;  %2967 = vmatprep.subr.bf16.mxu0 %v3650_v56  ;;  %v3699_v55 = vcombine.low %v1330_v61, %v1334_v63  ;;  %v3706_v56 = vcombine.high %v1337_v51, %v1341_v52  ;;  %v1390_v60 = vld [vmem:[#allocation18 + $0x5b8] sm:$0xff]  ;;  %v3747_v63 = vcombine.low %v1378_v31, %v1382_v32 }
 0x47f   :  { %3049 = vmatprep.subr.bf16.mxu1 %v3652_v4  ;;  %v3708_v4 = vcombine.high %v1338_v11, %v1342_v53  ;;  %v1394_v51 = vld [vmem:[#allocation18 + $0x5d8] sm:$0xff] }
 0x480   :  { %v1398_v52 = vld [vmem:[#allocation18 + $0x5f8] sm:$0xff] }
 0x481   :  { %2968 = vmatpush1.bf16.msra.mxu0 %v3649_v40  ;;  %v1350_v40 = vld [vmem:[#allocation18 + $0x478] sm:$0xff] }
 0x482   :  { %3050 = vmatpush1.bf16.msra.mxu1 %v3651_v39  ;;  %2969 = vmatprep.subr.bf16.mxu0 %v3658_v8  ;;  %v3707_v39 = vcombine.low %v1338_v11, %v1342_v53  ;;  %v3714_v8 = vcombine.high %v1345_v6, %v1349_v7  ;;  %v3716_v57 = vcombine.high %v1346_v38, %v1350_v40 }
 0x483   :  { %3051 = vmatprep.subr.bf16.mxu1 %v3660_v9  ;;  %v1353_v9 = vld [vmem:[#allocation18 + $0x490] sm:$0xff]  ;;  %v3755_v53 = vcombine.low %v1386_v59, %v1390_v60 }
 0x485   :  { %2970 = vmatpush1.bf16.msra.mxu0 %v3657_v10  ;;  %v3713_v10 = vcombine.low %v1345_v6, %v1349_v7  ;;  %v1402_v6 = vld [vmem:[#allocation18 + $0x618] sm:$0xff] }
 0x486   :  { %3052 = vmatpush1.bf16.msra.mxu1 %v3659_v12  ;;  %2971 = vmatprep.subr.bf16.mxu0 %v3666_v58  ;;  %v3715_v12 = vcombine.low %v1346_v38, %v1350_v40  ;;  %v3722_v58 = vcombine.high %v1353_v9, %v1357_v42  ;;  %v1406_v7 = vld [vmem:[#allocation18 + $0x638] sm:$0xff]  ;;  %v3763_v38 = vcombine.low %v1394_v51, %v1398_v52 }
 0x487   :  { %3053 = vmatprep.subr.bf16.mxu1 %v3668_v13  ;;  %v3724_v13 = vcombine.high %v1354_v21, %v1358_v43 }
 0x489   :  { %2972 = vmatpush1.bf16.msra.mxu0 %v3665_v17  ;;  %v3721_v17 = vcombine.low %v1353_v9, %v1357_v42  ;;  %v1413_v9 = vld [vmem:[#allocation18 + $0x670] sm:$0xff]  ;;  %v1410_v42 = vld [vmem:[#allocation18 + $0x658] sm:$0xff] }
 0x48a   :  { %3054 = vmatpush1.bf16.msra.mxu1 %v3667_v18  ;;  %2973 = vmatprep.subr.bf16.mxu0 %v3674_v19  ;;  %v3730_v18 = vcombine.high %v1361_v14, %v1365_v15  ;;  %v3732_v19 = vcombine.high %v1362_v16, %v1366_v62 }
 0x48b   :  { %3055 = vmatprep.subr.bf16.mxu1 %v3676_v2  ;;  %v1369_v2 = vld [vmem:[#allocation18 + $0x510] sm:$0xff] }
 0x48c   :  { %v3737_v33 = vcombine.low %v1369_v2, %v1373_v20 }
 0x48d   :  { %2974 = vmatpush1.bf16.msra.mxu0 %v3673_v26  ;;  %v3738_v26 = vcombine.high %v1369_v2, %v1373_v20  ;;  %v1426_v2 = vld [vmem:[#allocation18 + $0x6d8] sm:$0xff] }
 0x48e   :  { %3056 = vmatpush1.bf16.msra.mxu1 %v3675_v27  ;;  %2975 = vmatprep.subr.bf16.mxu0 %v3682_v28  ;;  %v3740_v27 = vcombine.high %v1370_v22, %v1374_v24  ;;  %v1377_v28 = vld [vmem:[#allocation18 + $0x550] sm:$0xff]  ;;  %v1430_v20 = vld [vmem:[#allocation18 + $0x6f8] sm:$0xff] }
 0x48f   :  { %3057 = vmatprep.subr.bf16.mxu1 %v3684_v29  ;;  %v1381_v29 = vld [vmem:[#allocation18 + $0x570] sm:$0xff] }
 0x490   :  { %v3745_v61 = vcombine.low %v1377_v28, %v1381_v29 }
 0x491   :  { %2976 = vmatpush1.bf16.msra.mxu0 %v3681_v35  ;;  %v3746_v35 = vcombine.high %v1377_v28, %v1381_v29  ;;  %v1434_v28 = vld [vmem:[#allocation18 + $0x718] sm:$0xff] }
 0x492   :  { %3058 = vmatpush1.bf16.msra.mxu1 %v3683_v36  ;;  %2977 = vmatprep.subr.bf16.mxu0 %v3690_v41  ;;  %v3748_v36 = vcombine.high %v1378_v31, %v1382_v32  ;;  %v1385_v41 = vld [vmem:[#allocation18 + $0x590] sm:$0xff]  ;;  %v1438_v29 = vld [vmem:[#allocation18 + $0x738] sm:$0xff]  ;;  %v3795_v32 = vcombine.low %v1426_v2, %v1430_v20 }
 0x493   :  { %3059 = vmatprep.subr.bf16.mxu1 %v3692_v44  ;;  %v1389_v44 = vld [vmem:[#allocation18 + $0x5b0] sm:$0xff] }
 0x494   :  { %v3753_v11 = vcombine.low %v1385_v41, %v1389_v44 }
 0x495   :  { %2978 = vmatpush1.bf16.msra.mxu0 %v3689_v0  ;;  %v3754_v0 = vcombine.high %v1385_v41, %v1389_v44  ;;  %v1442_v41 = vld [vmem:[#allocation18 + $0x758] sm:$0xff] }
 0x496   :  { %3060 = vmatpush1.bf16.msra.mxu1 %v3691_v45  ;;  %2979 = vmatprep.subr.bf16.mxu0 %v3698_v48  ;;  %v3756_v45 = vcombine.high %v1386_v59, %v1390_v60  ;;  %v1393_v48 = vld [vmem:[#allocation18 + $0x5d0] sm:$0xff]  ;;  %v1446_v44 = vld [vmem:[#allocation18 + $0x778] sm:$0xff]  ;;  %v3803_v60 = vcombine.low %v1434_v28, %v1438_v29 }
 0x497   :  { %3061 = vmatprep.subr.bf16.mxu1 %v3700_v50  ;;  %v1397_v50 = vld [vmem:[#allocation18 + $0x5f0] sm:$0xff] }
 0x499   :  { %2980 = vmatpush1.bf16.msra.mxu0 %v3697_v54  ;;  %v3762_v54 = vcombine.high %v1393_v48, %v1397_v50 }
 0x49a   :  { %3062 = vmatpush1.bf16.msra.mxu1 %v3699_v55  ;;  %2990 = vmatprep.subr.bf16.mxu0 %v3706_v56  ;;  %v3764_v55 = vcombine.high %v1394_v51, %v1398_v52  ;;  %v1401_v56 = vld [vmem:[#allocation18 + $0x610] sm:$0xff]  ;;  %v3811_v52 = vcombine.low %v1442_v41, %v1446_v44 }
 0x49b   :  { %3072 = vmatprep.subr.bf16.mxu1 %v3708_v4  ;;  %v1405_v4 = vld [vmem:[#allocation18 + $0x630] sm:$0xff] }
 0x49c   :  { %2982 = vmatmul.mubr.bf16.vlgmr.msra.gmra.mrb[12].mxu0 %v4774_v23  ;;  %v3770_v40 = vcombine.high %v1401_v56, %v1405_v4 }
 0x49d   :  { %3064 = vmatmul.mubr.bf16.vlgmr.msra.gmra.mrb[12].mxu1 %v4774_v23  ;;  %2991 = vmatpush1.bf16.msra.mxu0 %v3705_v37  ;;  %v3723_v23 = vcombine.low %v1354_v21, %v1358_v43  ;;  %v3761_v37 = vcombine.low %v1393_v48, %v1397_v50  ;;  %v3769_v21 = vcombine.low %v1401_v56, %v1405_v4  ;;  %v1450_v48 = vld [vmem:[#allocation18 + $0x798] sm:$0xff] }
 0x49e   :  { %3022 = vmatprep.mubr.bf16.mxu0 %v4780_v30  ;;  %3073 = vmatpush1.bf16.msra.mxu1 %v3707_v39  ;;  %v3772_v39 = vcombine.high %v1402_v6, %v1406_v7  ;;  %v3771_v43 = vcombine.low %v1402_v6, %v1406_v7  ;;  %v1454_v50 = vld [vmem:[#allocation18 + $0x7b8] sm:$0xff] }
 0x49f   :  { %3104 = vmatprep.mubr.bf16.mxu1 %v4780_v30  ;;  %2992 = vmatprep.subr.bf16.mxu0 %v3714_v8  ;;  %v3729_v30 = vcombine.low %v1361_v14, %v1365_v15  ;;  %v1409_v8 = vld [vmem:[#allocation18 + $0x650] sm:$0xff]  ;;  %v1418_v14 = vld [vmem:[#allocation18 + $0x698] sm:$0xff]  ;;  %v3819_v7 = vcombine.low %v1450_v48, %v1454_v50 }
 0x4a0   :  { %3074 = vmatprep.subr.bf16.mxu1 %v3716_v57  ;;  %v1414_v57 = vld [vmem:[#allocation18 + $0x678] sm:$0xff]  ;;  %v3777_v16 = vcombine.low %v1409_v8, %v1413_v9 }
 0x4a1   :  { %2993 = vmatpush1.bf16.msra.mxu0 %v3713_v10  ;;  %v3778_v10 = vcombine.high %v1409_v8, %v1413_v9  ;;  %v1422_v15 = vld [vmem:[#allocation18 + $0x6b8] sm:$0xff]  ;;  %v3779_v62 = vcombine.low %v1410_v42, %v1414_v57  ;;  %v4805_v8 = vld [vmem:[#allocation19] sm:$0xff] }
 0x4a2   :  { %3075 = vmatpush1.bf16.msra.mxu1 %v3715_v12  ;;  %2994 = vmatprep.subr.bf16.mxu0 %v3722_v58  ;;  %v3780_v12 = vcombine.high %v1410_v42, %v1414_v57  ;;  %v1417_v58 = vld [vmem:[#allocation18 + $0x690] sm:$0xff]  ;;  %v3787_v24 = vcombine.low %v1418_v14, %v1422_v15  ;;  %v1458_v56 = vld [vmem:[#allocation18 + $0x7d8] sm:$0xff]  ;;  %v1468_v9 = vrot.slane %v4805_v8, %v4702_v47 }
 0x4a3   :  { %3076 = vmatprep.subr.bf16.mxu1 %v3724_v13  ;;  %v1421_v13 = vld [vmem:[#allocation18 + $0x6b0] sm:$0xff]  ;;  %v1462_v4 = vld [vmem:[#allocation18 + $0x7f8] sm:$0xff]  ;;  %v1476_v42 = vrot.slane %v4805_v8, %v4740_v3  ;;  %v1472_v57 = vrot.slane %v4805_v8, %v4705_v49 }
 0x4a4   :  { %v3785_v22 = vcombine.low %v1417_v58, %v1421_v13 }
 0x4a5   :  { %2995 = vmatpush1.bf16.msra.mxu0 %v3721_v17  ;;  %v3786_v17 = vcombine.high %v1417_v58, %v1421_v13 }
 0x4a6   :  { %3077 = vmatpush1.bf16.msra.mxu1 %v3723_v23  ;;  %2996 = vmatprep.subr.bf16.mxu0 %v3730_v18  ;;  %v3788_v23 = vcombine.high %v1418_v14, %v1422_v15  ;;  %v1425_v18 = vld [vmem:[#allocation18 + $0x6d0] sm:$0xff] }
 0x4a7   :  { %3078 = vmatprep.subr.bf16.mxu1 %v3732_v19  ;;  %v1429_v19 = vld [vmem:[#allocation18 + $0x6f0] sm:$0xff] }
 0x4a8   :  { %v3793_v31 = vcombine.low %v1425_v18, %v1429_v19 }
 0x4a9   :  { %2997 = vmatpush1.bf16.msra.mxu0 %v3729_v30  ;;  %v3794_v30 = vcombine.high %v1425_v18, %v1429_v19 }
 0x4aa   :  { %3079 = vmatpush1.bf16.msra.mxu1 %v3731_v25  ;;  %2998 = vmatprep.subr.bf16.mxu0 %v3738_v26  ;;  %v3796_v25 = vcombine.high %v1426_v2, %v1430_v20  ;;  %v1433_v26 = vld [vmem:[#allocation18 + $0x710] sm:$0xff] }
 0x4ab   :  { %3080 = vmatprep.subr.bf16.mxu1 %v3740_v27  ;;  %v1437_v27 = vld [vmem:[#allocation18 + $0x730] sm:$0xff] }
 0x4ac   :  { %v3801_v59 = vcombine.low %v1433_v26, %v1437_v27 }
 0x4ad   :  { %2999 = vmatpush1.bf16.msra.mxu0 %v3737_v33  ;;  %v3802_v33 = vcombine.high %v1433_v26, %v1437_v27 }
 0x4ae   :  { %3081 = vmatpush1.bf16.msra.mxu1 %v3739_v34  ;;  %3000 = vmatprep.subr.bf16.mxu0 %v3746_v35  ;;  %v3804_v34 = vcombine.high %v1434_v28, %v1438_v29  ;;  %v1441_v35 = vld [vmem:[#allocation18 + $0x750] sm:$0xff] }
 0x4af   :  { %3082 = vmatprep.subr.bf16.mxu1 %v3748_v36  ;;  %v1445_v36 = vld [vmem:[#allocation18 + $0x770] sm:$0xff] }
 0x4b0   :  { %v3809_v51 = vcombine.low %v1441_v35, %v1445_v36 }
 0x4b1   :  { %3001 = vmatpush1.bf16.msra.mxu0 %v3745_v61  ;;  %v3810_v61 = vcombine.high %v1441_v35, %v1445_v36 }
 0x4b2   :  { %3083 = vmatpush1.bf16.msra.mxu1 %v3747_v63  ;;  %3002 = vmatprep.subr.bf16.mxu0 %v3754_v0  ;;  %v3812_v63 = vcombine.high %v1442_v41, %v1446_v44  ;;  %v1449_v0 = vld [vmem:[#allocation18 + $0x790] sm:$0xff] }
 0x4b3   :  { %3084 = vmatprep.subr.bf16.mxu1 %v3756_v45  ;;  %v1453_v45 = vld [vmem:[#allocation18 + $0x7b0] sm:$0xff] }
 0x4b4   :  { %v3817_v6 = vcombine.low %v1449_v0, %v1453_v45 }
 0x4b5   :  { %3003 = vmatpush1.bf16.msra.mxu0 %v3753_v11  ;;  %v3818_v11 = vcombine.high %v1449_v0, %v1453_v45 }
 0x4b6   :  { %3085 = vmatpush1.bf16.msra.mxu1 %v3755_v53  ;;  %3004 = vmatprep.subr.bf16.mxu0 %v3762_v54  ;;  %v3820_v53 = vcombine.high %v1450_v48, %v1454_v50  ;;  %v1457_v54 = vld [vmem:[#allocation18 + $0x7d0] sm:$0xff] }
 0x4b7   :  { %3086 = vmatprep.subr.bf16.mxu1 %v3764_v55  ;;  %v1461_v55 = vld [vmem:[#allocation18 + $0x7f0] sm:$0xff] }
 0x4b9   :  { %3005 = vmatpush1.bf16.msra.mxu0 %v3761_v37  ;;  %v3826_v37 = vcombine.high %v1457_v54, %v1461_v55 }
 0x4ba   :  { %3087 = vmatpush1.bf16.msra.mxu1 %v3763_v38  ;;  %3006 = vmatprep.subr.bf16.mxu0 %v3770_v40  ;;  %v3828_v38 = vcombine.high %v1458_v56, %v1462_v4  ;;  %v3825_v40 = vcombine.low %v1457_v54, %v1461_v55 }
 0x4bb   :  { %3088 = vmatprep.subr.bf16.mxu1 %v3772_v39  ;;  %v3827_v39 = vcombine.low %v1458_v56, %v1462_v4 }
 0x4bd   :  { %3007 = vmatpush1.bf16.msra.mxu0 %v3769_v21  ;;  %v1480_v21 = vrot.slane %v4805_v8, %v4743_v5 }
 0x4be   :  { %3089 = vmatpush1.bf16.msra.mxu1 %v3771_v43  ;;  %3008 = vmatprep.subr.bf16.mxu0 %v3778_v10 }
 0x4bf   :  { %3090 = vmatprep.subr.bf16.mxu1 %v3780_v12 }
 0x4c1   :  { %3009 = vmatpush1.bf16.msra.mxu0 %v3777_v16 }
 0x4c2   :  { %3091 = vmatpush1.bf16.msra.mxu1 %v3779_v62  ;;  %3010 = vmatprep.subr.bf16.mxu0 %v3786_v17 }
 0x4c3   :  { %3092 = vmatprep.subr.bf16.mxu1 %v3788_v23 }
 0x4c5   :  { %3011 = vmatpush1.bf16.msra.mxu0 %v3785_v22 }
 0x4c6   :  { %3093 = vmatpush1.bf16.msra.mxu1 %v3787_v24  ;;  %3012 = vmatprep.subr.bf16.mxu0 %v3794_v30 }
 0x4c7   :  { %3094 = vmatprep.subr.bf16.mxu1 %v3796_v25 }
 0x4c9   :  { %3013 = vmatpush1.bf16.msra.mxu0 %v3793_v31 }
 0x4ca   :  { %3095 = vmatpush1.bf16.msra.mxu1 %v3795_v32  ;;  %3014 = vmatprep.subr.bf16.mxu0 %v3802_v33 }
 0x4cb   :  { %3096 = vmatprep.subr.bf16.mxu1 %v3804_v34 }
 0x4cd   :  { %3015 = vmatpush1.bf16.msra.mxu0 %v3801_v59 }
 0x4ce   :  { %3097 = vmatpush1.bf16.msra.mxu1 %v3803_v60  ;;  %3016 = vmatprep.subr.bf16.mxu0 %v3810_v61 }
 0x4cf   :  { %3098 = vmatprep.subr.bf16.mxu1 %v3812_v63 }
 0x4d1   :  { %3017 = vmatpush1.bf16.msra.mxu0 %v3809_v51 }
 0x4d2   :  { %3099 = vmatpush1.bf16.msra.mxu1 %v3811_v52  ;;  %3018 = vmatprep.subr.bf16.mxu0 %v3818_v11 }
 0x4d3   :  { %3100 = vmatprep.subr.bf16.mxu1 %v3820_v53 }
 0x4d5   :  { %3019 = vmatpush1.bf16.msra.mxu0 %v3817_v6 }
 0x4d6   :  { %3101 = vmatpush1.bf16.msra.mxu1 %v3819_v7  ;;  %3020 = vmatprep.subr.bf16.mxu0 %v3826_v37 }
 0x4d7   :  { %3102 = vmatprep.subr.bf16.mxu1 %v3828_v38 }
 0x4d9   :  { %3021 = vmatpush1.bf16.msra.mxu0 %v3825_v40 }
 0x4da   :  { %3103 = vmatpush1.bf16.msra.mxu1 %v3827_v39 }
 0x4dc   :  { %3023 = vmatmul.mubr.bf16.vlgmr.msra.gmra.mrb[12].mxu0 %v4793_v1 }
 0x4dd   :  { %3105 = vmatmul.mubr.bf16.vlgmr.msra.gmra.mrb[12].mxu1 %v4793_v1 }
 0x52f   :  { %v2860_v43 = vpop.f32.mrb[8].mxu0  ;;  %v2942_v10 = vpop.f32.mrb[8].mxu1 }
 0x530   :  { %v3862_v12 = vadd.f32 %v2860_v43, %v1468_v9  ;;  %v3864_v58 = vadd.f32 %v2942_v10, %v1476_v42  ;;  %v2862_v13 = vpop.f32.mrb[9].mxu0  ;;  %v2944_v1 = vpop.f32.mrb[9].mxu1 }
 0x531   :  { %v3863_v14 = vadd.f32 %v2862_v13, %v1472_v57  ;;  %v3865_v15 = vadd.f32 %v2944_v1, %v1480_v21  ;;  %v2864_v16 = vpop.f32.mrb[10].mxu0  ;;  %v2946_v62 = vpop.f32.mrb[10].mxu1 }
 0x532   :  { %v3113_v17 = vsel %vm487_vm2, %v3862_v12, 0.0  ;;  %v3127_v23 = vsel %vm487_vm2, %v3864_v58, 0.0  ;;  %v2865_v18 = vpop.f32.mrb[11].mxu0  ;;  %v2947_v19 = vpop.f32.mrb[11].mxu1 }
 0x533   :  { %v3114_v2 = vrot.slane %v3113_v17, 4  ;;  %v3128_v20 = vrot.slane %v3127_v23, 4  ;;  %v3120_v22 = vsel %vm487_vm2, %v3863_v14, 0.0  ;;  %v3134_v24 = vsel %vm487_vm2, %v3865_v15, 0.0 }
 0x534   :  { %v3121_v30 = vrot.slane %v3120_v22, 4  ;;  %v3135_v25 = vrot.slane %v3134_v24, 4 }
 0x535   :  { %v3115_v26 = vadd.f32 %v3114_v2, %v3113_v17  ;;  %v3129_v27 = vadd.f32 %v3128_v20, %v3127_v23 }
 0x536   :  { %v3122_v28 = vadd.f32 %v3121_v30, %v3120_v22  ;;  %v3136_v29 = vadd.f32 %v3135_v25, %v3134_v24 }
 0x537   :  { %v3116_v31 = vrot.slane %v3115_v26, 2  ;;  %v3130_v32 = vrot.slane %v3129_v27, 2 }
 0x538   :  { %v3123_v33 = vrot.slane %v3122_v28, 2  ;;  %v3137_v34 = vrot.slane %v3136_v29, 2 }
 0x539   :  { %v3117_v35 = vadd.f32 %v3116_v31, %v3115_v26  ;;  %v3131_v36 = vadd.f32 %v3130_v32, %v3129_v27 }
 0x53a   :  { %v3124_v41 = vadd.f32 %v3123_v33, %v3122_v28  ;;  %v3138_v44 = vadd.f32 %v3137_v34, %v3136_v29 }
 0x53b   :  { %v3118_v59 = vrot.slane %v3117_v35, 1  ;;  %v3132_v60 = vrot.slane %v3131_v36, 1 }
 0x53c   :  { %v3125_v61 = vrot.slane %v3124_v41, 1  ;;  %v3139_v63 = vrot.slane %v3138_v44, 1 }
 0x53d   :  { %v3119_v0 = vadd.f32 %v3118_v59, %v3117_v35  ;;  %v3133_v45 = vadd.f32 %v3132_v60, %v3131_v36 }
 0x53e   :  { %v3126_v48 = vadd.f32 %v3125_v61, %v3124_v41  ;;  %v3140_v50 = vadd.f32 %v3139_v63, %v3138_v44  ;;  %v4831_v41 = vld [vmem:[#allocation21] sm:$0xff]  ;;  %v4833_v44 = vld [vmem:[#allocation22] sm:$0xff] }
 0x53f   :  { %v3169_v51 = vmul.f32 0.5, %v3119_v0  ;;  %v3171_v52 = vmul.f32 0.5, %v3133_v45  ;;  %v3286_v59 = vrot.slane %v4831_v41, %v4702_v47  ;;  %v3294_v61 = vrot.slane %v4831_v41, %v4740_v3 }
 0x540   :  { %v3170_v11 = vmul.f32 0.5, %v3126_v48  ;;  %v3172_v53 = vmul.f32 0.5, %v3140_v50  ;;  %v3336_v45 = vrot.slane %v4833_v44, %v4702_v47  ;;  %v3290_v48 = vrot.slane %v4831_v41, %v4705_v49 }
 0x541   :  { %v3177_v54 = vsub.f32 %v3862_v12, %v3169_v51  ;;  %v3179_v55 = vsub.f32 %v3864_v58, %v3171_v52  ;;  %v3344_v52 = vrot.slane %v4833_v44, %v4740_v3  ;;  %v3340_v47 = vrot.slane %v4833_v44, %v4705_v49 }
 0x542   :  { %v4819_v56 = vsub.f32 %v3863_v14, %v3170_v11  ;;  %v4821_v4 = vsub.f32 %v3865_v15, %v3172_v53  ;;  %v4417_v11 = vmov 1966171168  }
 0x543   :  { %v3185_v6 = vmul.f32 %v3177_v54, %v3177_v54  ;;  %v3187_v7 = vmul.f32 %v3179_v55, %v3179_v55  ;;  %v3426_v53 = vunpack.c.l.s4 %v4417_v11 }
 0x544   :  { %v3186_v37 = vmul.f32 %v4819_v56, %v4819_v56  ;;  %v3188_v38 = vmul.f32 %v4821_v4, %v4821_v4 }
 0x545   :  { %v3193_v40 = vsel %vm487_vm2, %v3185_v6, 0.0  ;;  %v3207_v39 = vsel %vm487_vm2, %v3187_v7, 0.0  ;;  %v3298_v6 = vrot.slane %v4831_v41, %v4743_v5 }
 0x546   :  { %v3194_v9 = vrot.slane %v3193_v40, 4  ;;  %v3208_v42 = vrot.slane %v3207_v39, 4  ;;  %v3200_v57 = vsel %vm487_vm2, %v3186_v37, 0.0  ;;  %v3214_v21 = vsel %vm487_vm2, %v3188_v38, 0.0 }
 0x547   :  { %v3201_v43 = vrot.slane %v3200_v57, 4  ;;  %v3215_v10 = vrot.slane %v3214_v21, 4 }
 0x548   :  { %v3195_v12 = vadd.f32 %v3194_v9, %v3193_v40  ;;  %v3209_v58 = vadd.f32 %v3208_v42, %v3207_v39  ;;  %v3427_v42 = vunpack.c.0.s8 %v3426_v53 }
 0x549   :  { %v3202_v13 = vadd.f32 %v3201_v43, %v3200_v57  ;;  %v3216_v1 = vadd.f32 %v3215_v10, %v3214_v21 }
 0x54a   :  { %v3196_v14 = vrot.slane %v3195_v12, 2  ;;  %v3210_v15 = vrot.slane %v3209_v58, 2 }
 0x54b   :  { %v3203_v16 = vrot.slane %v3202_v13, 2  ;;  %v3217_v62 = vrot.slane %v3216_v1, 2 }
 0x54c   :  { %v3197_v17 = vadd.f32 %v3196_v14, %v3195_v12  ;;  %v3211_v23 = vadd.f32 %v3210_v15, %v3209_v58 }
 0x54d   :  { %v3204_v18 = vadd.f32 %v3203_v16, %v3202_v13  ;;  %v3218_v19 = vadd.f32 %v3217_v62, %v3216_v1 }
 0x54e   :  { %v3198_v2 = vrot.slane %v3197_v17, 1  ;;  %v3212_v20 = vrot.slane %v3211_v23, 1 }
 0x54f   :  { %v3205_v22 = vrot.slane %v3204_v18, 1  ;;  %v3219_v24 = vrot.slane %v3218_v19, 1 }
 0x550   :  { %v3199_v30 = vadd.f32 %v3198_v2, %v3197_v17  ;;  %v3213_v25 = vadd.f32 %v3212_v20, %v3211_v23  ;;  %v4865_v23 = vsub.s32 4, %v4699_v46  ;;  %v4874_v2 = vsub.s32 7, %v4699_v46 }
 0x551   :  { %v3206_v26 = vadd.f32 %v3205_v22, %v3204_v18  ;;  %v3220_v27 = vadd.f32 %v3219_v24, %v3218_v19  ;;  %v4868_v18 = vsub.s32 6, %v4699_v46  ;;  %v4871_v19 = vsub.s32 5, %v4699_v46 }
 0x552   :  { %v3249_v28 = vmul.f32 0.5, %v3199_v30  ;;  %v3251_v29 = vmul.f32 0.5, %v3213_v25  ;;  %v1484_v20 = vrot.slane %v4805_v8, %v4865_v23  ;;  %v1496_v30 = vrot.slane %v4805_v8, %v4874_v2 }
 0x553   :  { %v3250_v31 = vmul.f32 0.5, %v3206_v26  ;;  %v3252_v32 = vmul.f32 0.5, %v3220_v27  ;;  %v1492_v22 = vrot.slane %v4805_v8, %v4868_v18  ;;  %v1488_v24 = vrot.slane %v4805_v8, %v4871_v19 }
 0x554   :  { %v3257_v33 = vadd.f32 0.8, %v3249_v28  ;;  %v3259_v34 = vadd.f32 0.8, %v3251_v29 }
 0x555   :  { %v3258_v35 = vadd.f32 0.8, %v3250_v31  ;;  %v3260_v36 = vadd.f32 0.8, %v3252_v32 }
 0x556   :  { %4052 = vrsqrt.f32 %v3257_v33 }
 0x557   :  { %4054 = vrsqrt.f32 %v3259_v34 }
 0x558   :  { %4056 = vrsqrt.f32 %v3258_v35 }
 0x559   :  { %4058 = vrsqrt.f32 %v3260_v36 }
 0x560   :  { %v4053_v60 = vpop.eup %4052 }
 0x561   :  { %v4055_v63 = vpop.eup %4054  ;;  %v3273_v0 = vmul.f32 %v4053_v60, %v3177_v54 }
 0x562   :  { %v4057_v50 = vpop.eup %4056  ;;  %v3275_v51 = vmul.f32 %v4055_v63, %v3179_v55  ;;  %v3348_v55 = vrot.slane %v4833_v44, %v4743_v5 }
 0x563   :  { %v4059_v7 = vpop.eup %4058  ;;  %v3323_v37 = vmul.f32 %v3286_v59, %v3273_v0  ;;  %v3274_v54 = vmul.f32 %v4057_v50, %v4819_v56 }
 0x564   :  { %v3325_v38 = vmul.f32 %v3294_v61, %v3275_v51  ;;  %v3276_v40 = vmul.f32 %v4059_v7, %v4821_v4  ;;  %v4854_v4 = vsub.s32 %v3427_v42, %v4699_v46 }
 0x565   :  { %v3373_v39 = vadd.f32 %v3336_v45, %v3323_v37  ;;  %v3324_v3 = vmul.f32 %v3290_v48, %v3274_v54 }
 0x566   :  { %v3375_v9 = vadd.f32 %v3344_v52, %v3325_v38  ;;  %v3326_v57 = vmul.f32 %v3298_v6, %v3276_v40 }
 0x567   :  { %vm3381_vm9 = vcmp.ge.f32.partialorder %v3373_v39, 0.0  ;;  %v3389_v21 = vmul.f32 0.2, %v3373_v39  ;;  %v3374_v43 = vadd.f32 %v3340_v47, %v3324_v3 }
 0x568   :  { %vm3383_vm10 = vcmp.ge.f32.partialorder %v3375_v9, 0.0  ;;  %v3391_v10 = vmul.f32 0.2, %v3375_v9  ;;  %v3376_v56 = vadd.f32 %v3348_v55, %v3326_v57 }
 0x569   :  { %v3397_v12 = vsel %vm3381_vm9, %v3373_v39, %v3389_v21  ;;  %vm3382_vm11 = vcmp.ge.f32.partialorder %v3374_v43, 0.0  ;;  %v3390_v49 = vmul.f32 0.2, %v3374_v43 }
 0x56a   :  { %v3399_v58 = vsel %vm3383_vm10, %v3375_v9, %v3391_v10  ;;  %vm3384_vm12 = vcmp.ge.f32.partialorder %v3376_v56, 0.0  ;;  %v3392_v5 = vmul.f32 0.2, %v3376_v56 }
 0x56b   :  { %v3398_v13 = vsel %vm3382_vm11, %v3374_v43, %v3390_v49 }
 0x56c   :  { %v3829_v1 = vpack.c.bf16 %v3398_v13, %v3397_v12  ;;  %v3400_v14 = vsel %vm3384_vm12, %v3376_v56, %v3392_v5 }
 0x56d   :  { %v3830_v15 = vpack.c.bf16 %v3400_v14, %v3399_v58 }
 0x56e   :  { %v4857_v16 = vrot.slane %v3829_v1, %v4854_v4 }
 0x56f   :  { %v4860_v62 = vrot.slane %v3830_v15, %v4854_v4 }
 0x571   :  { %v3453_v17 = vcombine.low %v4857_v16, %v4860_v62 }
 0x5af   :  { %v3024_v25 = vpop.f32.mrb[12].mxu0 }
 0x5b0   :  { %v3866_v26 = vadd.f32 %v3024_v25, %v1484_v20  ;;  %v3106_v27 = vpop.f32.mrb[12].mxu1  ;;  %v3026_v28 = vpop.f32.mrb[13].mxu0 }
 0x5b1   :  { %v3868_v29 = vadd.f32 %v3106_v27, %v1492_v22  ;;  %v3867_v31 = vadd.f32 %v3026_v28, %v1488_v24  ;;  %v3108_v46 = vpop.f32.mrb[13].mxu1  ;;  %v3028_v32 = vpop.f32.mrb[14].mxu0 }
 0x5b2   :  { %v3141_v33 = vsel %vm487_vm2, %v3866_v26, 0.0  ;;  %v3869_v34 = vadd.f32 %v3108_v46, %v1496_v30  ;;  %v3110_v35 = vpop.f32.mrb[14].mxu1  ;;  %v3029_v36 = vpop.f32.mrb[15].mxu0 }
 0x5b3   :  { %v3142_v59 = vrot.slane %v3141_v33, 4  ;;  %v3155_v60 = vsel %vm487_vm2, %v3868_v29, 0.0  ;;  %v3148_v61 = vsel %vm487_vm2, %v3867_v31, 0.0  ;;  %v3111_v63 = vpop.f32.mrb[15].mxu1 }
 0x5b4   :  { %v3156_v8 = vrot.slane %v3155_v60, 4  ;;  %v3149_v0 = vrot.slane %v3148_v61, 4  ;;  %v3162_v45 = vsel %vm487_vm2, %v3869_v34, 0.0 }
 0x5b5   :  { %v3143_v48 = vadd.f32 %v3142_v59, %v3141_v33  ;;  %v3163_v50 = vrot.slane %v3162_v45, 4 }
 0x5b6   :  { %v3157_v51 = vadd.f32 %v3156_v8, %v3155_v60  ;;  %v3150_v52 = vadd.f32 %v3149_v0, %v3148_v61 }
 0x5b7   :  { %v3144_v11 = vrot.slane %v3143_v48, 2  ;;  %v3164_v53 = vadd.f32 %v3163_v50, %v3162_v45 }
 0x5b8   :  { %v3158_v6 = vrot.slane %v3157_v51, 2  ;;  %v3151_v7 = vrot.slane %v3150_v52, 2 }
 0x5b9   :  { %v3145_v37 = vadd.f32 %v3144_v11, %v3143_v48  ;;  %v3165_v54 = vrot.slane %v3164_v53, 2 }
 0x5ba   :  { %v3159_v47 = vadd.f32 %v3158_v6, %v3157_v51  ;;  %v3152_v38 = vadd.f32 %v3151_v7, %v3150_v52 }
 0x5bb   :  { %v3146_v40 = vrot.slane %v3145_v37, 1  ;;  %v3166_v55 = vadd.f32 %v3165_v54, %v3164_v53 }
 0x5bc   :  { %v3160_v39 = vrot.slane %v3159_v47, 1  ;;  %v3153_v3 = vrot.slane %v3152_v38, 1 }
 0x5bd   :  { %v3147_v9 = vadd.f32 %v3146_v40, %v3145_v37  ;;  %v3167_v42 = vrot.slane %v3166_v55, 1 }
 0x5be   :  { %v3161_v57 = vadd.f32 %v3160_v39, %v3159_v47  ;;  %v3154_v21 = vadd.f32 %v3153_v3, %v3152_v38  ;;  %v3302_v3 = vrot.slane %v4831_v41, %v4865_v23 }
 0x5bf   :  { %v3173_v43 = vmul.f32 0.5, %v3147_v9  ;;  %v3168_v10 = vadd.f32 %v3167_v42, %v3166_v55  ;;  %v3310_v42 = vrot.slane %v4831_v41, %v4868_v18 }
 0x5c0   :  { %v3175_v56 = vmul.f32 0.5, %v3161_v57  ;;  %v3174_v12 = vmul.f32 0.5, %v3154_v21 }
 0x5c1   :  { %v3181_v49 = vsub.f32 %v3866_v26, %v3173_v43  ;;  %v3176_v58 = vmul.f32 0.5, %v3168_v10  ;;  %v3352_v43 = vrot.slane %v4833_v44, %v4865_v23  ;;  %v3306_v10 = vrot.slane %v4831_v41, %v4871_v19 }
 0x5c2   :  { %v3183_v5 = vsub.f32 %v3868_v29, %v3175_v56  ;;  %v3182_v13 = vsub.f32 %v3867_v31, %v3174_v12  ;;  %v3364_v23 = vrot.slane %v4833_v44, %v4874_v2 }
 0x5c3   :  { %v3189_v1 = vmul.f32 %v3181_v49, %v3181_v49  ;;  %v3184_v14 = vsub.f32 %v3869_v34, %v3176_v58  ;;  %v3360_v58 = vrot.slane %v4833_v44, %v4868_v18 }
 0x5c4   :  { %v3191_v15 = vmul.f32 %v3183_v5, %v3183_v5  ;;  %v3190_v20 = vmul.f32 %v3182_v13, %v3182_v13 }
 0x5c5   :  { %v3221_v22 = vsel %vm487_vm2, %v3189_v1, 0.0  ;;  %v3192_v24 = vmul.f32 %v3184_v14, %v3184_v14  ;;  %v3314_v1 = vrot.slane %v4831_v41, %v4874_v2 }
 0x5c6   :  { %v3222_v30 = vrot.slane %v3221_v22, 4  ;;  %v3235_v25 = vsel %vm487_vm2, %v3191_v15, 0.0  ;;  %v3228_v27 = vsel %vm487_vm2, %v3190_v20, 0.0 }
 0x5c7   :  { %v3236_v28 = vrot.slane %v3235_v25, 4  ;;  %v3229_v46 = vrot.slane %v3228_v27, 4  ;;  %v3242_v32 = vsel %vm487_vm2, %v3192_v24, 0.0 }
 0x5c8   :  { %v3223_v26 = vadd.f32 %v3222_v30, %v3221_v22  ;;  %v3243_v33 = vrot.slane %v3242_v32, 4 }
 0x5c9   :  { %v3237_v29 = vadd.f32 %v3236_v28, %v3235_v25  ;;  %v3230_v31 = vadd.f32 %v3229_v46, %v3228_v27 }
 0x5ca   :  { %v3224_v35 = vrot.slane %v3223_v26, 2  ;;  %v3244_v34 = vadd.f32 %v3243_v33, %v3242_v32 }
 0x5cb   :  { %v3238_v36 = vrot.slane %v3237_v29, 2  ;;  %v3231_v59 = vrot.slane %v3230_v31, 2 }
 0x5cc   :  { %v3225_v60 = vadd.f32 %v3224_v35, %v3223_v26  ;;  %v3245_v61 = vrot.slane %v3244_v34, 2 }
 0x5cd   :  { %v3239_v63 = vadd.f32 %v3238_v36, %v3237_v29  ;;  %v3232_v8 = vadd.f32 %v3231_v59, %v3230_v31  ;;  %v3461_v36 = vrot.slane %v3453_v17, %v4854_v4 }
 0x5ce   :  { %v3226_v0 = vrot.slane %v3225_v60, 1  ;;  %v3246_v45 = vadd.f32 %v3245_v61, %v3244_v34 }
 0x5cf   :  { %v3240_v48 = vrot.slane %v3239_v63, 1  ;;  %v3233_v50 = vrot.slane %v3232_v8, 1 }
 0x5d0   :  { %v3227_v51 = vadd.f32 %v3226_v0, %v3225_v60  ;;  %v3247_v52 = vrot.slane %v3246_v45, 1 }
 0x5d1   :  { %v3241_v11 = vadd.f32 %v3240_v48, %v3239_v63  ;;  %v3234_v53 = vadd.f32 %v3233_v50, %v3232_v8 }
 0x5d2   :  { %v3253_v6 = vmul.f32 0.5, %v3227_v51  ;;  %v3248_v7 = vadd.f32 %v3247_v52, %v3246_v45 }
 0x5d3   :  { %v3255_v37 = vmul.f32 0.5, %v3241_v11  ;;  %v3254_v54 = vmul.f32 0.5, %v3234_v53 }
 0x5d4   :  { %v3261_v47 = vadd.f32 0.8, %v3253_v6  ;;  %v3256_v38 = vmul.f32 0.5, %v3248_v7 }
 0x5d5   :  { %v3263_v40 = vadd.f32 0.8, %v3255_v37  ;;  %v3262_v55 = vadd.f32 0.8, %v3254_v54 }
 0x5d6   :  { %4060 = vrsqrt.f32 %v3261_v47  ;;  %v3264_v39 = vadd.f32 0.8, %v3256_v38 }
 0x5d7   :  { %4062 = vrsqrt.f32 %v3263_v40 }
 0x5d8   :  { %4064 = vrsqrt.f32 %v3262_v55 }
 0x5d9   :  { %4066 = vrsqrt.f32 %v3264_v39 }
 0x5e0   :  { %v4061_v9 = vpop.eup %4060 }
 0x5e1   :  { %v4063_v57 = vpop.eup %4062  ;;  %v3277_v21 = vmul.f32 %v4061_v9, %v3181_v49  ;;  %v3356_v49 = vrot.slane %v4833_v44, %v4871_v19 }
 0x5e2   :  { %v4065_v56 = vpop.eup %4064  ;;  %v3279_v12 = vmul.f32 %v4063_v57, %v3183_v5 }
 0x5e3   :  { %v4067_v15 = vpop.eup %4066  ;;  %v3327_v20 = vmul.f32 %v3302_v3, %v3277_v21  ;;  %v3278_v22 = vmul.f32 %v4065_v56, %v3182_v13 }
 0x5e4   :  { %v3329_v24 = vmul.f32 %v3310_v42, %v3279_v12  ;;  %v3280_v30 = vmul.f32 %v4067_v15, %v3184_v14 }
 0x5e5   :  { %v3377_v25 = vadd.f32 %v3352_v43, %v3327_v20  ;;  %v3328_v27 = vmul.f32 %v3306_v10, %v3278_v22 }
 0x5e6   :  { %v3379_v5 = vadd.f32 %v3360_v58, %v3329_v24  ;;  %v3330_v28 = vmul.f32 %v3314_v1, %v3280_v30 }
 0x5e7   :  { %vm3385_vm13 = vcmp.ge.f32.partialorder %v3377_v25, 0.0  ;;  %v3393_v18 = vmul.f32 0.2, %v3377_v25  ;;  %v3378_v46 = vadd.f32 %v3356_v49, %v3328_v27 }
 0x5e8   :  { %vm3387_vm14 = vcmp.ge.f32.partialorder %v3379_v5, 0.0  ;;  %v3395_v41 = vmul.f32 0.2, %v3379_v5  ;;  %v3380_v32 = vadd.f32 %v3364_v23, %v3330_v28 }
 0x5e9   :  { %v3401_v26 = vsel %vm3385_vm13, %v3377_v25, %v3393_v18  ;;  %vm3386_vm15 = vcmp.ge.f32.partialorder %v3378_v46, 0.0  ;;  %v3394_v13 = vmul.f32 0.2, %v3378_v46 }
 0x5ea   :  { %v3403_v33 = vsel %vm3387_vm14, %v3379_v5, %v3395_v41  ;;  %vm3388_vm0 = vcmp.ge.f32.partialorder %v3380_v32, 0.0  ;;  %v3396_v19 = vmul.f32 0.2, %v3380_v32 }
 0x5eb   :  { %v3402_v14 = vsel %vm3386_vm15, %v3378_v46, %v3394_v13 }
 0x5ec   :  { %v3831_v29 = vpack.c.bf16 %v3402_v14, %v3401_v26  ;;  %v3404_v31 = vsel %vm3388_vm0, %v3380_v32, %v3396_v19 }
 0x5ed   :  { %v3832_v44 = vpack.c.bf16 %v3404_v31, %v3403_v33 }
 0x5ee   :  { %v3445_v2 = vrot.slane %v3831_v29, %v4854_v4 }
 0x5ef   :  { %v3452_v35 = vrot.slane %v3832_v44, %v4854_v4 }
 0x5f1   :  { %v3454_v34 = vcombine.low %v3445_v2, %v3452_v35 }
 0x5f3   :  { %v3468_v59 = vrot.slane %v3454_v34, %v4854_v4 }
 0x5f5   :  { %v3469_v60 = vcombine.low %v3461_v36, %v3468_v59 }
 0x5f7   :  { %3471 = vst [vmem:[%s4933_s15] sm:$0xff] %v3469_v60 }
 0x5f8   :  { %3476 = vsyncpa [#allocation3], 1 }
 0x5f9   :  { %3477 = vsyncpa [#allocation5], 1 }
 0x5fa   :  { %3478 = vsyncpa [#allocation8], 1 }
 0x5fb   :  { %3479 = vsyncpa [#allocation11], 1 }
 0x5fc   :  { %3480 = vsyncpa [#allocation14], 1 }
 0x5fd   :  { %3481 = vsyncpa [#allocation17], 1 }
 0x5fe   :  { %3482 = vsyncpa [#allocation20], 1 }
 0x5ff   :  { %3483 = vsyncpa [#allocation23], 1 }

</bundles_post_ra>
